<compile_context>
chip_gen: v6e
topology: v6e:2x2x1
jax: 0.10.0
libtpu: 0.0.40
codegen_flags: <defaults>
</compile_context>

<pallas_src>
import functools
import math

import jax
import jax.numpy as jnp
from jax import lax
from jax.experimental import pallas as pl
from jax.experimental.pallas import tpu as pltpu

LN_EPS = 1e-12


# ---------------------------------------------------------------------------
# Helpers
# ---------------------------------------------------------------------------

def _pick_tile(dim, candidates=(512, 256, 128)):
    """Largest candidate tile that evenly divides `dim`; otherwise the full dim."""
    for c in candidates:
        if dim >= c and dim % c == 0:
            return c
    return dim


def _layer_norm(x, gamma, beta, eps):
    mean = jnp.mean(x, axis=-1, keepdims=True)
    var = jnp.mean((x - mean) ** 2, axis=-1, keepdims=True)
    return (x - mean) * lax.rsqrt(var + eps) * gamma + beta


# ---------------------------------------------------------------------------
# Pallas kernels
# ---------------------------------------------------------------------------

def _mha_ln_block_kernel(*refs, n_heads, causal, self_attn, eps):
    """Fused multi-head-attention block for one batch element per grid step.

    Does: Q/K/V projections -> scaled-dot-product attention over all heads ->
    out-projection -> residual add -> LayerNorm, entirely in VMEM.

    Weights arrive head-split ([H, D, dh] for Q/K/V, [H, dh, D] for the output
    projection) so the head axis is a leading batch dim of every dot_general:
    no per-head loop, no lane slicing, no reshape/concatenate of the lane axis.
    """
    if self_attn:
        (xq_ref, m_ref, wq_ref, bq_ref, wk_ref, bk_ref, wv_ref, bv_ref,
         wo_ref, bo_ref, g_ref, b_ref, o_ref) = refs
        xkv_ref = xq_ref
    else:
        (xq_ref, xkv_ref, m_ref, wq_ref, bq_ref, wk_ref, bk_ref, wv_ref,
         bv_ref, wo_ref, bo_ref, g_ref, b_ref, o_ref) = refs

    xq = xq_ref[0].astype(jnp.float32)                      # [Sq, D]
    xkv = xq if self_attn else xkv_ref[0].astype(jnp.float32)  # [Sk, D]
    sq, d = xq.shape
    sk = xkv.shape[0]
    dh = d // n_heads
    scale = 1.0 / math.sqrt(dh)

    # Head-batched projections: [H, S, D] x [H, D, dh] -> [H, S, dh].
    xq_b = jnp.broadcast_to(xq[None], (n_heads, sq, d))
    xkv_b = xq_b if self_attn else jnp.broadcast_to(xkv[None], (n_heads, sk, d))

    qh = jnp.einsum("hsd,hdf->hsf", xq_b, wq_ref[...],
                    preferred_element_type=jnp.float32) + bq_ref[...]
    kh = jnp.einsum("hsd,hdf->hsf", xkv_b, wk_ref[...],
                    preferred_element_type=jnp.float32) + bk_ref[...]
    vh = jnp.einsum("hsd,hdf->hsf", xkv_b, wv_ref[...],
                    preferred_element_type=jnp.float32) + bv_ref[...]

    # Scores for all heads at once: [H, Sq, Sk].
    s = jnp.einsum("hqd,hkd->hqk", qh, kh,
                   preferred_element_type=jnp.float32) * scale

    # Compact mask: pad-row mask [Sq, 1] shipped from HBM; causal tril built here.
    valid = jnp.broadcast_to(m_ref[0] > 0.0, (sq, sk))
    if causal:
        qi = lax.broadcasted_iota(jnp.int32, (sq, sk), 0)
        ki = lax.broadcasted_iota(jnp.int32, (sq, sk), 1)
        valid = jnp.logical_and(valid, qi >= ki)
    s = jnp.where(valid[None], s, -10000.0)                 # masked_fill(mask==0, -1e4)

    # Softmax (exact reciprocal for parity with a reference divide).
    s = s - jnp.max(s, axis=-1, keepdims=True)
    p = jnp.exp(s)
    p = p * pl.reciprocal(jnp.sum(p, axis=-1, keepdims=True), approx=False)

    # Attention output and head-batched out-projection (+ sum over heads).
    ah = jnp.einsum("hqk,hkd->hqd", p, vh,
                    preferred_element_type=jnp.float32)     # [H, Sq, dh]
    oh = jnp.einsum("hqd,hdf->hqf", ah, wo_ref[...],
                    preferred_element_type=jnp.float32)     # [H, Sq, D]
    attn_out = jnp.sum(oh, axis=0) + bo_ref[...]            # [Sq, D]

    # Residual add + LayerNorm fused into the epilogue.
    y = _layer_norm(attn_out + xq, g_ref[...], b_ref[...], eps)
    o_ref[0] = y.astype(o_ref.dtype)


def _ffn_ln_block_kernel(x_ref, w1_ref, b1_ref, w2_ref, b2_ref, g_ref, b_ref,
                         o_ref, *, eps):
    """Fused position-wise FFN (w1 -> ReLU -> w2) + residual add + LayerNorm."""
    x = x_ref[...].astype(jnp.float32)
    h = jnp.dot(x, w1_ref[...], preferred_element_type=jnp.float32) + b1_ref[...]
    h = jnp.maximum(h, 0.0)
    y = jnp.dot(h, w2_ref[...], preferred_element_type=jnp.float32) + b2_ref[...]
    y = _layer_norm(y + x, g_ref[...], b_ref[...], eps)
    o_ref[...] = y.astype(o_ref.dtype)


def _linear_direct_kernel(x_ref, w_ref, b_ref, o_ref, *, activation):
    """Single-K-step GEMM: dot + bias (+ ReLU) written straight to the output."""
    y = jnp.dot(x_ref[...], w_ref[...], preferred_element_type=jnp.float32)
    y = y + b_ref[...].astype(jnp.float32)
    if activation == "relu":
        y = jnp.maximum(y, 0.0)
    o_ref[...] = y.astype(o_ref.dtype)


def _linear_acc_kernel(x_ref, w_ref, b_ref, o_ref, acc_ref, *, activation):
    """K-gridded GEMM with f32 VMEM accumulator; bias/ReLU fused in the epilogue."""
    @pl.when(pl.program_id(2) == 0)
    def _zero():
        acc_ref[...] = jnp.zeros_like(acc_ref)

    acc_ref[...] += jnp.dot(x_ref[...], w_ref[...],
                            preferred_element_type=jnp.float32)

    @pl.when(pl.program_id(2) == pl.num_programs(2) - 1)
    def _store():
        y = acc_ref[...] + b_ref[...].astype(jnp.float32)
        if activation == "relu":
            y = jnp.maximum(y, 0.0)
        o_ref[...] = y.astype(o_ref.dtype)


# ---------------------------------------------------------------------------
# Pallas wrappers
# ---------------------------------------------------------------------------

def mha_ln_block(x_q, x_kv, row_mask, p, gamma, beta, *, n_heads, causal,
                 self_attn):
    """Fused attention block.  x_q: [B,Sq,D] (also the residual), x_kv: [B,Sk,D],
    row_mask: [B,Sq,1] float (1 = keep query row, 0 = pad).

    NOTE: mirrors the reference module's mask orientation (pad mask applied along
    the *query* axis); cross-attention therefore assumes Sq == Sk, as the
    reference's broadcasting does.
    """
    B, Sq, D = x_q.shape
    Sk = x_kv.shape[1]
    H = n_heads
    dh = D // H

    def rep(shape):  # weight block replicated across the batch grid
        n = len(shape)
        return pl.BlockSpec(shape, lambda b: (0,) * n)

    in_specs = [pl.BlockSpec((1, Sq, D), lambda b: (b, 0, 0))]
    args = [x_q]
    if not self_attn:
        in_specs.append(pl.BlockSpec((1, Sk, D), lambda b: (b, 0, 0)))
        args.append(x_kv)
    in_specs += [
        pl.BlockSpec((1, Sq, 1), lambda b: (b, 0, 0)),
        rep((H, D, dh)), rep((H, 1, dh)),
        rep((H, D, dh)), rep((H, 1, dh)),
        rep((H, D, dh)), rep((H, 1, dh)),
        rep((H, dh, D)), rep((1, D)),
        rep((1, D)), rep((1, D)),
    ]
    args += [row_mask, p["wq"], p["bq"], p["wk"], p["bk"], p["wv"], p["bv"],
             p["wo"], p["bo"], gamma.reshape(1, D), beta.reshape(1, D)]

    kernel = functools.partial(_mha_ln_block_kernel, n_heads=n_heads,
                               causal=causal, self_attn=self_attn, eps=LN_EPS)
    return pl.pallas_call(
        kernel,
        grid=(B,),
        in_specs=in_specs,
        out_specs=pl.BlockSpec((1, Sq, D), lambda b: (b, 0, 0)),
        out_shape=jax.ShapeDtypeStruct((B, Sq, D), x_q.dtype),
        compiler_params=pltpu.CompilerParams(dimension_semantics=("parallel",)),
    )(*args)


def ffn_ln_block(x, p, gamma, beta):
    """Fused FFN + residual + LayerNorm.  x: [B, S, D]."""
    B, S, D = x.shape
    M = B * S
    Dh = p["w1"].shape[1]
    tm = _pick_tile(M)
    # TODO(synk): for large D/Dh, add a K grid axis (accumulator) instead of
    #             holding the full weights per step.
    out = pl.pallas_call(
        functools.partial(_ffn_ln_block_kernel, eps=LN_EPS),
        grid=(M // tm,),
        in_specs=[
            pl.BlockSpec((tm, D), lambda i: (i, 0)),
            pl.BlockSpec((D, Dh), lambda i: (0, 0)),
            pl.BlockSpec((1, Dh), lambda i: (0, 0)),
            pl.BlockSpec((Dh, D), lambda i: (0, 0)),
            pl.BlockSpec((1, D), lambda i: (0, 0)),
            pl.BlockSpec((1, D), lambda i: (0, 0)),
            pl.BlockSpec((1, D), lambda i: (0, 0)),
        ],
        out_specs=pl.BlockSpec((tm, D), lambda i: (i, 0)),
        out_shape=jax.ShapeDtypeStruct((M, D), x.dtype),
        compiler_params=pltpu.CompilerParams(dimension_semantics=("parallel",)),
    )(x.reshape(M, D), p["w1"], p["b1"].reshape(1, Dh), p["w2"],
      p["b2"].reshape(1, D), gamma.reshape(1, D), beta.reshape(1, D))
    return out.reshape(B, S, D)


def linear(x, w, b, activation=None):
    """x: [M, K] @ w: [K, N] + b: [N].  Direct store when K fits one step."""
    M, K = x.shape
    N = w.shape[1]
    tm = _pick_tile(M, (256, 128))
    tn = _pick_tile(N, (512, 256, 128))
    tk = _pick_tile(K, (512, 256, 128))
    if K // tk == 1:
        return pl.pallas_call(
            functools.partial(_linear_direct_kernel, activation=activation),
            grid=(M // tm, N // tn),
            in_specs=[
                pl.BlockSpec((tm, K), lambda i, j: (i, 0)),
                pl.BlockSpec((K, tn), lambda i, j: (0, j)),
                pl.BlockSpec((1, tn), lambda i, j: (0, j)),
            ],
            out_specs=pl.BlockSpec((tm, tn), lambda i, j: (i, j)),
            out_shape=jax.ShapeDtypeStruct((M, N), x.dtype),
            compiler_params=pltpu.CompilerParams(
                dimension_semantics=("parallel", "parallel")),
        )(x, w, b.reshape(1, N))
    return pl.pallas_call(
        functools.partial(_linear_acc_kernel, activation=activation),
        grid=(M // tm, N // tn, K // tk),
        in_specs=[
            pl.BlockSpec((tm, tk), lambda i, j, k: (i, k)),
            pl.BlockSpec((tk, tn), lambda i, j, k: (k, j)),
            pl.BlockSpec((1, tn), lambda i, j, k: (0, j)),
        ],
        out_specs=pl.BlockSpec((tm, tn), lambda i, j, k: (i, j)),
        out_shape=jax.ShapeDtypeStruct((M, N), x.dtype),
        scratch_shapes=[pltpu.VMEM((tm, tn), jnp.float32)],
        compiler_params=pltpu.CompilerParams(
            dimension_semantics=("parallel", "parallel", "arbitrary")),
    )(x, w, b.reshape(1, N))


# ---------------------------------------------------------------------------
# Transformer building blocks (thin JAX glue around the fused kernels)
# ---------------------------------------------------------------------------

def sinusoidal_pos_encoding(max_len, d_model):
    pos = jnp.arange(max_len, dtype=jnp.float32)[:, None]
    i = jnp.arange(0, d_model, 2, dtype=jnp.float32)
    angle = pos / jnp.power(10000.0, i / d_model)
    pe = jnp.zeros((max_len, d_model), jnp.float32)
    pe = pe.at[:, 0::2].set(jnp.sin(angle))
    pe = pe.at[:, 1::2].set(jnp.cos(angle))
    return pe


def embed(tokens, tok_emb, pos_enc):
    """tokens: [B, S] -> [B, S, D] (gather + pos-enc add left to XLA)."""
    S = tokens.shape[1]
    return jnp.take(tok_emb, tokens, axis=0) + pos_enc[:S][None, :, :]


def encoder_layer(x, src_row, p, n_heads):
    x = mha_ln_block(x, x, src_row, p["attn"], p["ln1_g"], p["ln1_b"],
                     n_heads=n_heads, causal=False, self_attn=True)
    x = ffn_ln_block(x, p["ffn"], p["ln2_g"], p["ln2_b"])
    return x


def decoder_layer(x, enc, trg_row, src_row, p, n_heads):
    x = mha_ln_block(x, x, trg_row, p["self_attn"], p["ln1_g"], p["ln1_b"],
                     n_heads=n_heads, causal=True, self_attn=True)
    x = mha_ln_block(x, enc, src_row, p["cross_attn"], p["ln2_g"], p["ln2_b"],
                     n_heads=n_heads, causal=False, self_attn=False)
    x = ffn_ln_block(x, p["ffn"], p["ln3_g"], p["ln3_b"])
    return x


def transformer_forward(params, src, trg, cfg):
    n_heads = cfg["n_heads"]
    # Compact per-query-row pad masks (reference orientation: mask query rows).
    src_row = (src != cfg["enc_pad_idx"]).astype(jnp.float32)[:, :, None]  # [B,Ss,1]
    trg_row = (trg != cfg["dec_pad_idx"]).astype(jnp.float32)[:, :, None]  # [B,St,1]

    # Encoder
    x = embed(src, params["enc_tok_emb"], params["pos_enc"])
    for lp in params["enc_layers"]:
        x = encoder_layer(x, src_row, lp, n_heads)
    enc = x

    # Decoder
    y = embed(trg, params["dec_tok_emb"], params["pos_enc"])
    for lp in params["dec_layers"]:
        y = decoder_layer(y, enc, trg_row, src_row, lp, n_heads)

    # Final projection (N padded to a lane-dense multiple of 128; slice outside).
    B, St, D = y.shape
    logits = linear(y.reshape(B * St, D), params["out_w"], params["out_b"])
    V = cfg["decode_vocab_size"]
    return logits[:, :V].reshape(B, St, V)


# ---------------------------------------------------------------------------
# Deterministic parameter initialization (attention weights pre-split per head)
# ---------------------------------------------------------------------------

def _init_attn(key, d_model, n_heads):
    dh = d_model // n_heads
    ks = jax.random.split(key, 4)
    mk = lambda k: jax.random.normal(k, (d_model, d_model), jnp.float32) * 0.02
    wq, wk, wv, wo = (mk(k) for k in ks)
    split_in = lambda w: w.reshape(d_model, n_heads, dh).transpose(1, 0, 2)  # [H,D,dh]
    return {
        "wq": split_in(wq), "wk": split_in(wk), "wv": split_in(wv),
        "bq": jnp.zeros((n_heads, 1, dh), jnp.float32),
        "bk": jnp.zeros((n_heads, 1, dh), jnp.float32),
        "bv": jnp.zeros((n_heads, 1, dh), jnp.float32),
        "wo": wo.reshape(n_heads, dh, d_model),                              # [H,dh,D]
        "bo": jnp.zeros((1, d_model), jnp.float32),
    }


def _init_ffn(key, d_model, d_hidden):
    k1, k2 = jax.random.split(key)
    return {"w1": jax.random.normal(k1, (d_model, d_hidden), jnp.float32) * 0.02,
            "b1": jnp.zeros((d_hidden,), jnp.float32),
            "w2": jax.random.normal(k2, (d_hidden, d_model), jnp.float32) * 0.02,
            "b2": jnp.zeros((d_model,), jnp.float32)}


def init_params(key, cfg):
    d_model = cfg["d_model"]
    n_heads = cfg["n_heads"]
    V = cfg["decode_vocab_size"]
    v_pad = ((V + 127) // 128) * 128          # lane-dense final projection
    keys = jax.random.split(key, 6)
    out_w = jax.random.normal(keys[2], (d_model, V), jnp.float32) * 0.02
    params = {
        "enc_tok_emb": jax.random.normal(keys[0], (cfg["vocab_size"], d_model), jnp.float32) * 0.02,
        "dec_tok_emb": jax.random.normal(keys[1], (cfg["vocab_size"], d_model), jnp.float32) * 0.02,
        "pos_enc": sinusoidal_pos_encoding(cfg["max_seq_len"], d_model),
        "out_w": jnp.zeros((d_model, v_pad), jnp.float32).at[:, :V].set(out_w),
        "out_b": jnp.zeros((v_pad,), jnp.float32),
        "enc_layers": [],
        "dec_layers": [],
    }
    ones = jnp.ones((d_model,), jnp.float32)
    zeros = jnp.zeros((d_model,), jnp.float32)
    for lk in jax.random.split(keys[3], cfg["n_layers"]):
        k1, k2 = jax.random.split(lk)
        params["enc_layers"].append({
            "attn": _init_attn(k1, d_model, n_heads),
            "ffn": _init_ffn(k2, d_model, cfg["d_hidden"]),
            "ln1_g": ones, "ln1_b": zeros, "ln2_g": ones, "ln2_b": zeros,
        })
    for lk in jax.random.split(keys[4], cfg["n_layers"]):
        k1, k2, k3 = jax.random.split(lk, 3)
        params["dec_layers"].append({
            "self_attn": _init_attn(k1, d_model, n_heads),
            "cross_attn": _init_attn(k2, d_model, n_heads),
            "ffn": _init_ffn(k3, d_model, cfg["d_hidden"]),
            "ln1_g": ones, "ln1_b": zeros, "ln2_g": ones, "ln2_b": zeros,
            "ln3_g": ones, "ln3_b": zeros,
        })
    return params


# ---------------------------------------------------------------------------
# Main
# ---------------------------------------------------------------------------

if __name__ == "__main__":
    cfg = dict(
        enc_pad_idx=0, dec_pad_idx=0, dec_sos_idx=1,
        n_layers=2, vocab_size=32, d_model=32, max_seq_len=16,
        n_heads=4, d_hidden=64, drop_prob=0.1, decode_vocab_size=24,
    )
    B, S = 2, 8

    key = jax.random.PRNGKey(0)
    k_param, k_src, k_trg = jax.random.split(key, 3)
    params = init_params(k_param, cfg)

    src = jax.random.randint(k_src, (B, S), 2, cfg["vocab_size"], dtype=jnp.int32)
    trg = jax.random.randint(k_trg, (B, S), 2, cfg["vocab_size"], dtype=jnp.int32)
    # Introduce padding positions so the masks are non-trivial.
    src = src.at[0, -2:].set(cfg["enc_pad_idx"])
    trg = trg.at[1, -3:].set(cfg["dec_pad_idx"])
    trg = trg.at[:, 0].set(cfg["dec_sos_idx"])

    fwd = jax.jit(lambda p, s, t: transformer_forward(p, s, t, cfg))
    out = fwd(params, src, trg)
    out = jax.block_until_ready(out)

    assert out.shape == (B, S, cfg["decode_vocab_size"]), out.shape
    assert bool(jnp.all(jnp.isfinite(out)))
    print("KERNEL_OK")
</pallas_src>

<mosaic_0001>
module attributes {stable_mosaic.version = 11 : i64} {
  func.func @_ffn_ln_block_kernel(%arg0: i32, %arg1: memref<16x32xf32, #tpu.memory_space<vmem>>, %arg2: memref<32x64xf32, #tpu.memory_space<vmem>>, %arg3: memref<1x64xf32, #tpu.memory_space<vmem>>, %arg4: memref<64x32xf32, #tpu.memory_space<vmem>>, %arg5: memref<1x32xf32, #tpu.memory_space<vmem>>, %arg6: memref<1x32xf32, #tpu.memory_space<vmem>>, %arg7: memref<1x32xf32, #tpu.memory_space<vmem>>, %arg8: memref<16x32xf32, #tpu.memory_space<vmem>>) attributes {dimension_semantics = [#tpu.dimension_semantics<parallel>], iteration_bounds = array<i64: 1>, scalar_prefetch = 0 : i64, scratch_operands = 0 : i64, tpu.core_type = #tpu.core_type<tc>, window_params = [{transform_indices = @transform_0, window_bounds = array<i64: 16, 32>}, {pipeline_mode = #tpu.pipeline_mode<synchronous>, transform_indices = @transform_1, window_bounds = array<i64: 32, 64>}, {pipeline_mode = #tpu.pipeline_mode<synchronous>, transform_indices = @transform_2, window_bounds = array<i64: 1, 64>}, {pipeline_mode = #tpu.pipeline_mode<synchronous>, transform_indices = @transform_3, window_bounds = array<i64: 64, 32>}, {pipeline_mode = #tpu.pipeline_mode<synchronous>, transform_indices = @transform_4, window_bounds = array<i64: 1, 32>}, {pipeline_mode = #tpu.pipeline_mode<synchronous>, transform_indices = @transform_5, window_bounds = array<i64: 1, 32>}, {pipeline_mode = #tpu.pipeline_mode<synchronous>, transform_indices = @transform_6, window_bounds = array<i64: 1, 32>}, {transform_indices = @transform_7, window_bounds = array<i64: 16, 32>}]} {
    %c0 = arith.constant 0 : index
    %c0_0 = arith.constant 0 : index
    %0 = vector.load %arg1[%c0, %c0_0] : memref<16x32xf32, #tpu.memory_space<vmem>>, vector<16x32xf32>
    %c0_1 = arith.constant 0 : index
    %c0_2 = arith.constant 0 : index
    %1 = vector.load %arg2[%c0_1, %c0_2] : memref<32x64xf32, #tpu.memory_space<vmem>>, vector<32x64xf32>
    %cst = arith.constant dense<0.000000e+00> : vector<16x64xf32>
    %2 = tpu.matmul %0, %1, %cst {dimension_numbers = #tpu.dot_dimension_numbers<[1], [0], [0], [1], [0, 0, 1, 1], [], []>} : vector<16x32xf32>, vector<32x64xf32>, vector<16x64xf32> -> vector<16x64xf32>
    %c0_3 = arith.constant 0 : index
    %c0_4 = arith.constant 0 : index
    %3 = vector.load %arg3[%c0_3, %c0_4] : memref<1x64xf32, #tpu.memory_space<vmem>>, vector<1x64xf32>
    %4 = vector.broadcast %3 : vector<1x64xf32> to vector<16x64xf32>
    %5 = arith.addf %2, %4 : vector<16x64xf32>
    %cst_5 = arith.constant 0.000000e+00 : f32
    %6 = vector.broadcast %cst_5 : f32 to vector<16x64xf32>
    %7 = arith.maximumf %5, %6 : vector<16x64xf32>
    %c0_6 = arith.constant 0 : index
    %c0_7 = arith.constant 0 : index
    %8 = vector.load %arg4[%c0_6, %c0_7] : memref<64x32xf32, #tpu.memory_space<vmem>>, vector<64x32xf32>
    %cst_8 = arith.constant dense<0.000000e+00> : vector<16x32xf32>
    %9 = tpu.matmul %7, %8, %cst_8 {dimension_numbers = #tpu.dot_dimension_numbers<[1], [0], [0], [1], [0, 0, 1, 1], [], []>} : vector<16x64xf32>, vector<64x32xf32>, vector<16x32xf32> -> vector<16x32xf32>
    %c0_9 = arith.constant 0 : index
    %c0_10 = arith.constant 0 : index
    %10 = vector.load %arg5[%c0_9, %c0_10] : memref<1x32xf32, #tpu.memory_space<vmem>>, vector<1x32xf32>
    %11 = vector.broadcast %10 : vector<1x32xf32> to vector<16x32xf32>
    %12 = arith.addf %9, %11 : vector<16x32xf32>
    %13 = arith.addf %12, %0 : vector<16x32xf32>
    %c0_11 = arith.constant 0 : index
    %c0_12 = arith.constant 0 : index
    %14 = vector.load %arg6[%c0_11, %c0_12] : memref<1x32xf32, #tpu.memory_space<vmem>>, vector<1x32xf32>
    %c0_13 = arith.constant 0 : index
    %c0_14 = arith.constant 0 : index
    %15 = vector.load %arg7[%c0_13, %c0_14] : memref<1x32xf32, #tpu.memory_space<vmem>>, vector<1x32xf32>
    %cst_15 = arith.constant dense<0.000000e+00> : vector<16xf32>
    %16 = vector.multi_reduction <add>, %13, %cst_15 [1] : vector<16x32xf32> to vector<16xf32>
    %17 = vector.shape_cast %16 : vector<16xf32> to vector<16x1xf32>
    %cst_16 = arith.constant 3.200000e+01 : f32
    %18 = vector.broadcast %cst_16 : f32 to vector<16x1xf32>
    %19 = arith.divf %17, %18 : vector<16x1xf32>
    %20 = vector.broadcast %19 : vector<16x1xf32> to vector<16x32xf32>
    %21 = arith.subf %13, %20 : vector<16x32xf32>
    %22 = arith.mulf %21, %21 : vector<16x32xf32>
    %cst_17 = arith.constant dense<0.000000e+00> : vector<16xf32>
    %23 = vector.multi_reduction <add>, %22, %cst_17 [1] : vector<16x32xf32> to vector<16xf32>
    %24 = vector.shape_cast %23 : vector<16xf32> to vector<16x1xf32>
    %cst_18 = arith.constant 3.200000e+01 : f32
    %25 = vector.broadcast %cst_18 : f32 to vector<16x1xf32>
    %26 = arith.divf %24, %25 : vector<16x1xf32>
    %27 = vector.broadcast %19 : vector<16x1xf32> to vector<16x32xf32>
    %28 = arith.subf %13, %27 : vector<16x32xf32>
    %cst_19 = arith.constant 9.99999996E-13 : f32
    %29 = vector.broadcast %cst_19 : f32 to vector<16x1xf32>
    %30 = arith.addf %26, %29 : vector<16x1xf32>
    %31 = math.rsqrt %30 : vector<16x1xf32>
    %32 = vector.broadcast %31 : vector<16x1xf32> to vector<16x32xf32>
    %33 = arith.mulf %28, %32 : vector<16x32xf32>
    %34 = vector.broadcast %14 : vector<1x32xf32> to vector<16x32xf32>
    %35 = arith.mulf %33, %34 : vector<16x32xf32>
    %36 = vector.broadcast %15 : vector<1x32xf32> to vector<16x32xf32>
    %37 = arith.addf %35, %36 : vector<16x32xf32>
    %c0_20 = arith.constant 0 : index
    %c0_21 = arith.constant 0 : index
    %38 = vector.load %arg8[%c0_20, %c0_21] : memref<16x32xf32, #tpu.memory_space<vmem>>, vector<16x32xf32>
    tpu.vector_store %arg8[%c0_20, %c0_21], %37 {strides = array<i32>} : memref<16x32xf32, #tpu.memory_space<vmem>>, vector<16x32xf32>,
    return
  }
  func.func @transform_0(%arg0: i32) -> (i32, i32) {
    %c0_i32 = arith.constant 0 : i32
    %c0_i32_0 = arith.constant 0 : i32
    return %arg0, %c0_i32 : i32, i32
  }
  func.func @transform_1(%arg0: i32) -> (i32, i32) {
    %c0_i32 = arith.constant 0 : i32
    %c0_i32_0 = arith.constant 0 : i32
    %c0_i32_1 = arith.constant 0 : i32
    return %c0_i32, %c0_i32_0 : i32, i32
  }
  func.func @transform_2(%arg0: i32) -> (i32, i32) {
    %c0_i32 = arith.constant 0 : i32
    %c0_i32_0 = arith.constant 0 : i32
    %c0_i32_1 = arith.constant 0 : i32
    return %c0_i32, %c0_i32_0 : i32, i32
  }
  func.func @transform_3(%arg0: i32) -> (i32, i32) {
    %c0_i32 = arith.constant 0 : i32
    %c0_i32_0 = arith.constant 0 : i32
    %c0_i32_1 = arith.constant 0 : i32
    return %c0_i32, %c0_i32_0 : i32, i32
  }
  func.func @transform_4(%arg0: i32) -> (i32, i32) {
    %c0_i32 = arith.constant 0 : i32
    %c0_i32_0 = arith.constant 0 : i32
    %c0_i32_1 = arith.constant 0 : i32
    return %c0_i32, %c0_i32_0 : i32, i32
  }
  func.func @transform_5(%arg0: i32) -> (i32, i32) {
    %c0_i32 = arith.constant 0 : i32
    %c0_i32_0 = arith.constant 0 : i32
    %c0_i32_1 = arith.constant 0 : i32
    return %c0_i32, %c0_i32_0 : i32, i32
  }
  func.func @transform_6(%arg0: i32) -> (i32, i32) {
    %c0_i32 = arith.constant 0 : i32
    %c0_i32_0 = arith.constant 0 : i32
    %c0_i32_1 = arith.constant 0 : i32
    return %c0_i32, %c0_i32_0 : i32, i32
  }
  func.func @transform_7(%arg0: i32) -> (i32, i32) {
    %c0_i32 = arith.constant 0 : i32
    %c0_i32_0 = arith.constant 0 : i32
    return %arg0, %c0_i32 : i32, i32
  }
}

module attributes {stable_mosaic.version = 11 : i64} {
  func.func @_mha_ln_block_kernel(%arg0: i32, %arg1: memref<1x8x32xf32, #tpu.memory_space<vmem>>, %arg2: memref<1x8x1xf32, #tpu.memory_space<vmem>>, %arg3: memref<4x32x8xf32, #tpu.memory_space<vmem>>, %arg4: memref<4x1x8xf32, #tpu.memory_space<vmem>>, %arg5: memref<4x32x8xf32, #tpu.memory_space<vmem>>, %arg6: memref<4x1x8xf32, #tpu.memory_space<vmem>>, %arg7: memref<4x32x8xf32, #tpu.memory_space<vmem>>, %arg8: memref<4x1x8xf32, #tpu.memory_space<vmem>>, %arg9: memref<4x8x32xf32, #tpu.memory_space<vmem>>, %arg10: memref<1x32xf32, #tpu.memory_space<vmem>>, %arg11: memref<1x32xf32, #tpu.memory_space<vmem>>, %arg12: memref<1x32xf32, #tpu.memory_space<vmem>>, %arg13: memref<1x8x32xf32, #tpu.memory_space<vmem>>) attributes {dimension_semantics = [#tpu.dimension_semantics<parallel>], iteration_bounds = array<i64: 2>, scalar_prefetch = 0 : i64, scratch_operands = 0 : i64, tpu.core_type = #tpu.core_type<tc>, window_params = [{transform_indices = @transform_0, window_bounds = array<i64: 1, 8, 32>}, {transform_indices = @transform_1, window_bounds = array<i64: 1, 8, 1>}, {pipeline_mode = #tpu.pipeline_mode<synchronous>, transform_indices = @transform_2, window_bounds = array<i64: 4, 32, 8>}, {pipeline_mode = #tpu.pipeline_mode<synchronous>, transform_indices = @transform_3, window_bounds = array<i64: 4, 1, 8>}, {pipeline_mode = #tpu.pipeline_mode<synchronous>, transform_indices = @transform_4, window_bounds = array<i64: 4, 32, 8>}, {pipeline_mode = #tpu.pipeline_mode<synchronous>, transform_indices = @transform_5, window_bounds = array<i64: 4, 1, 8>}, {pipeline_mode = #tpu.pipeline_mode<synchronous>, transform_indices = @transform_6, window_bounds = array<i64: 4, 32, 8>}, {pipeline_mode = #tpu.pipeline_mode<synchronous>, transform_indices = @transform_7, window_bounds = array<i64: 4, 1, 8>}, {pipeline_mode = #tpu.pipeline_mode<synchronous>, transform_indices = @transform_8, window_bounds = array<i64: 4, 8, 32>}, {pipeline_mode = #tpu.pipeline_mode<synchronous>, transform_indices = @transform_9, window_bounds = array<i64: 1, 32>}, {pipeline_mode = #tpu.pipeline_mode<synchronous>, transform_indices = @transform_10, window_bounds = array<i64: 1, 32>}, {pipeline_mode = #tpu.pipeline_mode<synchronous>, transform_indices = @transform_11, window_bounds = array<i64: 1, 32>}, {transform_indices = @transform_12, window_bounds = array<i64: 1, 8, 32>}]} {
    %c0 = arith.constant 0 : index
    %c0_0 = arith.constant 0 : index
    %c0_1 = arith.constant 0 : index
    %0 = vector.load %arg1[%c0, %c0_0, %c0_1] : memref<1x8x32xf32, #tpu.memory_space<vmem>>, vector<1x8x32xf32>
    %1 = vector.shape_cast %0 : vector<1x8x32xf32> to vector<8x32xf32>
    %2 = vector.shape_cast %1 : vector<8x32xf32> to vector<1x8x32xf32>
    %3 = vector.shape_cast %2 : vector<1x8x32xf32> to vector<1x8x32xf32>
    %4 = vector.broadcast %3 : vector<1x8x32xf32> to vector<4x8x32xf32>
    %c0_2 = arith.constant 0 : index
    %c0_3 = arith.constant 0 : index
    %c0_4 = arith.constant 0 : index
    %5 = vector.load %arg3[%c0_2, %c0_3, %c0_4] : memref<4x32x8xf32, #tpu.memory_space<vmem>>, vector<4x32x8xf32>
    "tpu.trace_start"() <{level = 10 : i32, message = "hsd,hdf->hsf"}> : () -> ()
    %cst = arith.constant dense<0.000000e+00> : vector<4x8x8xf32>
    %6 = tpu.matmul %4, %5, %cst {dimension_numbers = #tpu.dot_dimension_numbers<[2], [1], [1], [2], [0, 0, 0, 1, 1, 2], [0], [0]>} : vector<4x8x32xf32>, vector<4x32x8xf32>, vector<4x8x8xf32> -> vector<4x8x8xf32>
    "tpu.trace_stop"() : () -> ()
    %c0_5 = arith.constant 0 : index
    %c0_6 = arith.constant 0 : index
    %c0_7 = arith.constant 0 : index
    %7 = vector.load %arg4[%c0_5, %c0_6, %c0_7] : memref<4x1x8xf32, #tpu.memory_space<vmem>>, vector<4x1x8xf32>
    %8 = vector.broadcast %7 : vector<4x1x8xf32> to vector<4x8x8xf32>
    %9 = arith.addf %6, %8 : vector<4x8x8xf32>
    %c0_8 = arith.constant 0 : index
    %c0_9 = arith.constant 0 : index
    %c0_10 = arith.constant 0 : index
    %10 = vector.load %arg5[%c0_8, %c0_9, %c0_10] : memref<4x32x8xf32, #tpu.memory_space<vmem>>, vector<4x32x8xf32>
    "tpu.trace_start"() <{level = 10 : i32, message = "hsd,hdf->hsf"}> : () -> ()
    %cst_11 = arith.constant dense<0.000000e+00> : vector<4x8x8xf32>
    %11 = tpu.matmul %4, %10, %cst_11 {dimension_numbers = #tpu.dot_dimension_numbers<[2], [1], [1], [2], [0, 0, 0, 1, 1, 2], [0], [0]>} : vector<4x8x32xf32>, vector<4x32x8xf32>, vector<4x8x8xf32> -> vector<4x8x8xf32>
    "tpu.trace_stop"() : () -> ()
    %c0_12 = arith.constant 0 : index
    %c0_13 = arith.constant 0 : index
    %c0_14 = arith.constant 0 : index
    %12 = vector.load %arg6[%c0_12, %c0_13, %c0_14] : memref<4x1x8xf32, #tpu.memory_space<vmem>>, vector<4x1x8xf32>
    %13 = vector.broadcast %12 : vector<4x1x8xf32> to vector<4x8x8xf32>
    %14 = arith.addf %11, %13 : vector<4x8x8xf32>
    %c0_15 = arith.constant 0 : index
    %c0_16 = arith.constant 0 : index
    %c0_17 = arith.constant 0 : index
    %15 = vector.load %arg7[%c0_15, %c0_16, %c0_17] : memref<4x32x8xf32, #tpu.memory_space<vmem>>, vector<4x32x8xf32>
    "tpu.trace_start"() <{level = 10 : i32, message = "hsd,hdf->hsf"}> : () -> ()
    %cst_18 = arith.constant dense<0.000000e+00> : vector<4x8x8xf32>
    %16 = tpu.matmul %4, %15, %cst_18 {dimension_numbers = #tpu.dot_dimension_numbers<[2], [1], [1], [2], [0, 0, 0, 1, 1, 2], [0], [0]>} : vector<4x8x32xf32>, vector<4x32x8xf32>, vector<4x8x8xf32> -> vector<4x8x8xf32>
    "tpu.trace_stop"() : () -> ()
    %c0_19 = arith.constant 0 : index
    %c0_20 = arith.constant 0 : index
    %c0_21 = arith.constant 0 : index
    %17 = vector.load %arg8[%c0_19, %c0_20, %c0_21] : memref<4x1x8xf32, #tpu.memory_space<vmem>>, vector<4x1x8xf32>
    %18 = vector.broadcast %17 : vector<4x1x8xf32> to vector<4x8x8xf32>
    %19 = arith.addf %16, %18 : vector<4x8x8xf32>
    "tpu.trace_start"() <{level = 10 : i32, message = "hqd,hkd->hqk"}> : () -> ()
    %cst_22 = arith.constant dense<0.000000e+00> : vector<4x8x8xf32>
    %20 = tpu.matmul %9, %14, %cst_22 {dimension_numbers = #tpu.dot_dimension_numbers<[2], [2], [1], [1], [0, 0, 0, 1, 1, 1], [0], [0]>} : vector<4x8x8xf32>, vector<4x8x8xf32>, vector<4x8x8xf32> -> vector<4x8x8xf32>
    "tpu.trace_stop"() : () -> ()
    %cst_23 = arith.constant 0.353553385 : f32
    %21 = vector.broadcast %cst_23 : f32 to vector<4x8x8xf32>
    %22 = arith.mulf %20, %21 : vector<4x8x8xf32>
    %c0_24 = arith.constant 0 : index
    %c0_25 = arith.constant 0 : index
    %c0_26 = arith.constant 0 : index
    %23 = vector.load %arg2[%c0_24, %c0_25, %c0_26] : memref<1x8x1xf32, #tpu.memory_space<vmem>>, vector<1x8x1xf32>
    %24 = vector.shape_cast %23 : vector<1x8x1xf32> to vector<8x1xf32>
    %cst_27 = arith.constant 0.000000e+00 : f32
    %25 = vector.broadcast %cst_27 : f32 to vector<8x1xf32>
    %26 = arith.cmpf ogt, %24, %25 : vector<8x1xf32>
    %27 = vector.shape_cast %26 : vector<8x1xi1> to vector<8x1xi1>
    %28 = vector.broadcast %27 : vector<8x1xi1> to vector<8x8xi1>
    %29 = tpu.iota {dimensions = array<i32: 0>} : vector<8x8xi32>
    %30 = tpu.iota {dimensions = array<i32: 1>} : vector<8x8xi32>
    %31 = arith.cmpi sge, %29, %30 : vector<8x8xi32>
    %32 = arith.andi %28, %31 : vector<8x8xi1>
    %33 = vector.shape_cast %32 : vector<8x8xi1> to vector<1x8x8xi1>
    %cst_28 = arith.constant -1.000000e+04 : f32
    %34 = vector.shape_cast %33 : vector<1x8x8xi1> to vector<1x8x8xi1>
    %35 = vector.broadcast %34 : vector<1x8x8xi1> to vector<4x8x8xi1>
    %36 = vector.broadcast %cst_28 : f32 to vector<4x8x8xf32>
    %37 = arith.select %35, %22, %36 : vector<4x8x8xi1>, vector<4x8x8xf32>
    %cst_29 = arith.constant dense<0xFF800000> : vector<4x8xf32>
    %38 = vector.multi_reduction <maximumf>, %37, %cst_29 [2] : vector<4x8x8xf32> to vector<4x8xf32>
    %39 = vector.shape_cast %38 : vector<4x8xf32> to vector<4x8x1xf32>
    %40 = vector.broadcast %39 : vector<4x8x1xf32> to vector<4x8x8xf32>
    %41 = arith.subf %37, %40 : vector<4x8x8xf32>
    %42 = math.exp %41 : vector<4x8x8xf32>
    %cst_30 = arith.constant dense<0.000000e+00> : vector<4x8xf32>
    %43 = vector.multi_reduction <add>, %42, %cst_30 [2] : vector<4x8x8xf32> to vector<4x8xf32>
    %44 = vector.shape_cast %43 : vector<4x8xf32> to vector<4x8x1xf32>
    %45 = tpu.reciprocal %44 : vector<4x8x1xf32> -> vector<4x8x1xf32>
    %46 = vector.broadcast %45 : vector<4x8x1xf32> to vector<4x8x8xf32>
    %47 = arith.mulf %42, %46 : vector<4x8x8xf32>
    "tpu.trace_start"() <{level = 10 : i32, message = "hqk,hkd->hqd"}> : () -> ()
    %cst_31 = arith.constant dense<0.000000e+00> : vector<4x8x8xf32>
    %48 = tpu.matmul %47, %19, %cst_31 {dimension_numbers = #tpu.dot_dimension_numbers<[2], [1], [1], [2], [0, 0, 0, 1, 1, 2], [0], [0]>} : vector<4x8x8xf32>, vector<4x8x8xf32>, vector<4x8x8xf32> -> vector<4x8x8xf32>
    "tpu.trace_stop"() : () -> ()
    %c0_32 = arith.constant 0 : index
    %c0_33 = arith.constant 0 : index
    %c0_34 = arith.constant 0 : index
    %49 = vector.load %arg9[%c0_32, %c0_33, %c0_34] : memref<4x8x32xf32, #tpu.memory_space<vmem>>, vector<4x8x32xf32>
    "tpu.trace_start"() <{level = 10 : i32, message = "hqd,hdf->hqf"}> : () -> ()
    %cst_35 = arith.constant dense<0.000000e+00> : vector<4x8x32xf32>
    %50 = tpu.matmul %48, %49, %cst_35 {dimension_numbers = #tpu.dot_dimension_numbers<[2], [1], [1], [2], [0, 0, 0, 1, 1, 2], [0], [0]>} : vector<4x8x8xf32>, vector<4x8x32xf32>, vector<4x8x32xf32> -> vector<4x8x32xf32>
    "tpu.trace_stop"() : () -> ()
    %cst_36 = arith.constant dense<0.000000e+00> : vector<8x32xf32>
    %51 = vector.multi_reduction <add>, %50, %cst_36 [0] : vector<4x8x32xf32> to vector<8x32xf32>
    %c0_37 = arith.constant 0 : index
    %c0_38 = arith.constant 0 : index
    %52 = vector.load %arg10[%c0_37, %c0_38] : memref<1x32xf32, #tpu.memory_space<vmem>>, vector<1x32xf32>
    %53 = vector.broadcast %52 : vector<1x32xf32> to vector<8x32xf32>
    %54 = arith.addf %51, %53 : vector<8x32xf32>
    %55 = arith.addf %54, %1 : vector<8x32xf32>
    %c0_39 = arith.constant 0 : index
    %c0_40 = arith.constant 0 : index
    %56 = vector.load %arg11[%c0_39, %c0_40] : memref<1x32xf32, #tpu.memory_space<vmem>>, vector<1x32xf32>
    %c0_41 = arith.constant 0 : index
    %c0_42 = arith.constant 0 : index
    %57 = vector.load %arg12[%c0_41, %c0_42] : memref<1x32xf32, #tpu.memory_space<vmem>>, vector<1x32xf32>
    %cst_43 = arith.constant dense<0.000000e+00> : vector<8xf32>
    %58 = vector.multi_reduction <add>, %55, %cst_43 [1] : vector<8x32xf32> to vector<8xf32>
    %59 = vector.shape_cast %58 : vector<8xf32> to vector<8x1xf32>
    %cst_44 = arith.constant 3.200000e+01 : f32
    %60 = vector.broadcast %cst_44 : f32 to vector<8x1xf32>
    %61 = arith.divf %59, %60 : vector<8x1xf32>
    %62 = vector.broadcast %61 : vector<8x1xf32> to vector<8x32xf32>
    %63 = arith.subf %55, %62 : vector<8x32xf32>
    %64 = arith.mulf %63, %63 : vector<8x32xf32>
    %cst_45 = arith.constant dense<0.000000e+00> : vector<8xf32>
    %65 = vector.multi_reduction <add>, %64, %cst_45 [1] : vector<8x32xf32> to vector<8xf32>
    %66 = vector.shape_cast %65 : vector<8xf32> to vector<8x1xf32>
    %cst_46 = arith.constant 3.200000e+01 : f32
    %67 = vector.broadcast %cst_46 : f32 to vector<8x1xf32>
    %68 = arith.divf %66, %67 : vector<8x1xf32>
    %69 = vector.broadcast %61 : vector<8x1xf32> to vector<8x32xf32>
    %70 = arith.subf %55, %69 : vector<8x32xf32>
    %cst_47 = arith.constant 9.99999996E-13 : f32
    %71 = vector.broadcast %cst_47 : f32 to vector<8x1xf32>
    %72 = arith.addf %68, %71 : vector<8x1xf32>
    %73 = math.rsqrt %72 : vector<8x1xf32>
    %74 = vector.broadcast %73 : vector<8x1xf32> to vector<8x32xf32>
    %75 = arith.mulf %70, %74 : vector<8x32xf32>
    %76 = vector.broadcast %56 : vector<1x32xf32> to vector<8x32xf32>
    %77 = arith.mulf %75, %76 : vector<8x32xf32>
    %78 = vector.broadcast %57 : vector<1x32xf32> to vector<8x32xf32>
    %79 = arith.addf %77, %78 : vector<8x32xf32>
    %c0_48 = arith.constant 0 : index
    %c0_49 = arith.constant 0 : index
    %c0_50 = arith.constant 0 : index
    %80 = vector.load %arg13[%c0_48, %c0_49, %c0_50] : memref<1x8x32xf32, #tpu.memory_space<vmem>>, vector<1x8x32xf32>
    %81 = vector.shape_cast %80 : vector<1x8x32xf32> to vector<8x32xf32>
    %82 = vector.shape_cast %79 : vector<8x32xf32> to vector<1x8x32xf32>
    tpu.vector_store %arg13[%c0_48, %c0_49, %c0_50], %82 {strides = array<i32>} : memref<1x8x32xf32, #tpu.memory_space<vmem>>, vector<1x8x32xf32>,
    return
  }
  func.func @transform_0(%arg0: i32) -> (i32, i32, i32) {
    %c0_i32 = arith.constant 0 : i32
    %c0_i32_0 = arith.constant 0 : i32
    %c0_i32_1 = arith.constant 0 : i32
    return %arg0, %c0_i32, %c0_i32_0 : i32, i32, i32
  }
  func.func @transform_1(%arg0: i32) -> (i32, i32, i32) {
    %c0_i32 = arith.constant 0 : i32
    %c0_i32_0 = arith.constant 0 : i32
    %c0_i32_1 = arith.constant 0 : i32
    return %arg0, %c0_i32, %c0_i32_0 : i32, i32, i32
  }
  func.func @transform_2(%arg0: i32) -> (i32, i32, i32) {
    %c0_i32 = arith.constant 0 : i32
    %c0_i32_0 = arith.constant 0 : i32
    %c0_i32_1 = arith.constant 0 : i32
    %c0_i32_2 = arith.constant 0 : i32
    return %c0_i32, %c0_i32_0, %c0_i32_1 : i32, i32, i32
  }
  func.func @transform_3(%arg0: i32) -> (i32, i32, i32) {
    %c0_i32 = arith.constant 0 : i32
    %c0_i32_0 = arith.constant 0 : i32
    %c0_i32_1 = arith.constant 0 : i32
    %c0_i32_2 = arith.constant 0 : i32
    return %c0_i32, %c0_i32_0, %c0_i32_1 : i32, i32, i32
  }
  func.func @transform_4(%arg0: i32) -> (i32, i32, i32) {
    %c0_i32 = arith.constant 0 : i32
    %c0_i32_0 = arith.constant 0 : i32
    %c0_i32_1 = arith.constant 0 : i32
    %c0_i32_2 = arith.constant 0 : i32
    return %c0_i32, %c0_i32_0, %c0_i32_1 : i32, i32, i32
  }
  func.func @transform_5(%arg0: i32) -> (i32, i32, i32) {
    %c0_i32 = arith.constant 0 : i32
    %c0_i32_0 = arith.constant 0 : i32
    %c0_i32_1 = arith.constant 0 : i32
    %c0_i32_2 = arith.constant 0 : i32
    return %c0_i32, %c0_i32_0, %c0_i32_1 : i32, i32, i32
  }
  func.func @transform_6(%arg0: i32) -> (i32, i32, i32) {
    %c0_i32 = arith.constant 0 : i32
    %c0_i32_0 = arith.constant 0 : i32
    %c0_i32_1 = arith.constant 0 : i32
    %c0_i32_2 = arith.constant 0 : i32
    return %c0_i32, %c0_i32_0, %c0_i32_1 : i32, i32, i32
  }
  func.func @transform_7(%arg0: i32) -> (i32, i32, i32) {
    %c0_i32 = arith.constant 0 : i32
    %c0_i32_0 = arith.constant 0 : i32
    %c0_i32_1 = arith.constant 0 : i32
    %c0_i32_2 = arith.constant 0 : i32
    return %c0_i32, %c0_i32_0, %c0_i32_1 : i32, i32, i32
  }
  func.func @transform_8(%arg0: i32) -> (i32, i32, i32) {
    %c0_i32 = arith.constant 0 : i32
    %c0_i32_0 = arith.constant 0 : i32
    %c0_i32_1 = arith.constant 0 : i32
    %c0_i32_2 = arith.constant 0 : i32
    return %c0_i32, %c0_i32_0, %c0_i32_1 : i32, i32, i32
  }
  func.func @transform_9(%arg0: i32) -> (i32, i32) {
    %c0_i32 = arith.constant 0 : i32
    %c0_i32_0 = arith.constant 0 : i32
    %c0_i32_1 = arith.constant 0 : i32
    return %c0_i32, %c0_i32_0 : i32, i32
  }
  func.func @transform_10(%arg0: i32) -> (i32, i32) {
    %c0_i32 = arith.constant 0 : i32
    %c0_i32_0 = arith.constant 0 : i32
    %c0_i32_1 = arith.constant 0 : i32
    return %c0_i32, %c0_i32_0 : i32, i32
  }
  func.func @transform_11(%arg0: i32) -> (i32, i32) {
    %c0_i32 = arith.constant 0 : i32
    %c0_i32_0 = arith.constant 0 : i32
    %c0_i32_1 = arith.constant 0 : i32
    return %c0_i32, %c0_i32_0 : i32, i32
  }
  func.func @transform_12(%arg0: i32) -> (i32, i32, i32) {
    %c0_i32 = arith.constant 0 : i32
    %c0_i32_0 = arith.constant 0 : i32
    %c0_i32_1 = arith.constant 0 : i32
    return %arg0, %c0_i32, %c0_i32_0 : i32, i32, i32
  }
}

module attributes {stable_mosaic.version = 11 : i64} {
  func.func @_mha_ln_block_kernel(%arg0: i32, %arg1: memref<1x8x32xf32, #tpu.memory_space<vmem>>, %arg2: memref<1x8x1xf32, #tpu.memory_space<vmem>>, %arg3: memref<4x32x8xf32, #tpu.memory_space<vmem>>, %arg4: memref<4x1x8xf32, #tpu.memory_space<vmem>>, %arg5: memref<4x32x8xf32, #tpu.memory_space<vmem>>, %arg6: memref<4x1x8xf32, #tpu.memory_space<vmem>>, %arg7: memref<4x32x8xf32, #tpu.memory_space<vmem>>, %arg8: memref<4x1x8xf32, #tpu.memory_space<vmem>>, %arg9: memref<4x8x32xf32, #tpu.memory_space<vmem>>, %arg10: memref<1x32xf32, #tpu.memory_space<vmem>>, %arg11: memref<1x32xf32, #tpu.memory_space<vmem>>, %arg12: memref<1x32xf32, #tpu.memory_space<vmem>>, %arg13: memref<1x8x32xf32, #tpu.memory_space<vmem>>) attributes {dimension_semantics = [#tpu.dimension_semantics<parallel>], iteration_bounds = array<i64: 2>, scalar_prefetch = 0 : i64, scratch_operands = 0 : i64, tpu.core_type = #tpu.core_type<tc>, window_params = [{transform_indices = @transform_0, window_bounds = array<i64: 1, 8, 32>}, {transform_indices = @transform_1, window_bounds = array<i64: 1, 8, 1>}, {pipeline_mode = #tpu.pipeline_mode<synchronous>, transform_indices = @transform_2, window_bounds = array<i64: 4, 32, 8>}, {pipeline_mode = #tpu.pipeline_mode<synchronous>, transform_indices = @transform_3, window_bounds = array<i64: 4, 1, 8>}, {pipeline_mode = #tpu.pipeline_mode<synchronous>, transform_indices = @transform_4, window_bounds = array<i64: 4, 32, 8>}, {pipeline_mode = #tpu.pipeline_mode<synchronous>, transform_indices = @transform_5, window_bounds = array<i64: 4, 1, 8>}, {pipeline_mode = #tpu.pipeline_mode<synchronous>, transform_indices = @transform_6, window_bounds = array<i64: 4, 32, 8>}, {pipeline_mode = #tpu.pipeline_mode<synchronous>, transform_indices = @transform_7, window_bounds = array<i64: 4, 1, 8>}, {pipeline_mode = #tpu.pipeline_mode<synchronous>, transform_indices = @transform_8, window_bounds = array<i64: 4, 8, 32>}, {pipeline_mode = #tpu.pipeline_mode<synchronous>, transform_indices = @transform_9, window_bounds = array<i64: 1, 32>}, {pipeline_mode = #tpu.pipeline_mode<synchronous>, transform_indices = @transform_10, window_bounds = array<i64: 1, 32>}, {pipeline_mode = #tpu.pipeline_mode<synchronous>, transform_indices = @transform_11, window_bounds = array<i64: 1, 32>}, {transform_indices = @transform_12, window_bounds = array<i64: 1, 8, 32>}]} {
    %c0 = arith.constant 0 : index
    %c0_0 = arith.constant 0 : index
    %c0_1 = arith.constant 0 : index
    %0 = vector.load %arg1[%c0, %c0_0, %c0_1] : memref<1x8x32xf32, #tpu.memory_space<vmem>>, vector<1x8x32xf32>
    %1 = vector.shape_cast %0 : vector<1x8x32xf32> to vector<8x32xf32>
    %2 = vector.shape_cast %1 : vector<8x32xf32> to vector<1x8x32xf32>
    %3 = vector.shape_cast %2 : vector<1x8x32xf32> to vector<1x8x32xf32>
    %4 = vector.broadcast %3 : vector<1x8x32xf32> to vector<4x8x32xf32>
    %c0_2 = arith.constant 0 : index
    %c0_3 = arith.constant 0 : index
    %c0_4 = arith.constant 0 : index
    %5 = vector.load %arg3[%c0_2, %c0_3, %c0_4] : memref<4x32x8xf32, #tpu.memory_space<vmem>>, vector<4x32x8xf32>
    "tpu.trace_start"() <{level = 10 : i32, message = "hsd,hdf->hsf"}> : () -> ()
    %cst = arith.constant dense<0.000000e+00> : vector<4x8x8xf32>
    %6 = tpu.matmul %4, %5, %cst {dimension_numbers = #tpu.dot_dimension_numbers<[2], [1], [1], [2], [0, 0, 0, 1, 1, 2], [0], [0]>} : vector<4x8x32xf32>, vector<4x32x8xf32>, vector<4x8x8xf32> -> vector<4x8x8xf32>
    "tpu.trace_stop"() : () -> ()
    %c0_5 = arith.constant 0 : index
    %c0_6 = arith.constant 0 : index
    %c0_7 = arith.constant 0 : index
    %7 = vector.load %arg4[%c0_5, %c0_6, %c0_7] : memref<4x1x8xf32, #tpu.memory_space<vmem>>, vector<4x1x8xf32>
    %8 = vector.broadcast %7 : vector<4x1x8xf32> to vector<4x8x8xf32>
    %9 = arith.addf %6, %8 : vector<4x8x8xf32>
    %c0_8 = arith.constant 0 : index
    %c0_9 = arith.constant 0 : index
    %c0_10 = arith.constant 0 : index
    %10 = vector.load %arg5[%c0_8, %c0_9, %c0_10] : memref<4x32x8xf32, #tpu.memory_space<vmem>>, vector<4x32x8xf32>
    "tpu.trace_start"() <{level = 10 : i32, message = "hsd,hdf->hsf"}> : () -> ()
    %cst_11 = arith.constant dense<0.000000e+00> : vector<4x8x8xf32>
    %11 = tpu.matmul %4, %10, %cst_11 {dimension_numbers = #tpu.dot_dimension_numbers<[2], [1], [1], [2], [0, 0, 0, 1, 1, 2], [0], [0]>} : vector<4x8x32xf32>, vector<4x32x8xf32>, vector<4x8x8xf32> -> vector<4x8x8xf32>
    "tpu.trace_stop"() : () -> ()
    %c0_12 = arith.constant 0 : index
    %c0_13 = arith.constant 0 : index
    %c0_14 = arith.constant 0 : index
    %12 = vector.load %arg6[%c0_12, %c0_13, %c0_14] : memref<4x1x8xf32, #tpu.memory_space<vmem>>, vector<4x1x8xf32>
    %13 = vector.broadcast %12 : vector<4x1x8xf32> to vector<4x8x8xf32>
    %14 = arith.addf %11, %13 : vector<4x8x8xf32>
    %c0_15 = arith.constant 0 : index
    %c0_16 = arith.constant 0 : index
    %c0_17 = arith.constant 0 : index
    %15 = vector.load %arg7[%c0_15, %c0_16, %c0_17] : memref<4x32x8xf32, #tpu.memory_space<vmem>>, vector<4x32x8xf32>
    "tpu.trace_start"() <{level = 10 : i32, message = "hsd,hdf->hsf"}> : () -> ()
    %cst_18 = arith.constant dense<0.000000e+00> : vector<4x8x8xf32>
    %16 = tpu.matmul %4, %15, %cst_18 {dimension_numbers = #tpu.dot_dimension_numbers<[2], [1], [1], [2], [0, 0, 0, 1, 1, 2], [0], [0]>} : vector<4x8x32xf32>, vector<4x32x8xf32>, vector<4x8x8xf32> -> vector<4x8x8xf32>
    "tpu.trace_stop"() : () -> ()
    %c0_19 = arith.constant 0 : index
    %c0_20 = arith.constant 0 : index
    %c0_21 = arith.constant 0 : index
    %17 = vector.load %arg8[%c0_19, %c0_20, %c0_21] : memref<4x1x8xf32, #tpu.memory_space<vmem>>, vector<4x1x8xf32>
    %18 = vector.broadcast %17 : vector<4x1x8xf32> to vector<4x8x8xf32>
    %19 = arith.addf %16, %18 : vector<4x8x8xf32>
    "tpu.trace_start"() <{level = 10 : i32, message = "hqd,hkd->hqk"}> : () -> ()
    %cst_22 = arith.constant dense<0.000000e+00> : vector<4x8x8xf32>
    %20 = tpu.matmul %9, %14, %cst_22 {dimension_numbers = #tpu.dot_dimension_numbers<[2], [2], [1], [1], [0, 0, 0, 1, 1, 1], [0], [0]>} : vector<4x8x8xf32>, vector<4x8x8xf32>, vector<4x8x8xf32> -> vector<4x8x8xf32>
    "tpu.trace_stop"() : () -> ()
    %cst_23 = arith.constant 0.353553385 : f32
    %21 = vector.broadcast %cst_23 : f32 to vector<4x8x8xf32>
    %22 = arith.mulf %20, %21 : vector<4x8x8xf32>
    %c0_24 = arith.constant 0 : index
    %c0_25 = arith.constant 0 : index
    %c0_26 = arith.constant 0 : index
    %23 = vector.load %arg2[%c0_24, %c0_25, %c0_26] : memref<1x8x1xf32, #tpu.memory_space<vmem>>, vector<1x8x1xf32>
    %24 = vector.shape_cast %23 : vector<1x8x1xf32> to vector<8x1xf32>
    %cst_27 = arith.constant 0.000000e+00 : f32
    %25 = vector.broadcast %cst_27 : f32 to vector<8x1xf32>
    %26 = arith.cmpf ogt, %24, %25 : vector<8x1xf32>
    %27 = vector.shape_cast %26 : vector<8x1xi1> to vector<8x1xi1>
    %28 = vector.broadcast %27 : vector<8x1xi1> to vector<8x8xi1>
    %29 = vector.shape_cast %28 : vector<8x8xi1> to vector<1x8x8xi1>
    %cst_28 = arith.constant -1.000000e+04 : f32
    %30 = vector.shape_cast %29 : vector<1x8x8xi1> to vector<1x8x8xi1>
    %31 = vector.broadcast %30 : vector<1x8x8xi1> to vector<4x8x8xi1>
    %32 = vector.broadcast %cst_28 : f32 to vector<4x8x8xf32>
    %33 = arith.select %31, %22, %32 : vector<4x8x8xi1>, vector<4x8x8xf32>
    %cst_29 = arith.constant dense<0xFF800000> : vector<4x8xf32>
    %34 = vector.multi_reduction <maximumf>, %33, %cst_29 [2] : vector<4x8x8xf32> to vector<4x8xf32>
    %35 = vector.shape_cast %34 : vector<4x8xf32> to vector<4x8x1xf32>
    %36 = vector.broadcast %35 : vector<4x8x1xf32> to vector<4x8x8xf32>
    %37 = arith.subf %33, %36 : vector<4x8x8xf32>
    %38 = math.exp %37 : vector<4x8x8xf32>
    %cst_30 = arith.constant dense<0.000000e+00> : vector<4x8xf32>
    %39 = vector.multi_reduction <add>, %38, %cst_30 [2] : vector<4x8x8xf32> to vector<4x8xf32>
    %40 = vector.shape_cast %39 : vector<4x8xf32> to vector<4x8x1xf32>
    %41 = tpu.reciprocal %40 : vector<4x8x1xf32> -> vector<4x8x1xf32>
    %42 = vector.broadcast %41 : vector<4x8x1xf32> to vector<4x8x8xf32>
    %43 = arith.mulf %38, %42 : vector<4x8x8xf32>
    "tpu.trace_start"() <{level = 10 : i32, message = "hqk,hkd->hqd"}> : () -> ()
    %cst_31 = arith.constant dense<0.000000e+00> : vector<4x8x8xf32>
    %44 = tpu.matmul %43, %19, %cst_31 {dimension_numbers = #tpu.dot_dimension_numbers<[2], [1], [1], [2], [0, 0, 0, 1, 1, 2], [0], [0]>} : vector<4x8x8xf32>, vector<4x8x8xf32>, vector<4x8x8xf32> -> vector<4x8x8xf32>
    "tpu.trace_stop"() : () -> ()
    %c0_32 = arith.constant 0 : index
    %c0_33 = arith.constant 0 : index
    %c0_34 = arith.constant 0 : index
    %45 = vector.load %arg9[%c0_32, %c0_33, %c0_34] : memref<4x8x32xf32, #tpu.memory_space<vmem>>, vector<4x8x32xf32>
    "tpu.trace_start"() <{level = 10 : i32, message = "hqd,hdf->hqf"}> : () -> ()
    %cst_35 = arith.constant dense<0.000000e+00> : vector<4x8x32xf32>
    %46 = tpu.matmul %44, %45, %cst_35 {dimension_numbers = #tpu.dot_dimension_numbers<[2], [1], [1], [2], [0, 0, 0, 1, 1, 2], [0], [0]>} : vector<4x8x8xf32>, vector<4x8x32xf32>, vector<4x8x32xf32> -> vector<4x8x32xf32>
    "tpu.trace_stop"() : () -> ()
    %cst_36 = arith.constant dense<0.000000e+00> : vector<8x32xf32>
    %47 = vector.multi_reduction <add>, %46, %cst_36 [0] : vector<4x8x32xf32> to vector<8x32xf32>
    %c0_37 = arith.constant 0 : index
    %c0_38 = arith.constant 0 : index
    %48 = vector.load %arg10[%c0_37, %c0_38] : memref<1x32xf32, #tpu.memory_space<vmem>>, vector<1x32xf32>
    %49 = vector.broadcast %48 : vector<1x32xf32> to vector<8x32xf32>
    %50 = arith.addf %47, %49 : vector<8x32xf32>
    %51 = arith.addf %50, %1 : vector<8x32xf32>
    %c0_39 = arith.constant 0 : index
    %c0_40 = arith.constant 0 : index
    %52 = vector.load %arg11[%c0_39, %c0_40] : memref<1x32xf32, #tpu.memory_space<vmem>>, vector<1x32xf32>
    %c0_41 = arith.constant 0 : index
    %c0_42 = arith.constant 0 : index
    %53 = vector.load %arg12[%c0_41, %c0_42] : memref<1x32xf32, #tpu.memory_space<vmem>>, vector<1x32xf32>
    %cst_43 = arith.constant dense<0.000000e+00> : vector<8xf32>
    %54 = vector.multi_reduction <add>, %51, %cst_43 [1] : vector<8x32xf32> to vector<8xf32>
    %55 = vector.shape_cast %54 : vector<8xf32> to vector<8x1xf32>
    %cst_44 = arith.constant 3.200000e+01 : f32
    %56 = vector.broadcast %cst_44 : f32 to vector<8x1xf32>
    %57 = arith.divf %55, %56 : vector<8x1xf32>
    %58 = vector.broadcast %57 : vector<8x1xf32> to vector<8x32xf32>
    %59 = arith.subf %51, %58 : vector<8x32xf32>
    %60 = arith.mulf %59, %59 : vector<8x32xf32>
    %cst_45 = arith.constant dense<0.000000e+00> : vector<8xf32>
    %61 = vector.multi_reduction <add>, %60, %cst_45 [1] : vector<8x32xf32> to vector<8xf32>
    %62 = vector.shape_cast %61 : vector<8xf32> to vector<8x1xf32>
    %cst_46 = arith.constant 3.200000e+01 : f32
    %63 = vector.broadcast %cst_46 : f32 to vector<8x1xf32>
    %64 = arith.divf %62, %63 : vector<8x1xf32>
    %65 = vector.broadcast %57 : vector<8x1xf32> to vector<8x32xf32>
    %66 = arith.subf %51, %65 : vector<8x32xf32>
    %cst_47 = arith.constant 9.99999996E-13 : f32
    %67 = vector.broadcast %cst_47 : f32 to vector<8x1xf32>
    %68 = arith.addf %64, %67 : vector<8x1xf32>
    %69 = math.rsqrt %68 : vector<8x1xf32>
    %70 = vector.broadcast %69 : vector<8x1xf32> to vector<8x32xf32>
    %71 = arith.mulf %66, %70 : vector<8x32xf32>
    %72 = vector.broadcast %52 : vector<1x32xf32> to vector<8x32xf32>
    %73 = arith.mulf %71, %72 : vector<8x32xf32>
    %74 = vector.broadcast %53 : vector<1x32xf32> to vector<8x32xf32>
    %75 = arith.addf %73, %74 : vector<8x32xf32>
    %c0_48 = arith.constant 0 : index
    %c0_49 = arith.constant 0 : index
    %c0_50 = arith.constant 0 : index
    %76 = vector.load %arg13[%c0_48, %c0_49, %c0_50] : memref<1x8x32xf32, #tpu.memory_space<vmem>>, vector<1x8x32xf32>
    %77 = vector.shape_cast %76 : vector<1x8x32xf32> to vector<8x32xf32>
    %78 = vector.shape_cast %75 : vector<8x32xf32> to vector<1x8x32xf32>
    tpu.vector_store %arg13[%c0_48, %c0_49, %c0_50], %78 {strides = array<i32>} : memref<1x8x32xf32, #tpu.memory_space<vmem>>, vector<1x8x32xf32>,
    return
  }
  func.func @transform_0(%arg0: i32) -> (i32, i32, i32) {
    %c0_i32 = arith.constant 0 : i32
    %c0_i32_0 = arith.constant 0 : i32
    %c0_i32_1 = arith.constant 0 : i32
    return %arg0, %c0_i32, %c0_i32_0 : i32, i32, i32
  }
  func.func @transform_1(%arg0: i32) -> (i32, i32, i32) {
    %c0_i32 = arith.constant 0 : i32
    %c0_i32_0 = arith.constant 0 : i32
    %c0_i32_1 = arith.constant 0 : i32
    return %arg0, %c0_i32, %c0_i32_0 : i32, i32, i32
  }
  func.func @transform_2(%arg0: i32) -> (i32, i32, i32) {
    %c0_i32 = arith.constant 0 : i32
    %c0_i32_0 = arith.constant 0 : i32
    %c0_i32_1 = arith.constant 0 : i32
    %c0_i32_2 = arith.constant 0 : i32
    return %c0_i32, %c0_i32_0, %c0_i32_1 : i32, i32, i32
  }
  func.func @transform_3(%arg0: i32) -> (i32, i32, i32) {
    %c0_i32 = arith.constant 0 : i32
    %c0_i32_0 = arith.constant 0 : i32
    %c0_i32_1 = arith.constant 0 : i32
    %c0_i32_2 = arith.constant 0 : i32
    return %c0_i32, %c0_i32_0, %c0_i32_1 : i32, i32, i32
  }
  func.func @transform_4(%arg0: i32) -> (i32, i32, i32) {
    %c0_i32 = arith.constant 0 : i32
    %c0_i32_0 = arith.constant 0 : i32
    %c0_i32_1 = arith.constant 0 : i32
    %c0_i32_2 = arith.constant 0 : i32
    return %c0_i32, %c0_i32_0, %c0_i32_1 : i32, i32, i32
  }
  func.func @transform_5(%arg0: i32) -> (i32, i32, i32) {
    %c0_i32 = arith.constant 0 : i32
    %c0_i32_0 = arith.constant 0 : i32
    %c0_i32_1 = arith.constant 0 : i32
    %c0_i32_2 = arith.constant 0 : i32
    return %c0_i32, %c0_i32_0, %c0_i32_1 : i32, i32, i32
  }
  func.func @transform_6(%arg0: i32) -> (i32, i32, i32) {
    %c0_i32 = arith.constant 0 : i32
    %c0_i32_0 = arith.constant 0 : i32
    %c0_i32_1 = arith.constant 0 : i32
    %c0_i32_2 = arith.constant 0 : i32
    return %c0_i32, %c0_i32_0, %c0_i32_1 : i32, i32, i32
  }
  func.func @transform_7(%arg0: i32) -> (i32, i32, i32) {
    %c0_i32 = arith.constant 0 : i32
    %c0_i32_0 = arith.constant 0 : i32
    %c0_i32_1 = arith.constant 0 : i32
    %c0_i32_2 = arith.constant 0 : i32
    return %c0_i32, %c0_i32_0, %c0_i32_1 : i32, i32, i32
  }
  func.func @transform_8(%arg0: i32) -> (i32, i32, i32) {
    %c0_i32 = arith.constant 0 : i32
    %c0_i32_0 = arith.constant 0 : i32
    %c0_i32_1 = arith.constant 0 : i32
    %c0_i32_2 = arith.constant 0 : i32
    return %c0_i32, %c0_i32_0, %c0_i32_1 : i32, i32, i32
  }
  func.func @transform_9(%arg0: i32) -> (i32, i32) {
    %c0_i32 = arith.constant 0 : i32
    %c0_i32_0 = arith.constant 0 : i32
    %c0_i32_1 = arith.constant 0 : i32
    return %c0_i32, %c0_i32_0 : i32, i32
  }
  func.func @transform_10(%arg0: i32) -> (i32, i32) {
    %c0_i32 = arith.constant 0 : i32
    %c0_i32_0 = arith.constant 0 : i32
    %c0_i32_1 = arith.constant 0 : i32
    return %c0_i32, %c0_i32_0 : i32, i32
  }
  func.func @transform_11(%arg0: i32) -> (i32, i32) {
    %c0_i32 = arith.constant 0 : i32
    %c0_i32_0 = arith.constant 0 : i32
    %c0_i32_1 = arith.constant 0 : i32
    return %c0_i32, %c0_i32_0 : i32, i32
  }
  func.func @transform_12(%arg0: i32) -> (i32, i32, i32) {
    %c0_i32 = arith.constant 0 : i32
    %c0_i32_0 = arith.constant 0 : i32
    %c0_i32_1 = arith.constant 0 : i32
    return %arg0, %c0_i32, %c0_i32_0 : i32, i32, i32
  }
}

module attributes {stable_mosaic.version = 11 : i64} {
  func.func @_mha_ln_block_kernel(%arg0: i32, %arg1: memref<1x8x32xf32, #tpu.memory_space<vmem>>, %arg2: memref<1x8x32xf32, #tpu.memory_space<vmem>>, %arg3: memref<1x8x1xf32, #tpu.memory_space<vmem>>, %arg4: memref<4x32x8xf32, #tpu.memory_space<vmem>>, %arg5: memref<4x1x8xf32, #tpu.memory_space<vmem>>, %arg6: memref<4x32x8xf32, #tpu.memory_space<vmem>>, %arg7: memref<4x1x8xf32, #tpu.memory_space<vmem>>, %arg8: memref<4x32x8xf32, #tpu.memory_space<vmem>>, %arg9: memref<4x1x8xf32, #tpu.memory_space<vmem>>, %arg10: memref<4x8x32xf32, #tpu.memory_space<vmem>>, %arg11: memref<1x32xf32, #tpu.memory_space<vmem>>, %arg12: memref<1x32xf32, #tpu.memory_space<vmem>>, %arg13: memref<1x32xf32, #tpu.memory_space<vmem>>, %arg14: memref<1x8x32xf32, #tpu.memory_space<vmem>>) attributes {dimension_semantics = [#tpu.dimension_semantics<parallel>], iteration_bounds = array<i64: 2>, scalar_prefetch = 0 : i64, scratch_operands = 0 : i64, tpu.core_type = #tpu.core_type<tc>, window_params = [{transform_indices = @transform_0, window_bounds = array<i64: 1, 8, 32>}, {transform_indices = @transform_1, window_bounds = array<i64: 1, 8, 32>}, {transform_indices = @transform_2, window_bounds = array<i64: 1, 8, 1>}, {pipeline_mode = #tpu.pipeline_mode<synchronous>, transform_indices = @transform_3, window_bounds = array<i64: 4, 32, 8>}, {pipeline_mode = #tpu.pipeline_mode<synchronous>, transform_indices = @transform_4, window_bounds = array<i64: 4, 1, 8>}, {pipeline_mode = #tpu.pipeline_mode<synchronous>, transform_indices = @transform_5, window_bounds = array<i64: 4, 32, 8>}, {pipeline_mode = #tpu.pipeline_mode<synchronous>, transform_indices = @transform_6, window_bounds = array<i64: 4, 1, 8>}, {pipeline_mode = #tpu.pipeline_mode<synchronous>, transform_indices = @transform_7, window_bounds = array<i64: 4, 32, 8>}, {pipeline_mode = #tpu.pipeline_mode<synchronous>, transform_indices = @transform_8, window_bounds = array<i64: 4, 1, 8>}, {pipeline_mode = #tpu.pipeline_mode<synchronous>, transform_indices = @transform_9, window_bounds = array<i64: 4, 8, 32>}, {pipeline_mode = #tpu.pipeline_mode<synchronous>, transform_indices = @transform_10, window_bounds = array<i64: 1, 32>}, {pipeline_mode = #tpu.pipeline_mode<synchronous>, transform_indices = @transform_11, window_bounds = array<i64: 1, 32>}, {pipeline_mode = #tpu.pipeline_mode<synchronous>, transform_indices = @transform_12, window_bounds = array<i64: 1, 32>}, {transform_indices = @transform_13, window_bounds = array<i64: 1, 8, 32>}]} {
    %c0 = arith.constant 0 : index
    %c0_0 = arith.constant 0 : index
    %c0_1 = arith.constant 0 : index
    %0 = vector.load %arg1[%c0, %c0_0, %c0_1] : memref<1x8x32xf32, #tpu.memory_space<vmem>>, vector<1x8x32xf32>
    %1 = vector.shape_cast %0 : vector<1x8x32xf32> to vector<8x32xf32>
    %c0_2 = arith.constant 0 : index
    %c0_3 = arith.constant 0 : index
    %c0_4 = arith.constant 0 : index
    %2 = vector.load %arg2[%c0_2, %c0_3, %c0_4] : memref<1x8x32xf32, #tpu.memory_space<vmem>>, vector<1x8x32xf32>
    %3 = vector.shape_cast %2 : vector<1x8x32xf32> to vector<8x32xf32>
    %4 = vector.shape_cast %1 : vector<8x32xf32> to vector<1x8x32xf32>
    %5 = vector.shape_cast %4 : vector<1x8x32xf32> to vector<1x8x32xf32>
    %6 = vector.broadcast %5 : vector<1x8x32xf32> to vector<4x8x32xf32>
    %7 = vector.shape_cast %3 : vector<8x32xf32> to vector<1x8x32xf32>
    %8 = vector.shape_cast %7 : vector<1x8x32xf32> to vector<1x8x32xf32>
    %9 = vector.broadcast %8 : vector<1x8x32xf32> to vector<4x8x32xf32>
    %c0_5 = arith.constant 0 : index
    %c0_6 = arith.constant 0 : index
    %c0_7 = arith.constant 0 : index
    %10 = vector.load %arg4[%c0_5, %c0_6, %c0_7] : memref<4x32x8xf32, #tpu.memory_space<vmem>>, vector<4x32x8xf32>
    "tpu.trace_start"() <{level = 10 : i32, message = "hsd,hdf->hsf"}> : () -> ()
    %cst = arith.constant dense<0.000000e+00> : vector<4x8x8xf32>
    %11 = tpu.matmul %6, %10, %cst {dimension_numbers = #tpu.dot_dimension_numbers<[2], [1], [1], [2], [0, 0, 0, 1, 1, 2], [0], [0]>} : vector<4x8x32xf32>, vector<4x32x8xf32>, vector<4x8x8xf32> -> vector<4x8x8xf32>
    "tpu.trace_stop"() : () -> ()
    %c0_8 = arith.constant 0 : index
    %c0_9 = arith.constant 0 : index
    %c0_10 = arith.constant 0 : index
    %12 = vector.load %arg5[%c0_8, %c0_9, %c0_10] : memref<4x1x8xf32, #tpu.memory_space<vmem>>, vector<4x1x8xf32>
    %13 = vector.broadcast %12 : vector<4x1x8xf32> to vector<4x8x8xf32>
    %14 = arith.addf %11, %13 : vector<4x8x8xf32>
    %c0_11 = arith.constant 0 : index
    %c0_12 = arith.constant 0 : index
    %c0_13 = arith.constant 0 : index
    %15 = vector.load %arg6[%c0_11, %c0_12, %c0_13] : memref<4x32x8xf32, #tpu.memory_space<vmem>>, vector<4x32x8xf32>
    "tpu.trace_start"() <{level = 10 : i32, message = "hsd,hdf->hsf"}> : () -> ()
    %cst_14 = arith.constant dense<0.000000e+00> : vector<4x8x8xf32>
    %16 = tpu.matmul %9, %15, %cst_14 {dimension_numbers = #tpu.dot_dimension_numbers<[2], [1], [1], [2], [0, 0, 0, 1, 1, 2], [0], [0]>} : vector<4x8x32xf32>, vector<4x32x8xf32>, vector<4x8x8xf32> -> vector<4x8x8xf32>
    "tpu.trace_stop"() : () -> ()
    %c0_15 = arith.constant 0 : index
    %c0_16 = arith.constant 0 : index
    %c0_17 = arith.constant 0 : index
    %17 = vector.load %arg7[%c0_15, %c0_16, %c0_17] : memref<4x1x8xf32, #tpu.memory_space<vmem>>, vector<4x1x8xf32>
    %18 = vector.broadcast %17 : vector<4x1x8xf32> to vector<4x8x8xf32>
    %19 = arith.addf %16, %18 : vector<4x8x8xf32>
    %c0_18 = arith.constant 0 : index
    %c0_19 = arith.constant 0 : index
    %c0_20 = arith.constant 0 : index
    %20 = vector.load %arg8[%c0_18, %c0_19, %c0_20] : memref<4x32x8xf32, #tpu.memory_space<vmem>>, vector<4x32x8xf32>
    "tpu.trace_start"() <{level = 10 : i32, message = "hsd,hdf->hsf"}> : () -> ()
    %cst_21 = arith.constant dense<0.000000e+00> : vector<4x8x8xf32>
    %21 = tpu.matmul %9, %20, %cst_21 {dimension_numbers = #tpu.dot_dimension_numbers<[2], [1], [1], [2], [0, 0, 0, 1, 1, 2], [0], [0]>} : vector<4x8x32xf32>, vector<4x32x8xf32>, vector<4x8x8xf32> -> vector<4x8x8xf32>
    "tpu.trace_stop"() : () -> ()
    %c0_22 = arith.constant 0 : index
    %c0_23 = arith.constant 0 : index
    %c0_24 = arith.constant 0 : index
    %22 = vector.load %arg9[%c0_22, %c0_23, %c0_24] : memref<4x1x8xf32, #tpu.memory_space<vmem>>, vector<4x1x8xf32>
    %23 = vector.broadcast %22 : vector<4x1x8xf32> to vector<4x8x8xf32>
    %24 = arith.addf %21, %23 : vector<4x8x8xf32>
    "tpu.trace_start"() <{level = 10 : i32, message = "hqd,hkd->hqk"}> : () -> ()
    %cst_25 = arith.constant dense<0.000000e+00> : vector<4x8x8xf32>
    %25 = tpu.matmul %14, %19, %cst_25 {dimension_numbers = #tpu.dot_dimension_numbers<[2], [2], [1], [1], [0, 0, 0, 1, 1, 1], [0], [0]>} : vector<4x8x8xf32>, vector<4x8x8xf32>, vector<4x8x8xf32> -> vector<4x8x8xf32>
    "tpu.trace_stop"() : () -> ()
    %cst_26 = arith.constant 0.353553385 : f32
    %26 = vector.broadcast %cst_26 : f32 to vector<4x8x8xf32>
    %27 = arith.mulf %25, %26 : vector<4x8x8xf32>
    %c0_27 = arith.constant 0 : index
    %c0_28 = arith.constant 0 : index
    %c0_29 = arith.constant 0 : index
    %28 = vector.load %arg3[%c0_27, %c0_28, %c0_29] : memref<1x8x1xf32, #tpu.memory_space<vmem>>, vector<1x8x1xf32>
    %29 = vector.shape_cast %28 : vector<1x8x1xf32> to vector<8x1xf32>
    %cst_30 = arith.constant 0.000000e+00 : f32
    %30 = vector.broadcast %cst_30 : f32 to vector<8x1xf32>
    %31 = arith.cmpf ogt, %29, %30 : vector<8x1xf32>
    %32 = vector.shape_cast %31 : vector<8x1xi1> to vector<8x1xi1>
    %33 = vector.broadcast %32 : vector<8x1xi1> to vector<8x8xi1>
    %34 = vector.shape_cast %33 : vector<8x8xi1> to vector<1x8x8xi1>
    %cst_31 = arith.constant -1.000000e+04 : f32
    %35 = vector.shape_cast %34 : vector<1x8x8xi1> to vector<1x8x8xi1>
    %36 = vector.broadcast %35 : vector<1x8x8xi1> to vector<4x8x8xi1>
    %37 = vector.broadcast %cst_31 : f32 to vector<4x8x8xf32>
    %38 = arith.select %36, %27, %37 : vector<4x8x8xi1>, vector<4x8x8xf32>
    %cst_32 = arith.constant dense<0xFF800000> : vector<4x8xf32>
    %39 = vector.multi_reduction <maximumf>, %38, %cst_32 [2] : vector<4x8x8xf32> to vector<4x8xf32>
    %40 = vector.shape_cast %39 : vector<4x8xf32> to vector<4x8x1xf32>
    %41 = vector.broadcast %40 : vector<4x8x1xf32> to vector<4x8x8xf32>
    %42 = arith.subf %38, %41 : vector<4x8x8xf32>
    %43 = math.exp %42 : vector<4x8x8xf32>
    %cst_33 = arith.constant dense<0.000000e+00> : vector<4x8xf32>
    %44 = vector.multi_reduction <add>, %43, %cst_33 [2] : vector<4x8x8xf32> to vector<4x8xf32>
    %45 = vector.shape_cast %44 : vector<4x8xf32> to vector<4x8x1xf32>
    %46 = tpu.reciprocal %45 : vector<4x8x1xf32> -> vector<4x8x1xf32>
    %47 = vector.broadcast %46 : vector<4x8x1xf32> to vector<4x8x8xf32>
    %48 = arith.mulf %43, %47 : vector<4x8x8xf32>
    "tpu.trace_start"() <{level = 10 : i32, message = "hqk,hkd->hqd"}> : () -> ()
    %cst_34 = arith.constant dense<0.000000e+00> : vector<4x8x8xf32>
    %49 = tpu.matmul %48, %24, %cst_34 {dimension_numbers = #tpu.dot_dimension_numbers<[2], [1], [1], [2], [0, 0, 0, 1, 1, 2], [0], [0]>} : vector<4x8x8xf32>, vector<4x8x8xf32>, vector<4x8x8xf32> -> vector<4x8x8xf32>
    "tpu.trace_stop"() : () -> ()
    %c0_35 = arith.constant 0 : index
    %c0_36 = arith.constant 0 : index
    %c0_37 = arith.constant 0 : index
    %50 = vector.load %arg10[%c0_35, %c0_36, %c0_37] : memref<4x8x32xf32, #tpu.memory_space<vmem>>, vector<4x8x32xf32>
    "tpu.trace_start"() <{level = 10 : i32, message = "hqd,hdf->hqf"}> : () -> ()
    %cst_38 = arith.constant dense<0.000000e+00> : vector<4x8x32xf32>
    %51 = tpu.matmul %49, %50, %cst_38 {dimension_numbers = #tpu.dot_dimension_numbers<[2], [1], [1], [2], [0, 0, 0, 1, 1, 2], [0], [0]>} : vector<4x8x8xf32>, vector<4x8x32xf32>, vector<4x8x32xf32> -> vector<4x8x32xf32>
    "tpu.trace_stop"() : () -> ()
    %cst_39 = arith.constant dense<0.000000e+00> : vector<8x32xf32>
    %52 = vector.multi_reduction <add>, %51, %cst_39 [0] : vector<4x8x32xf32> to vector<8x32xf32>
    %c0_40 = arith.constant 0 : index
    %c0_41 = arith.constant 0 : index
    %53 = vector.load %arg11[%c0_40, %c0_41] : memref<1x32xf32, #tpu.memory_space<vmem>>, vector<1x32xf32>
    %54 = vector.broadcast %53 : vector<1x32xf32> to vector<8x32xf32>
    %55 = arith.addf %52, %54 : vector<8x32xf32>
    %56 = arith.addf %55, %1 : vector<8x32xf32>
    %c0_42 = arith.constant 0 : index
    %c0_43 = arith.constant 0 : index
    %57 = vector.load %arg12[%c0_42, %c0_43] : memref<1x32xf32, #tpu.memory_space<vmem>>, vector<1x32xf32>
    %c0_44 = arith.constant 0 : index
    %c0_45 = arith.constant 0 : index
    %58 = vector.load %arg13[%c0_44, %c0_45] : memref<1x32xf32, #tpu.memory_space<vmem>>, vector<1x32xf32>
    %cst_46 = arith.constant dense<0.000000e+00> : vector<8xf32>
    %59 = vector.multi_reduction <add>, %56, %cst_46 [1] : vector<8x32xf32> to vector<8xf32>
    %60 = vector.shape_cast %59 : vector<8xf32> to vector<8x1xf32>
    %cst_47 = arith.constant 3.200000e+01 : f32
    %61 = vector.broadcast %cst_47 : f32 to vector<8x1xf32>
    %62 = arith.divf %60, %61 : vector<8x1xf32>
    %63 = vector.broadcast %62 : vector<8x1xf32> to vector<8x32xf32>
    %64 = arith.subf %56, %63 : vector<8x32xf32>
    %65 = arith.mulf %64, %64 : vector<8x32xf32>
    %cst_48 = arith.constant dense<0.000000e+00> : vector<8xf32>
    %66 = vector.multi_reduction <add>, %65, %cst_48 [1] : vector<8x32xf32> to vector<8xf32>
    %67 = vector.shape_cast %66 : vector<8xf32> to vector<8x1xf32>
    %cst_49 = arith.constant 3.200000e+01 : f32
    %68 = vector.broadcast %cst_49 : f32 to vector<8x1xf32>
    %69 = arith.divf %67, %68 : vector<8x1xf32>
    %70 = vector.broadcast %62 : vector<8x1xf32> to vector<8x32xf32>
    %71 = arith.subf %56, %70 : vector<8x32xf32>
    %cst_50 = arith.constant 9.99999996E-13 : f32
    %72 = vector.broadcast %cst_50 : f32 to vector<8x1xf32>
    %73 = arith.addf %69, %72 : vector<8x1xf32>
    %74 = math.rsqrt %73 : vector<8x1xf32>
    %75 = vector.broadcast %74 : vector<8x1xf32> to vector<8x32xf32>
    %76 = arith.mulf %71, %75 : vector<8x32xf32>
    %77 = vector.broadcast %57 : vector<1x32xf32> to vector<8x32xf32>
    %78 = arith.mulf %76, %77 : vector<8x32xf32>
    %79 = vector.broadcast %58 : vector<1x32xf32> to vector<8x32xf32>
    %80 = arith.addf %78, %79 : vector<8x32xf32>
    %c0_51 = arith.constant 0 : index
    %c0_52 = arith.constant 0 : index
    %c0_53 = arith.constant 0 : index
    %81 = vector.load %arg14[%c0_51, %c0_52, %c0_53] : memref<1x8x32xf32, #tpu.memory_space<vmem>>, vector<1x8x32xf32>
    %82 = vector.shape_cast %81 : vector<1x8x32xf32> to vector<8x32xf32>
    %83 = vector.shape_cast %80 : vector<8x32xf32> to vector<1x8x32xf32>
    tpu.vector_store %arg14[%c0_51, %c0_52, %c0_53], %83 {strides = array<i32>} : memref<1x8x32xf32, #tpu.memory_space<vmem>>, vector<1x8x32xf32>,
    return
  }
  func.func @transform_0(%arg0: i32) -> (i32, i32, i32) {
    %c0_i32 = arith.constant 0 : i32
    %c0_i32_0 = arith.constant 0 : i32
    %c0_i32_1 = arith.constant 0 : i32
    return %arg0, %c0_i32, %c0_i32_0 : i32, i32, i32
  }
  func.func @transform_1(%arg0: i32) -> (i32, i32, i32) {
    %c0_i32 = arith.constant 0 : i32
    %c0_i32_0 = arith.constant 0 : i32
    %c0_i32_1 = arith.constant 0 : i32
    return %arg0, %c0_i32, %c0_i32_0 : i32, i32, i32
  }
  func.func @transform_2(%arg0: i32) -> (i32, i32, i32) {
    %c0_i32 = arith.constant 0 : i32
    %c0_i32_0 = arith.constant 0 : i32
    %c0_i32_1 = arith.constant 0 : i32
    return %arg0, %c0_i32, %c0_i32_0 : i32, i32, i32
  }
  func.func @transform_3(%arg0: i32) -> (i32, i32, i32) {
    %c0_i32 = arith.constant 0 : i32
    %c0_i32_0 = arith.constant 0 : i32
    %c0_i32_1 = arith.constant 0 : i32
    %c0_i32_2 = arith.constant 0 : i32
    return %c0_i32, %c0_i32_0, %c0_i32_1 : i32, i32, i32
  }
  func.func @transform_4(%arg0: i32) -> (i32, i32, i32) {
    %c0_i32 = arith.constant 0 : i32
    %c0_i32_0 = arith.constant 0 : i32
    %c0_i32_1 = arith.constant 0 : i32
    %c0_i32_2 = arith.constant 0 : i32
    return %c0_i32, %c0_i32_0, %c0_i32_1 : i32, i32, i32
  }
  func.func @transform_5(%arg0: i32) -> (i32, i32, i32) {
    %c0_i32 = arith.constant 0 : i32
    %c0_i32_0 = arith.constant 0 : i32
    %c0_i32_1 = arith.constant 0 : i32
    %c0_i32_2 = arith.constant 0 : i32
    return %c0_i32, %c0_i32_0, %c0_i32_1 : i32, i32, i32
  }
  func.func @transform_6(%arg0: i32) -> (i32, i32, i32) {
    %c0_i32 = arith.constant 0 : i32
    %c0_i32_0 = arith.constant 0 : i32
    %c0_i32_1 = arith.constant 0 : i32
    %c0_i32_2 = arith.constant 0 : i32
    return %c0_i32, %c0_i32_0, %c0_i32_1 : i32, i32, i32
  }
  func.func @transform_7(%arg0: i32) -> (i32, i32, i32) {
    %c0_i32 = arith.constant 0 : i32
    %c0_i32_0 = arith.constant 0 : i32
    %c0_i32_1 = arith.constant 0 : i32
    %c0_i32_2 = arith.constant 0 : i32
    return %c0_i32, %c0_i32_0, %c0_i32_1 : i32, i32, i32
  }
  func.func @transform_8(%arg0: i32) -> (i32, i32, i32) {
    %c0_i32 = arith.constant 0 : i32
    %c0_i32_0 = arith.constant 0 : i32
    %c0_i32_1 = arith.constant 0 : i32
    %c0_i32_2 = arith.constant 0 : i32
    return %c0_i32, %c0_i32_0, %c0_i32_1 : i32, i32, i32
  }
  func.func @transform_9(%arg0: i32) -> (i32, i32, i32) {
    %c0_i32 = arith.constant 0 : i32
    %c0_i32_0 = arith.constant 0 : i32
    %c0_i32_1 = arith.constant 0 : i32
    %c0_i32_2 = arith.constant 0 : i32
    return %c0_i32, %c0_i32_0, %c0_i32_1 : i32, i32, i32
  }
  func.func @transform_10(%arg0: i32) -> (i32, i32) {
    %c0_i32 = arith.constant 0 : i32
    %c0_i32_0 = arith.constant 0 : i32
    %c0_i32_1 = arith.constant 0 : i32
    return %c0_i32, %c0_i32_0 : i32, i32
  }
  func.func @transform_11(%arg0: i32) -> (i32, i32) {
    %c0_i32 = arith.constant 0 : i32
    %c0_i32_0 = arith.constant 0 : i32
    %c0_i32_1 = arith.constant 0 : i32
    return %c0_i32, %c0_i32_0 : i32, i32
  }
  func.func @transform_12(%arg0: i32) -> (i32, i32) {
    %c0_i32 = arith.constant 0 : i32
    %c0_i32_0 = arith.constant 0 : i32
    %c0_i32_1 = arith.constant 0 : i32
    return %c0_i32, %c0_i32_0 : i32, i32
  }
  func.func @transform_13(%arg0: i32) -> (i32, i32, i32) {
    %c0_i32 = arith.constant 0 : i32
    %c0_i32_0 = arith.constant 0 : i32
    %c0_i32_1 = arith.constant 0 : i32
    return %arg0, %c0_i32, %c0_i32_0 : i32, i32, i32
  }
}

module attributes {stable_mosaic.version = 11 : i64} {
  func.func @_linear_direct_kernel(%arg0: i32, %arg1: i32, %arg2: memref<16x32xf32, #tpu.memory_space<vmem>>, %arg3: memref<32x128xf32, #tpu.memory_space<vmem>>, %arg4: memref<1x128xf32, #tpu.memory_space<vmem>>, %arg5: memref<16x128xf32, #tpu.memory_space<vmem>>) attributes {dimension_semantics = [#tpu.dimension_semantics<parallel>, #tpu.dimension_semantics<parallel>], iteration_bounds = array<i64: 1, 1>, scalar_prefetch = 0 : i64, scratch_operands = 0 : i64, tpu.core_type = #tpu.core_type<tc>, window_params = [{transform_indices = @transform_0, window_bounds = array<i64: 16, 32>}, {transform_indices = @transform_1, window_bounds = array<i64: 32, 128>}, {transform_indices = @transform_2, window_bounds = array<i64: 1, 128>}, {transform_indices = @transform_3, window_bounds = array<i64: 16, 128>}]} {
    %c0 = arith.constant 0 : index
    %c0_0 = arith.constant 0 : index
    %0 = vector.load %arg2[%c0, %c0_0] : memref<16x32xf32, #tpu.memory_space<vmem>>, vector<16x32xf32>
    %c0_1 = arith.constant 0 : index
    %c0_2 = arith.constant 0 : index
    %1 = vector.load %arg3[%c0_1, %c0_2] : memref<32x128xf32, #tpu.memory_space<vmem>>, vector<32x128xf32>
    %cst = arith.constant dense<0.000000e+00> : vector<16x128xf32>
    %2 = tpu.matmul %0, %1, %cst {dimension_numbers = #tpu.dot_dimension_numbers<[1], [0], [0], [1], [0, 0, 1, 1], [], []>} : vector<16x32xf32>, vector<32x128xf32>, vector<16x128xf32> -> vector<16x128xf32>
    %c0_3 = arith.constant 0 : index
    %c0_4 = arith.constant 0 : index
    %3 = vector.load %arg4[%c0_3, %c0_4] : memref<1x128xf32, #tpu.memory_space<vmem>>, vector<1x128xf32>
    %4 = vector.broadcast %3 : vector<1x128xf32> to vector<16x128xf32>
    %5 = arith.addf %2, %4 : vector<16x128xf32>
    %c0_5 = arith.constant 0 : index
    %c0_6 = arith.constant 0 : index
    %6 = vector.load %arg5[%c0_5, %c0_6] : memref<16x128xf32, #tpu.memory_space<vmem>>, vector<16x128xf32>
    tpu.vector_store %arg5[%c0_5, %c0_6], %5 {strides = array<i32>} : memref<16x128xf32, #tpu.memory_space<vmem>>, vector<16x128xf32>,
    return
  }
  func.func @transform_0(%arg0: i32, %arg1: i32) -> (i32, i32) {
    %c0_i32 = arith.constant 0 : i32
    %c0_i32_0 = arith.constant 0 : i32
    return %arg0, %c0_i32 : i32, i32
  }
  func.func @transform_1(%arg0: i32, %arg1: i32) -> (i32, i32) {
    %c0_i32 = arith.constant 0 : i32
    %c0_i32_0 = arith.constant 0 : i32
    return %c0_i32, %arg1 : i32, i32
  }
  func.func @transform_2(%arg0: i32, %arg1: i32) -> (i32, i32) {
    %c0_i32 = arith.constant 0 : i32
    %c0_i32_0 = arith.constant 0 : i32
    return %c0_i32, %arg1 : i32, i32
  }
  func.func @transform_3(%arg0: i32, %arg1: i32) -> (i32, i32) {
    %c0_i32 = arith.constant 0 : i32
    return %arg0, %arg1 : i32, i32
  }
}

</mosaic_0001>

<bundles_post_ra>
// kernel: _lambda_.12
= control target key start
LH: loop header
LB: loop body
LE: loop exit
PB: predicated region body
PF: predicated region fallthrough
CT: control target
= control target key end

     0   :  { %vm39_vm0 = vcmask 261120   ;;  %vm138_vm1 = vcmask 523264   ;;  %s439_s1 = inlined_call_operand.vmem [shape: f32[32,64], index: 1, kind: input, shape index: {}]   ;;  %s440_s0 = inlined_call_operand.vmem [shape: f32[16,32], index: 0, kind: input, shape index: {}]   ;;  %s441_s3 = inlined_call_operand.vmem [shape: f32[64,32], index: 3, kind: input, shape index: {}]   ;;  %s442_s2 = inlined_call_operand.vmem [shape: f32[1,64], index: 2, kind: input, shape index: {}]   ;;  %s443_s4 = inlined_call_operand.vmem [shape: f32[1,32], index: 4, kind: input, shape index: {}]   ;;  %s444_s5 = inlined_call_operand.vmem [shape: f32[1,32], index: 5, kind: input, shape index: {}]   ;;  %s445_s6 = inlined_call_operand.vmem [shape: f32[1,32], index: 6, kind: input, shape index: {}]   ;;  %s446_s7 = inlined_call_operand.vmem [shape: f32[16,32], index: 7, kind: output, shape index: {}]  }
   0x1   :  { %v31_v0 = vld [vmem:[%s439_s1 + $0x18] sm:$0xff]  ;;  %v30_v1 = vld [vmem:[%s439_s1 + $0x10] sm:$0xff]  ;;  %v26_v2 = vld [vmem:[%s440_s0] sm:$0xff] }
   0x2   :  { %297 = vmatprep.subr.mxu0 %v31_v0  ;;  %v29_v3 = vld [vmem:[%s439_s1 + $0x8] sm:$0xff]  ;;  %305 = vmatprep.mubr.msk.f32.mxu0 %vm39_vm0, %v26_v2  ;;  %v130_v4 = vld [vmem:[%s441_s3 + $0x38] sm:$0xff]  ;;  %v129_v5 = vld [vmem:[%s441_s3 + $0x30] sm:$0xff] }
   0x3   :  { %298 = vmatpush3.msra.mxu0 %v31_v0  ;;  %308 = vmatprep.subr.mxu1 %v130_v4  ;;  %v28_v6 = vld [vmem:[%s439_s1] sm:$0xff]  ;;  %v128_v7 = vld [vmem:[%s441_s3 + $0x28] sm:$0xff]  ;;  %v126_v10 = vld [vmem:[%s441_s3 + $0x18] sm:$0xff] }
   0x4   :  { %299 = vmatprep.subr.mxu0 %v30_v1  ;;  %309 = vmatpush3.msra.mxu1 %v130_v4  ;;  %v27_v8 = vld [vmem:[%s440_s0 + $0x8] sm:$0xff]  ;;  %v127_v9 = vld [vmem:[%s441_s3 + $0x20] sm:$0xff]  ;;  %v125_v11 = vld [vmem:[%s441_s3 + $0x10] sm:$0xff] }
   0x5   :  { %300 = vmatpush3.msra.mxu0 %v30_v1  ;;  %310 = vmatprep.subr.mxu1 %v129_v5  ;;  %v124_v12 = vld [vmem:[%s441_s3 + $0x8] sm:$0xff]  ;;  %v123_v13 = vld [vmem:[%s441_s3] sm:$0xff] }
   0x6   :  { %301 = vmatprep.subr.mxu0 %v29_v3  ;;  %311 = vmatpush3.msra.mxu1 %v129_v5  ;;  %v273_v14 = vld [vmem:[%s442_s2] ss:$0 sm:$0xff] }
   0x7   :  { %302 = vmatpush3.msra.mxu0 %v29_v3  ;;  %312 = vmatprep.subr.mxu1 %v128_v7  ;;  %v276_v22 = vld [vmem:[%s443_s4] ss:$0 sm:$0xff] }
   0x8   :  { %303 = vmatprep.subr.mxu0 %v28_v6  ;;  %313 = vmatpush3.msra.mxu1 %v128_v7  ;;  %v279_v47 = vld [vmem:[%s444_s5] ss:$0 sm:$0xff] }
   0x9   :  { %304 = vmatpush3.msra.mxu0 %v28_v6  ;;  %314 = vmatprep.subr.mxu1 %v127_v9  ;;  %v280_v49 = vld [vmem:[%s445_s6] ss:$0 sm:$0xff] }
   0xa   :  { %306 = vmatmul.mubr.msk.f32.vlgmr.msra.gmra.mxu0 %vm39_vm0, %v27_v8  ;;  %315 = vmatpush3.msra.mxu1 %v127_v9 }
   0xb   :  { %316 = vmatprep.subr.mxu1 %v126_v10 }
   0xc   :  { %317 = vmatpush3.msra.mxu1 %v126_v10 }
   0xd   :  { %318 = vmatprep.subr.mxu1 %v125_v11 }
   0xe   :  { %319 = vmatpush3.msra.mxu1 %v125_v11 }
   0xf   :  { %320 = vmatprep.subr.mxu1 %v124_v12 }
  0x10   :  { %321 = vmatpush3.msra.mxu1 %v124_v12 }
  0x11   :  { %322 = vmatprep.subr.mxu1 %v123_v13 }
  0x12   :  { %323 = vmatpush3.msra.mxu1 %v123_v13 }
  0xca   :  { %v307_v15 = vpop.f32.mrf.mxu0 }
  0xcb   :  { %v118_v16 = vadd.f32 %v307_v15, %v273_v14 }
  0xcc   :  { %v112_v17 = vpop.f32.mrf.mxu0 }
  0xcd   :  { %v113_v18 = vadd.f32 %v273_v14, %v112_v17  ;;  %v122_v20 = vmax.f32 %v118_v16, 0.0 }
  0xcf   :  { %v121_v19 = vmax.f32 %v113_v18, 0.0 }
  0xd1   :  { %324 = vmatprep.mubr.msk.f32.mxu1 %vm138_vm1, %v121_v19 }
  0xd2   :  { %325 = vmatmul.mubr.msk.f32.vlgmr.msra.gmra.mxu1 %vm138_vm1, %v122_v20 }
 0x192   :  { %v326_v21 = vpop.f32.mrf.mxu1 }
 0x193   :  { %v217_v24 = vadd.f32 %v326_v21, %v276_v22 }
 0x194   :  { %v211_v23 = vpop.f32.mrf.mxu1 }
 0x195   :  { %v212_v25 = vadd.f32 %v276_v22, %v211_v23  ;;  %v221_v28 = vadd.f32 %v217_v24, %v27_v8 }
 0x197   :  { %v220_v26 = vadd.f32 %v212_v25, %v26_v2  ;;  %v227_v29 = vsel %vm39_vm0, %v221_v28, 0.0 }
 0x199   :  { %v224_v27 = vsel %vm39_vm0, %v220_v26, 0.0 }
 0x19a   :  { %225 = vadd.xlane.f32.xlu0 %v224_v27 }
 0x19e   :  { %228 = vadd.xlane.f32.xlu0 %v227_v29 }
 0x223   :  { %v226_v30 = vpop.xlane.xlu0 %225 }
 0x224   :  { %v231_v31 = vmul.f32 0.03125, %v226_v30 }
 0x226   :  { %v233_v32 = vsub.f32 %v220_v26, %v231_v31 }
 0x227   :  { %v229_v33 = vpop.xlane.xlu0 %228 }
 0x228   :  { %v232_v34 = vmul.f32 0.03125, %v229_v33  ;;  %v235_v35 = vmul.f32 %v233_v32, %v233_v32 }
 0x22a   :  { %v234_v36 = vsub.f32 %v221_v28, %v232_v34  ;;  %v237_v37 = vsel %vm39_vm0, %v235_v35, 0.0 }
 0x22b   :  { %238 = vadd.xlane.f32.xlu1 %v237_v37 }
 0x22c   :  { %v236_v38 = vmul.f32 %v234_v36, %v234_v36 }
 0x22e   :  { %v240_v39 = vsel %vm39_vm0, %v236_v38, 0.0 }
 0x22f   :  { %241 = vadd.xlane.f32.xlu1 %v240_v39 }
 0x2b4   :  { %v239_v40 = vpop.xlane.xlu1 %238 }
 0x2b5   :  { %v243_v41 = vmul.f32 0.03125, %v239_v40 }
 0x2b7   :  { %v245_v42 = vadd.f32 1e-12, %v243_v41 }
 0x2b8   :  { %v242_v43 = vpop.xlane.xlu1 %241 }
 0x2b9   :  { %327 = vrsqrt.f32 %v245_v42  ;;  %v244_v44 = vmul.f32 0.03125, %v242_v43 }
 0x2bb   :  { %v246_v45 = vadd.f32 1e-12, %v244_v44 }
 0x2bd   :  { %329 = vrsqrt.f32 %v246_v45 }
 0x2c6   :  { %v328_v46 = vpop.eup %327 }
 0x2c7   :  { %v249_v48 = vmul.f32 %v328_v46, %v233_v32 }
 0x2c9   :  { %v257_v50 = vmul.f32 %v279_v47, %v249_v48 }
 0x2ca   :  { %v330_v51 = vpop.eup %329 }
 0x2cb   :  { %v265_v52 = vadd.f32 %v280_v49, %v257_v50  ;;  %v250_v53 = vmul.f32 %v330_v51, %v234_v36 }
 0x2cd   :  { %267 = vst.msk [vmem:[%s446_s7] sm:$0xff] %vm39_vm0, %v265_v52  ;;  %v258_v54 = vmul.f32 %v279_v47, %v250_v53 }
 0x2cf   :  { %v266_v55 = vadd.f32 %v280_v49, %v258_v54 }
 0x2d1   :  { %268 = vst.msk [vmem:[%s446_s7 + $0x8] sm:$0xff] %vm39_vm0, %v266_v55 }

// kernel: _lambda_.21
= control target key start
LH: loop header
LB: loop body
LE: loop exit
PB: predicated region body
PF: predicated region fallthrough
CT: control target
= control target key end

     0   :  { %vm27_vm0 = vcmask 261120   ;;  %s184_s1 = inlined_call_operand.vmem [shape: f32[32,128], index: 1, kind: input, shape index: {}]   ;;  %s185_s0 = inlined_call_operand.vmem [shape: f32[16,32], index: 0, kind: input, shape index: {}]   ;;  %s186_s2 = inlined_call_operand.vmem [shape: f32[1,128], index: 2, kind: input, shape index: {}]   ;;  %s187_s3 = inlined_call_operand.vmem [shape: f32[16,128], index: 3, kind: output, shape index: {}]  }
   0x1   :  { %v19_v0 = vld [vmem:[%s184_s1 + $0x18] sm:$0xff]  ;;  %v18_v1 = vld [vmem:[%s184_s1 + $0x10] sm:$0xff]  ;;  %v14_v2 = vld [vmem:[%s185_s0] sm:$0xff] }
   0x2   :  { %124 = vmatprep.subr.mxu0 %v19_v0  ;;  %v17_v3 = vld [vmem:[%s184_s1 + $0x8] sm:$0xff]  ;;  %132 = vmatprep.mubr.msk.f32.mxu0 %vm27_vm0, %v14_v2  ;;  %v16_v4 = vld [vmem:[%s184_s1] sm:$0xff] }
   0x3   :  { %125 = vmatpush3.msra.mxu0 %v19_v0  ;;  %v15_v5 = vld [vmem:[%s185_s0 + $0x8] sm:$0xff]  ;;  %v115_v6 = vld [vmem:[%s186_s2] ss:$0 sm:$0xff] }
   0x4   :  { %126 = vmatprep.subr.mxu0 %v18_v1 }
   0x5   :  { %127 = vmatpush3.msra.mxu0 %v18_v1 }
   0x6   :  { %128 = vmatprep.subr.mxu0 %v17_v3 }
   0x7   :  { %129 = vmatpush3.msra.mxu0 %v17_v3 }
   0x8   :  { %130 = vmatprep.subr.mxu0 %v16_v4 }
   0x9   :  { %131 = vmatpush3.msra.mxu0 %v16_v4 }
   0xa   :  { %133 = vmatmul.mubr.msk.f32.vlgmr.msra.gmra.mxu0 %vm27_vm0, %v15_v5 }
  0xca   :  { %v134_v7 = vpop.f32.mrf.mxu0 }
  0xcb   :  { %v106_v8 = vadd.f32 %v134_v7, %v115_v6 }
  0xcc   :  { %v100_v9 = vpop.f32.mrf.mxu0 }
  0xcd   :  { %110 = vst [vmem:[%s187_s3 + $0x8] sm:$0xff] %v106_v8  ;;  %v101_v10 = vadd.f32 %v115_v6, %v100_v9 }
  0xcf   :  { %109 = vst [vmem:[%s187_s3] sm:$0xff] %v101_v10 }

// kernel: _lambda_.11
= control target key start
LH: loop header
LB: loop body
LE: loop exit
PB: predicated region body
PF: predicated region fallthrough
CT: control target
= control target key end

     0   :  { %s2902_s21 = smov 0   ;;  %s3304_s0 = inlined_call_operand.vmem [shape: f32[2,8,32], index: 0, kind: input, shape index: {}]   ;;  %s3305_s1 = inlined_call_operand.vmem [shape: f32[2,8,1], index: 1, kind: input, shape index: {}]   ;;  %s3306_s2 = inlined_call_operand.vmem [shape: f32[4,32,8], index: 2, kind: input, shape index: {}]   ;;  %s3307_s3 = inlined_call_operand.vmem [shape: f32[4,1,8], index: 3, kind: input, shape index: {}]   ;;  %s3308_s4 = inlined_call_operand.vmem [shape: f32[4,32,8], index: 4, kind: input, shape index: {}]   ;;  %s3309_s5 = inlined_call_operand.vmem [shape: f32[4,1,8], index: 5, kind: input, shape index: {}]   ;;  %s3310_s6 = inlined_call_operand.vmem [shape: f32[4,32,8], index: 6, kind: input, shape index: {}]   ;;  %s3311_s7 = inlined_call_operand.vmem [shape: f32[4,1,8], index: 7, kind: input, shape index: {}]   ;;  %s3312_s8 = inlined_call_operand.vmem [shape: f32[4,8,32], index: 8, kind: input, shape index: {}]   ;;  %s3313_s9 = inlined_call_operand.vmem [shape: f32[1,32], index: 9, kind: input, shape index: {}]   ;;  %s3314_s10 = inlined_call_operand.vmem [shape: f32[1,32], index: 10, kind: input, shape index: {}]   ;;  %s3315_s11 = inlined_call_operand.vmem [shape: f32[1,32], index: 11, kind: input, shape index: {}]   ;;  %s3316_s12 = inlined_call_operand.vmem [shape: f32[2,8,32], index: 12, kind: output, shape index: {}]  }
   0x1 LB: > { %s2467_s22 = sadd.s32 4294967295, %s2832_s21   ;;  %p2471_p0 = scmp.ge.s32.totalorder %s2832_s21, 1  ;;  %s2832_s21 = sphi %s2902_s21, %s22_s21  }
   0x2   : > { %p370_p1 = scmp.lt.s32.totalorder %s2832_s21, 3 }
   0x4   : > { %p371_p2 = pnand %p2471_p0, %p370_p1 }
   0x5   : > { %p414_p3 = scmp.lt.s32.totalorder (!%p371_p2), %s2467_s22, 1 }
   0x6   : > { %374 = sbr.rel (%p371_p2) target bundleno = 1463 (0x5b7), region = 68 }
   0xb   : > { %v430_v0 = vld [vmem:[%s3306_s2 + $0x18] sm:$0xff]  ;;  %v2834_v2 = vmov 0.0   ;;  %v429_v3 = vld [vmem:[%s3306_s2 + $0x10] sm:$0xff]  ;;  %s3318_s22 = smov (!%p414_p3, %s2467_s22), 1  ;;  %v428_v5 = vld [vmem:[%s3306_s2 + $0x8] sm:$0xff]  ;;  %vm471_vm0 = vcmask 261120  }
   0xc   : > { %v434_v1 = vld [vmem:[%s3306_s2 + $0x38] sm:$0xff]  ;;  %2604 = vmatprep.subr.mxu0 %v2834_v2  ;;  %2615 = vmatprep.subr.mxu1 %v2834_v2  ;;  %v433_v4 = vld [vmem:[%s3306_s2 + $0x30] sm:$0xff]  ;;  %v432_v6 = vld [vmem:[%s3306_s2 + $0x28] sm:$0xff]  ;;  %s2932_s17 = sshll.u32 %s3318_s22, 3  ;;  %vm2835_vm1 = vmmov 0   ;;  %v2836_v50 = vmov 0  }
   0xd   : > { %2605 = vmatpush3.msra.mxu0 %v430_v0  ;;  %2616 = vmatpush3.msra.mxu1 %v434_v1  ;;  %v427_v7 = vld [vmem:[%s3306_s2] sm:$0xff]  ;;  %s417_s24 = scalar_lea.vmem %s3304_s0, %s2932_s17  ;;  %v438_v10 = vld [vmem:[%s3306_s2 + $0x58] sm:$0xff]  ;;  %v437_v12 = vld [vmem:[%s3306_s2 + $0x50] sm:$0xff]  ;;  %s421_s28 = scalar_lea.vmem %s3305_s1, %s2932_s17  ;;  %vm1403_vm3 = vcmask 64512  }
   0xe   : > { %2606 = vmatprep.subr.mxu0 %v2834_v2  ;;  %2617 = vmatprep.subr.mxu1 %v2834_v2  ;;  %v431_v8 = vld [vmem:[%s3306_s2 + $0x20] sm:$0xff]  ;;  %v442_v11 = vld [vmem:[%s3306_s2 + $0x78] sm:$0xff]  ;;  %v441_v13 = vld [vmem:[%s3306_s2 + $0x70] sm:$0xff]  ;;  %s425_s20 = scalar_lea.vmem %s3316_s12, %s2932_s17 }
   0xf   : > { %2607 = vmatpush3.msra.mxu0 %v429_v3  ;;  %2618 = vmatpush3.msra.mxu1 %v433_v4  ;;  %v2946_v9 = vld [vmem:[%s417_s24] sm:$0xff]  ;;  %v436_v14 = vld [vmem:[%s3306_s2 + $0x48] sm:$0xff]  ;;  %v758_v18 = vld [vmem:[%s3308_s4 + $0x18] sm:$0xff] }
  0x10   : > { %2608 = vmatprep.subr.mxu0 %v2834_v2  ;;  %2619 = vmatprep.subr.mxu1 %v2834_v2  ;;  %v440_v15 = vld [vmem:[%s3306_s2 + $0x68] sm:$0xff]  ;;  %v435_v16 = vld [vmem:[%s3306_s2 + $0x40] sm:$0xff]  ;;  %v762_v19 = vld [vmem:[%s3308_s4 + $0x38] sm:$0xff] }
  0x11   : > { %2609 = vmatpush3.msra.mxu0 %v428_v5  ;;  %2620 = vmatpush3.msra.mxu1 %v432_v6  ;;  %v439_v17 = vld [vmem:[%s3306_s2 + $0x60] sm:$0xff]  ;;  %v757_v20 = vld [vmem:[%s3308_s4 + $0x10] sm:$0xff]  ;;  %v756_v22 = vld [vmem:[%s3308_s4 + $0x8] sm:$0xff] }
  0x12   : > { %2610 = vmatprep.subr.mxu0 %v2834_v2  ;;  %2621 = vmatprep.subr.mxu1 %v2834_v2  ;;  %v761_v21 = vld [vmem:[%s3308_s4 + $0x30] sm:$0xff]  ;;  %v760_v23 = vld [vmem:[%s3308_s4 + $0x28] sm:$0xff]  ;;  %v755_v24 = vld [vmem:[%s3308_s4] sm:$0xff] }
  0x13   : > { %2611 = vmatpush3.msra.mxu0 %v427_v7  ;;  %2612 = vmatprep.mubr.msk.f32.mxu0 %vm2835_vm1, %v2834_v2  ;;  %v759_v25 = vld [vmem:[%s3308_s4 + $0x20] sm:$0xff]  ;;  %v766_v26 = vld [vmem:[%s3308_s4 + $0x58] sm:$0xff]  ;;  %v765_v28 = vld [vmem:[%s3308_s4 + $0x50] sm:$0xff] }
  0x14   : > { %2622 = vmatpush3.msra.mxu1 %v431_v8  ;;  %2613 = vmatmul.mubr.msk.f32.vlgmr.msra.gmra.mxu0 %vm471_vm0, %v2946_v9  ;;  %v770_v27 = vld [vmem:[%s3308_s4 + $0x78] sm:$0xff]  ;;  %v769_v29 = vld [vmem:[%s3308_s4 + $0x70] sm:$0xff]  ;;  %v764_v30 = vld [vmem:[%s3308_s4 + $0x48] sm:$0xff] }
  0x15   : > { %2623 = vmatprep.mubr.msk.f32.mxu1 %vm2835_vm1, %v2834_v2  ;;  %2626 = vmatprep.subr.mxu0 %v2834_v2  ;;  %v768_v31 = vld [vmem:[%s3308_s4 + $0x68] sm:$0xff]  ;;  %v763_v32 = vld [vmem:[%s3308_s4 + $0x40] sm:$0xff]  ;;  %v1082_v34 = vld [vmem:[%s3310_s6 + $0x18] sm:$0xff] }
  0x16   : > { %2637 = vmatprep.subr.mxu1 %v2834_v2  ;;  %2624 = vmatmul.mubr.msk.f32.vlgmr.msra.gmra.mxu1 %vm471_vm0, %v2946_v9  ;;  %v767_v33 = vld [vmem:[%s3308_s4 + $0x60] sm:$0xff]  ;;  %v1086_v35 = vld [vmem:[%s3310_s6 + $0x38] sm:$0xff]  ;;  %v1081_v36 = vld [vmem:[%s3310_s6 + $0x10] sm:$0xff] }
  0x17   : > { %2627 = vmatpush3.msra.mxu0 %v438_v10  ;;  %2638 = vmatpush3.msra.mxu1 %v442_v11  ;;  %v1085_v37 = vld [vmem:[%s3310_s6 + $0x30] sm:$0xff]  ;;  %v1080_v38 = vld [vmem:[%s3310_s6 + $0x8] sm:$0xff]  ;;  %v1079_v40 = vld [vmem:[%s3310_s6] sm:$0xff] }
  0x18   : > { %2628 = vmatprep.subr.mxu0 %v2834_v2  ;;  %2639 = vmatprep.subr.mxu1 %v2834_v2  ;;  %v1084_v39 = vld [vmem:[%s3310_s6 + $0x28] sm:$0xff]  ;;  %v1083_v41 = vld [vmem:[%s3310_s6 + $0x20] sm:$0xff]  ;;  %v1090_v42 = vld [vmem:[%s3310_s6 + $0x58] sm:$0xff] }
  0x19   : > { %2629 = vmatpush3.msra.mxu0 %v437_v12  ;;  %2640 = vmatpush3.msra.mxu1 %v441_v13  ;;  %v1094_v43 = vld [vmem:[%s3310_s6 + $0x78] sm:$0xff]  ;;  %v1089_v44 = vld [vmem:[%s3310_s6 + $0x50] sm:$0xff]  ;;  %v1088_v46 = vld [vmem:[%s3310_s6 + $0x48] sm:$0xff] }
  0x1a   : > { %2630 = vmatprep.subr.mxu0 %v2834_v2  ;;  %2641 = vmatprep.subr.mxu1 %v2834_v2  ;;  %v1093_v45 = vld [vmem:[%s3310_s6 + $0x70] sm:$0xff]  ;;  %v1092_v47 = vld [vmem:[%s3310_s6 + $0x68] sm:$0xff]  ;;  %v1087_v48 = vld [vmem:[%s3310_s6 + $0x40] sm:$0xff] }
  0x1b   : > { %2631 = vmatpush3.msra.mxu0 %v436_v14  ;;  %2642 = vmatpush3.msra.mxu1 %v440_v15  ;;  %v1091_v49 = vld [vmem:[%s3310_s6 + $0x60] sm:$0xff] }
  0x1c   : > { %2632 = vmatprep.subr.mxu0 %v2834_v2  ;;  %2643 = vmatprep.subr.mxu1 %v2834_v2  ;;  %v1712_v51 = vld [vmem:[%s421_s28] sm:$0xff] }
  0x1d   : > { %2633 = vmatpush3.msra.mxu0 %v435_v16  ;;  %2634 = vmatprep.mubr.msk.f32.mxu0 %vm2835_vm1, %v2834_v2  ;;  %vm1713_vm2 = vcmp.gt.f32.partialorder %v1712_v51, 0.0  ;;  %v2483_v61 = vld [vmem:[%s3309_s5] ss:$0 sm:$0xff]  ;;  %v2484_v62 = vld [vmem:[%s3309_s5 + $0x1] ss:$0 sm:$0xff] }
  0x1e   : > { %2644 = vmatpush3.msra.mxu1 %v439_v17  ;;  %2635 = vmatmul.mubr.msk.f32.vlgmr.msra.gmra.mxu0 %vm471_vm0, %v2946_v9  ;;  %v1714_v52 = vsel %vm1713_vm2, 1, %v2836_v50  ;;  %v2475_v1 = vld [vmem:[%s3307_s3] ss:$0 sm:$0xff]  ;;  %v2476_v3 = vld [vmem:[%s3307_s3 + $0x1] ss:$0 sm:$0xff] }
  0x1f   : > { %2645 = vmatprep.mubr.msk.f32.mxu1 %vm2835_vm1, %v2834_v2  ;;  %2648 = vmatprep.subr.mxu0 %v2834_v2  ;;  %v2485_v11 = vld [vmem:[%s3309_s5 + $0x2] ss:$0 sm:$0xff]  ;;  %v2486_v12 = vld [vmem:[%s3309_s5 + $0x3] ss:$0 sm:$0xff] }
  0x20   : > { %2659 = vmatprep.subr.mxu1 %v2834_v2  ;;  %2646 = vmatmul.mubr.msk.f32.vlgmr.msra.gmra.mxu1 %vm471_vm0, %v2946_v9  ;;  %v2477_v15 = vld [vmem:[%s3307_s3 + $0x2] ss:$0 sm:$0xff]  ;;  %v2478_v16 = vld [vmem:[%s3307_s3 + $0x3] ss:$0 sm:$0xff] }
  0x21   : > { %2649 = vmatpush3.msra.mxu0 %v758_v18  ;;  %2660 = vmatpush3.msra.mxu1 %v762_v19 }
  0x22   : > { %2650 = vmatprep.subr.mxu0 %v2834_v2  ;;  %2661 = vmatprep.subr.mxu1 %v2834_v2 }
  0x23   : > { %2651 = vmatpush3.msra.mxu0 %v757_v20  ;;  %2662 = vmatpush3.msra.mxu1 %v761_v21 }
  0x24   : > { %2652 = vmatprep.subr.mxu0 %v2834_v2  ;;  %2663 = vmatprep.subr.mxu1 %v2834_v2 }
  0x25   : > { %2653 = vmatpush3.msra.mxu0 %v756_v22  ;;  %2664 = vmatpush3.msra.mxu1 %v760_v23  ;;  %v2491_v23 = vld [vmem:[%s3311_s7] ss:$0 sm:$0xff] }
  0x26   : > { %2654 = vmatprep.subr.mxu0 %v2834_v2  ;;  %2665 = vmatprep.subr.mxu1 %v2834_v2 }
  0x27   : > { %2655 = vmatpush3.msra.mxu0 %v755_v24  ;;  %2656 = vmatprep.mubr.msk.f32.mxu0 %vm2835_vm1, %v2834_v2 }
  0x28   : > { %2666 = vmatpush3.msra.mxu1 %v759_v25  ;;  %2667 = vmatprep.mubr.msk.f32.mxu1 %vm2835_vm1, %v2834_v2  ;;  %v2492_v25 = vld [vmem:[%s3311_s7 + $0x1] ss:$0 sm:$0xff] }
  0x29   : > { %2657 = vmatmul.mubr.msk.f32.vlgmr.msra.gmra.mxu0 %vm471_vm0, %v2946_v9  ;;  %2668 = vmatmul.mubr.msk.f32.vlgmr.msra.gmra.mxu1 %vm471_vm0, %v2946_v9 }
  0x2a   : > { %2670 = vmatprep.subr.mxu0 %v2834_v2  ;;  %2681 = vmatprep.subr.mxu1 %v2834_v2 }
  0x2b   : > { %2671 = vmatpush3.msra.mxu0 %v766_v26  ;;  %2682 = vmatpush3.msra.mxu1 %v770_v27 }
  0x2c   : > { %2672 = vmatprep.subr.mxu0 %v2834_v2  ;;  %2683 = vmatprep.subr.mxu1 %v2834_v2 }
  0x2d   : > { %2673 = vmatpush3.msra.mxu0 %v765_v28  ;;  %2684 = vmatpush3.msra.mxu1 %v769_v29 }
  0x2e   : > { %2674 = vmatprep.subr.mxu0 %v2834_v2  ;;  %2685 = vmatprep.subr.mxu1 %v2834_v2 }
  0x2f   : > { %2675 = vmatpush3.msra.mxu0 %v764_v30  ;;  %2686 = vmatpush3.msra.mxu1 %v768_v31 }
  0x30   : > { %2676 = vmatprep.subr.mxu0 %v2834_v2  ;;  %2687 = vmatprep.subr.mxu1 %v2834_v2 }
  0x31   : > { %2677 = vmatpush3.msra.mxu0 %v763_v32  ;;  %2678 = vmatprep.mubr.msk.f32.mxu0 %vm2835_vm1, %v2834_v2 }
  0x32   : > { %2688 = vmatpush3.msra.mxu1 %v767_v33  ;;  %2689 = vmatprep.mubr.msk.f32.mxu1 %vm2835_vm1, %v2834_v2 }
  0x33   : > { %2679 = vmatmul.mubr.msk.f32.vlgmr.msra.gmra.mxu0 %vm471_vm0, %v2946_v9  ;;  %2690 = vmatmul.mubr.msk.f32.vlgmr.msra.gmra.mxu1 %vm471_vm0, %v2946_v9 }
  0x34   : > { %2692 = vmatprep.subr.mxu0 %v2834_v2  ;;  %2703 = vmatprep.subr.mxu1 %v2834_v2 }
  0x35   : > { %2700 = vmatprep.mubr.msk.f32.mxu0 %vm2835_vm1, %v2834_v2  ;;  %2711 = vmatprep.mubr.msk.f32.mxu1 %vm2835_vm1, %v2834_v2 }
  0x36   : > { %2693 = vmatpush3.msra.mxu0 %v1082_v34  ;;  %2704 = vmatpush3.msra.mxu1 %v1086_v35 }
  0x37   : > { %2694 = vmatprep.subr.mxu0 %v2834_v2  ;;  %2705 = vmatprep.subr.mxu1 %v2834_v2 }
  0x38   : > { %2695 = vmatpush3.msra.mxu0 %v1081_v36  ;;  %2706 = vmatpush3.msra.mxu1 %v1085_v37 }
  0x39   : > { %2696 = vmatprep.subr.mxu0 %v2834_v2  ;;  %2707 = vmatprep.subr.mxu1 %v2834_v2 }
  0x3a   : > { %2697 = vmatpush3.msra.mxu0 %v1080_v38  ;;  %2708 = vmatpush3.msra.mxu1 %v1084_v39 }
  0x3b   : > { %2698 = vmatprep.subr.mxu0 %v2834_v2  ;;  %2709 = vmatprep.subr.mxu1 %v2834_v2 }
  0x3c   : > { %2699 = vmatpush3.msra.mxu0 %v1079_v40  ;;  %2710 = vmatpush3.msra.mxu1 %v1083_v41 }
  0x3d   : > { %2701 = vmatmul.mubr.msk.f32.vlgmr.msra.gmra.mxu0 %vm471_vm0, %v2946_v9  ;;  %2714 = vmatprep.subr.mxu0 %v2834_v2 }
  0x3e   : > { %2715 = vmatpush3.msra.mxu0 %v1090_v42  ;;  %2725 = vmatprep.subr.mxu1 %v2834_v2 }
  0x3f   : > { %2712 = vmatmul.mubr.msk.f32.vlgmr.msra.gmra.mxu1 %vm471_vm0, %v2946_v9  ;;  %2716 = vmatprep.subr.mxu0 %v2834_v2 }
  0x40   : > { %2726 = vmatpush3.msra.mxu1 %v1094_v43  ;;  %2717 = vmatpush3.msra.mxu0 %v1089_v44 }
  0x41   : > { %2727 = vmatprep.subr.mxu1 %v2834_v2  ;;  %2718 = vmatprep.subr.mxu0 %v2834_v2 }
  0x42   : > { %2728 = vmatpush3.msra.mxu1 %v1093_v45  ;;  %2719 = vmatpush3.msra.mxu0 %v1088_v46 }
  0x43   : > { %2729 = vmatprep.subr.mxu1 %v2834_v2  ;;  %2720 = vmatprep.subr.mxu0 %v2834_v2 }
  0x44   : > { %2730 = vmatpush3.msra.mxu1 %v1092_v47  ;;  %2722 = vmatprep.mubr.msk.f32.mxu0 %vm2835_vm1, %v2834_v2 }
  0x45   : > { %2731 = vmatprep.subr.mxu1 %v2834_v2  ;;  %2733 = vmatprep.mubr.msk.f32.mxu1 %vm2835_vm1, %v2834_v2 }
  0x46   : > { %2721 = vmatpush3.msra.mxu0 %v1087_v48  ;;  %2732 = vmatpush3.msra.mxu1 %v1091_v49 }
  0x47   : > { %2723 = vmatmul.mubr.msk.f32.vlgmr.msra.gmra.mxu0 %vm471_vm0, %v2946_v9  ;;  %2734 = vmatmul.mubr.msk.f32.vlgmr.msra.gmra.mxu1 %vm471_vm0, %v2946_v9 }
  0x48   : > { %2736 = vmatprep.subr.mxu0 %v2834_v2  ;;  %2741 = vmatprep.subr.mxu1 %v2834_v2 }
  0x49   : > { %2738 = vmatprep.mubr.msk.f32.mxu0 %vm2835_vm1, %v2834_v2  ;;  %2743 = vmatprep.mubr.msk.f32.mxu1 %vm2835_vm1, %v2834_v2 }
  0x4a   : > { %2807 = vset.pattern.permute.xlu0 %v2836_v50 }
  0x4b   : > { %1716 = vperm.xlu0 %2807, %v1714_v52  }
  0xc6   : > { %v1717_v35 = vpop.permute.xlu0 %1716 }
  0xc7   : > { %vm1718_vm4 = vcmp.eq.s32.totalorder %v1717_v35, 1  ;;  %v2062_v35 = vld [vmem:[%s3312_s8 + $0x18] sm:$0xff] }
  0xd4   : > { %v541_v53 = vpop.f32.mrf.mxu0 }
  0xd5   : > { %v542_v8 = vadd.f32 %v2475_v1, %v541_v53 }
  0xd6   : > { %v2614_v54 = vpop.f32.mrf.mxu0  ;;  %v611_v55 = vpop.f32.mrf.mxu1 }
  0xd7   : > { %v612_v10 = vadd.f32 %v2476_v3, %v611_v55 }
  0xd8   : > { %v2625_v56 = vpop.f32.mrf.mxu1 }
  0xde   : > { %v681_v57 = vpop.f32.mrf.mxu0 }
  0xdf   : > { %v682_v21 = vadd.f32 %v2477_v15, %v681_v57 }
  0xe0   : > { %v2636_v58 = vpop.f32.mrf.mxu0  ;;  %v751_v59 = vpop.f32.mrf.mxu1 }
  0xe1   : > { %v752_v22 = vadd.f32 %v2478_v16, %v751_v59 }
  0xe2   : > { %v2647_v60 = vpop.f32.mrf.mxu1 }
  0xe9   : > { %v865_v63 = vpop.f32.mrf.mxu0  ;;  %v935_v0 = vpop.f32.mrf.mxu1 }
  0xea   : > { %v866_v4 = vadd.f32 %v2483_v61, %v865_v63  ;;  %v936_v5 = vadd.f32 %v2484_v62, %v935_v0 }
  0xeb   : > { %v2658_v6 = vpop.f32.mrf.mxu0  ;;  %v2669_v7 = vpop.f32.mrf.mxu1 }
  0xec   : > { %2737 = vmatpush3.xpose.msk.msra.mxu0 %vm1403_vm3, %v866_v4  ;;  %2742 = vmatpush3.xpose.msk.msra.mxu1 %vm1403_vm3, %v936_v5 }
  0xed   : > { %2746 = vmatprep.subr.mxu0 %v2834_v2  ;;  %2751 = vmatprep.subr.mxu1 %v2834_v2 }
  0xef   : > { %2739 = vmatmul.mubr.msk.f32.vlgmr.msra.gmra.mxu0 %vm1403_vm3, %v542_v8  ;;  %2744 = vmatmul.mubr.msk.f32.vlgmr.msra.gmra.mxu1 %vm1403_vm3, %v612_v10 }
  0xf0   : > { %2748 = vmatprep.mubr.msk.f32.mxu0 %vm2835_vm1, %v2834_v2  ;;  %2753 = vmatprep.mubr.msk.f32.mxu1 %vm2835_vm1, %v2834_v2 }
  0xf3   : > { %v1005_v13 = vpop.f32.mrf.mxu0  ;;  %v1075_v14 = vpop.f32.mrf.mxu1 }
  0xf4   : > { %v1006_v17 = vadd.f32 %v2485_v11, %v1005_v13  ;;  %v1076_v18 = vadd.f32 %v2486_v12, %v1075_v14 }
  0xf5   : > { %v2680_v19 = vpop.f32.mrf.mxu0  ;;  %v2691_v20 = vpop.f32.mrf.mxu1 }
  0xf6   : > { %2747 = vmatpush3.xpose.msk.msra.mxu0 %vm1403_vm3, %v1006_v17  ;;  %2752 = vmatpush3.xpose.msk.msra.mxu1 %vm1403_vm3, %v1076_v18  ;;  %v2493_v17 = vld [vmem:[%s3311_s7 + $0x2] ss:$0 sm:$0xff] }
  0xf7   : > { %2756 = vmatprep.subr.mxu0 %v2834_v2  ;;  %2761 = vmatprep.subr.mxu1 %v2834_v2 }
  0xf9   : > { %2749 = vmatmul.mubr.msk.f32.vlgmr.msra.gmra.mxu0 %vm1403_vm3, %v682_v21  ;;  %2754 = vmatmul.mubr.msk.f32.vlgmr.msra.gmra.mxu1 %vm1403_vm3, %v752_v22  ;;  %v2494_v22 = vld [vmem:[%s3311_s7 + $0x3] ss:$0 sm:$0xff] }
  0xfa   : > { %2758 = vmatprep.mubr.msk.f32.mxu0 %vm2835_vm1, %v2834_v2  ;;  %2763 = vmatprep.mubr.msk.f32.mxu1 %vm2835_vm1, %v2834_v2 }
  0xfd   : > { %v1189_v24 = vpop.f32.mrf.mxu0 }
  0xfe   : > { %v1190_v26 = vadd.f32 %v2491_v23, %v1189_v24 }
  0xff   : > { %v2702_v27 = vpop.f32.mrf.mxu0  ;;  %v1259_v28 = vpop.f32.mrf.mxu1 }
 0x100   : > { %v1260_v29 = vadd.f32 %v2492_v25, %v1259_v28  ;;  %2757 = vmatpush3.msra.mxu0 %v1190_v26 }
 0x101   : > { %v2713_v30 = vpop.f32.mrf.mxu1  ;;  %2766 = vmatprep.subr.mxu0 %v2834_v2 }
 0x102   : > { %2762 = vmatpush3.msra.mxu1 %v1260_v29  ;;  %v2059_v30 = vld [vmem:[%s3312_s8] sm:$0xff] }
 0x103   : > { %2771 = vmatprep.subr.mxu1 %v2834_v2 }
 0x107   : > { %v3220_v31 = vpop.f32.mrf.mxu0  ;;  %v3222_v32 = vpop.f32.mrf.mxu1 }
 0x108   : > { %v1330_v21 = vadd.f32 %v2493_v17, %v3220_v31  ;;  %v1400_v25 = vadd.f32 %v2494_v22, %v3222_v32  ;;  %v2060_v31 = vld [vmem:[%s3312_s8 + $0x8] sm:$0xff]  ;;  %v2061_v32 = vld [vmem:[%s3312_s8 + $0x10] sm:$0xff] }
 0x109   : > { %v2724_v33 = vpop.f32.mrf.mxu0  ;;  %v2735_v34 = vpop.f32.mrf.mxu1 }
 0x1af   : > { %v1476_v36 = vpop.f32.mrf.mxu0  ;;  %v1552_v37 = vpop.f32.mrf.mxu1 }
 0x1b0   : > { %v1708_v38 = vmul.f32 0.35355338, %v1476_v36  ;;  %v1709_v39 = vmul.f32 0.35355338, %v1552_v37 }
 0x1b1   : > { %v2740_v40 = vpop.f32.mrf.mxu0  ;;  %v2745_v41 = vpop.f32.mrf.mxu1 }
 0x1b2   : > { %v1720_v42 = vsel %vm1718_vm4, %v1709_v39, -10000.0  ;;  %v1719_v43 = vsel %vm1718_vm4, %v1708_v38, -10000.0 }
 0x1b3   : > { %v1726_v44 = vsel %vm1403_vm3, %v1720_v42, -inf  ;;  %v1723_v45 = vsel %vm1403_vm3, %v1719_v43, -inf }
 0x1b4   : > { %1727 = vmax.xlane.f32.xlu1 %v1726_v44  ;;  %1724 = vmax.xlane.f32.xlu0 %v1723_v45 }
 0x1b9   : > { %v1628_v46 = vpop.f32.mrf.mxu0  ;;  %v1704_v47 = vpop.f32.mrf.mxu1 }
 0x1ba   : > { %v1710_v48 = vmul.f32 0.35355338, %v1628_v46  ;;  %v1711_v49 = vmul.f32 0.35355338, %v1704_v47 }
 0x1bb   : > { %v2750_v50 = vpop.f32.mrf.mxu0  ;;  %v2755_v51 = vpop.f32.mrf.mxu1 }
 0x1bc   : > { %v1721_v52 = vsel %vm1718_vm4, %v1710_v48, -10000.0  ;;  %v1722_v54 = vsel %vm1718_vm4, %v1711_v49, -10000.0 }
 0x1bd   : > { %v1729_v53 = vsel %vm1403_vm3, %v1721_v52, -inf  ;;  %v1732_v55 = vsel %vm1403_vm3, %v1722_v54, -inf }
 0x1be   : > { %1730 = vmax.xlane.f32.xlu1 %v1729_v53 }
 0x1c2   : > { %1733 = vmax.xlane.f32.xlu1 %v1732_v55 }
 0x23d   : > { %v1728_v56 = vpop.xlane.xlu1 %1727  ;;  %v1725_v57 = vpop.xlane.xlu0 %1724 }
 0x23e   : > { %v1736_v58 = vsub.f32 %v1720_v42, %v1728_v56  ;;  %v1735_v59 = vsub.f32 %v1719_v43, %v1725_v57 }
 0x240   : > { %v1739_v60 = vmul.f32 1.442695, %v1735_v59  ;;  %v1741_v61 = vmul.f32 1.442695, %v1736_v58 }
 0x242   : > { %2808 = vpow2.f32 %v1739_v60 }
 0x243   : > { %2810 = vpow2.f32 %v1741_v61 }
 0x247   : > { %v1731_v62 = vpop.xlane.xlu1 %1730 }
 0x248   : > { %v1737_v63 = vsub.f32 %v1721_v52, %v1731_v62 }
 0x24a   : > { %v1743_v0 = vmul.f32 1.442695, %v1737_v63 }
 0x24b   : > { %v1734_v1 = vpop.xlane.xlu1 %1733 }
 0x24c   : > { %2812 = vpow2.f32 %v1743_v0  ;;  %v1738_v3 = vsub.f32 %v1722_v54, %v1734_v1  ;;  %v2515_v54 = vld [vmem:[%s3313_s9] ss:$0 sm:$0xff] }
 0x24e   : > { %v1745_v4 = vmul.f32 1.442695, %v1738_v3 }
 0x24f   : > { %v2809_v5 = vpop.eup %2808 }
 0x250   : > { %2814 = vpow2.f32 %v1745_v4  ;;  %v1747_v6 = vsel %vm1403_vm3, %v2809_v5, 0.0  ;;  %v2811_v7 = vpop.eup %2810 }
 0x251   : > { %1748 = vadd.xlane.f32.xlu1 %v1747_v6  ;;  %v1750_v8 = vsel %vm1403_vm3, %v2811_v7, 0.0 }
 0x255   : > { %1751 = vadd.xlane.f32.xlu1 %v1750_v8 }
 0x259   : > { %v2813_v10 = vpop.eup %2812 }
 0x25a   : > { %v1753_v11 = vsel %vm1403_vm3, %v2813_v10, 0.0 }
 0x25b   : > { %1754 = vadd.xlane.f32.xlu1 %v1753_v11 }
 0x25d   : > { %v2815_v12 = vpop.eup %2814 }
 0x25e   : > { %v1756_v13 = vsel %vm1403_vm3, %v2815_v12, 0.0 }
 0x25f   : > { %1757 = vadd.xlane.f32.xlu1 %v1756_v13 }
 0x2da   : > { %v1749_v14 = vpop.xlane.xlu1 %1748 }
 0x2db   : > { %2816 = vrcp.f32 %v1749_v14 }
 0x2de   : > { %v1752_v15 = vpop.xlane.xlu1 %1751 }
 0x2df   : > { %2818 = vrcp.f32 %v1752_v15 }
 0x2e4   : > { %v1755_v16 = vpop.xlane.xlu1 %1754 }
 0x2e5   : > { %2820 = vrcp.f32 %v1755_v16 }
 0x2e8   : > { %v1758_v18 = vpop.xlane.xlu1 %1757  ;;  %v2817_v19 = vpop.eup %2816 }
 0x2e9   : > { %2822 = vrcp.f32 %v1758_v18  ;;  %v1763_v20 = vmul.f32 %v2817_v19, %v2809_v5 }
 0x2eb   : > { %2759 = vmatmul.mubr.msk.f32.vlgmr.msra.gmra.mxu0 %vm1403_vm3, %v1763_v20 }
 0x2ec   : > { %v2819_v23 = vpop.eup %2818  ;;  %2767 = vmatpush3.msra.mxu0 %v1330_v21  ;;  %2768 = vmatprep.mubr.msk.f32.mxu0 %vm2835_vm1, %v2834_v2 }
 0x2ed   : > { %v1764_v24 = vmul.f32 %v2819_v23, %v2811_v7  ;;  %2776 = vmatprep.subr.mxu0 %v2834_v2  ;;  %v2517_v7 = vld [vmem:[%s3315_s11] ss:$0 sm:$0xff] }
 0x2ef   : > { %2764 = vmatmul.mubr.msk.f32.vlgmr.msra.gmra.mxu1 %vm1403_vm3, %v1764_v24 }
 0x2f0   : > { %2772 = vmatpush3.msra.mxu1 %v1400_v25  ;;  %2773 = vmatprep.mubr.msk.f32.mxu1 %vm2835_vm1, %v2834_v2 }
 0x2f1   : > { %2781 = vmatprep.subr.mxu1 %v2834_v2 }
 0x2f2   : > { %v2821_v26 = vpop.eup %2820 }
 0x2f3   : > { %v1765_v27 = vmul.f32 %v2821_v26, %v2813_v10 }
 0x2f5   : > { %2769 = vmatmul.mubr.msk.f32.vlgmr.msra.gmra.mxu0 %vm1403_vm3, %v1765_v27 }
 0x2f6   : > { %v2823_v28 = vpop.eup %2822  ;;  %2778 = vmatprep.mubr.msk.f32.mxu0 %vm2835_vm1, %v2834_v2  ;;  %2777 = vmatpush3.msra.mxu0 %v2059_v30 }
 0x2f7   : > { %v1766_v29 = vmul.f32 %v2823_v28, %v2815_v12  ;;  %2786 = vmatprep.subr.mxu0 %v2834_v2 }
 0x2f9   : > { %2774 = vmatmul.mubr.msk.f32.vlgmr.msra.gmra.mxu1 %vm1403_vm3, %v1766_v29 }
 0x2fa   : > { %2783 = vmatprep.mubr.msk.f32.mxu1 %vm2835_vm1, %v2834_v2  ;;  %2782 = vmatpush3.msra.mxu1 %v2060_v31 }
 0x2fb   : > { %2791 = vmatprep.subr.mxu1 %v2834_v2 }
 0x3ab   : > { %v1836_v33 = vpop.f32.mrf.mxu0 }
 0x3ac   : > { %2779 = vmatmul.mubr.msk.f32.vlgmr.msra.gmra.mxu0 %vm1403_vm3, %v1836_v33 }
 0x3ad   : > { %v2760_v34 = vpop.f32.mrf.mxu0  ;;  %2787 = vmatpush3.msra.mxu0 %v2061_v32  ;;  %2788 = vmatprep.mubr.msk.f32.mxu0 %vm2835_vm1, %v2834_v2 }
 0x3af   : > { %v1909_v36 = vpop.f32.mrf.mxu1 }
 0x3b0   : > { %2784 = vmatmul.mubr.msk.f32.vlgmr.msra.gmra.mxu1 %vm1403_vm3, %v1909_v36 }
 0x3b1   : > { %v2765_v37 = vpop.f32.mrf.mxu1  ;;  %2792 = vmatpush3.msra.mxu1 %v2062_v35  ;;  %2793 = vmatprep.mubr.msk.f32.mxu1 %vm2835_vm1, %v2834_v2 }
 0x3b5   : > { %v1982_v38 = vpop.f32.mrf.mxu0 }
 0x3b6   : > { %2789 = vmatmul.mubr.msk.f32.vlgmr.msra.gmra.mxu0 %vm1403_vm3, %v1982_v38 }
 0x3b7   : > { %v2770_v39 = vpop.f32.mrf.mxu0 }
 0x3b9   : > { %v2055_v40 = vpop.f32.mrf.mxu1 }
 0x3ba   : > { %2794 = vmatmul.mubr.msk.f32.vlgmr.msra.gmra.mxu1 %vm1403_vm3, %v2055_v40 }
 0x3bb   : > { %v2775_v41 = vpop.f32.mrf.mxu1 }
 0x46c   : > { %v2132_v42 = vpop.f32.mrf.mxu0 }
 0x46d   : > { %v2355_v48 = vsel %vm471_vm0, %v2132_v42, 0.0 }
 0x46e   : > { %v2780_v43 = vpop.f32.mrf.mxu0 }
 0x470   : > { %v2205_v44 = vpop.f32.mrf.mxu1 }
 0x471   : > { %v2356_v46 = vsel %vm471_vm0, %v2205_v44, 0.0 }
 0x472   : > { %v2785_v45 = vpop.f32.mrf.mxu1  ;;  %v2357_v2 = vadd.f32 %v2356_v46, %v2355_v48 }
 0x476   : > { %v2278_v47 = vpop.f32.mrf.mxu0 }
 0x477   : > { %v2358_v49 = vsel %vm471_vm0, %v2278_v47, 0.0 }
 0x478   : > { %v2790_v50 = vpop.f32.mrf.mxu0  ;;  %v2359_v51 = vadd.f32 %v2358_v49, %v2357_v2 }
 0x47a   : > { %v2351_v52 = vpop.f32.mrf.mxu1 }
 0x47b   : > { %v2360_v53 = vsel %vm471_vm0, %v2351_v52, 0.0 }
 0x47c   : > { %v2361_v55 = vadd.f32 %v2360_v53, %v2359_v51  ;;  %v2795_v56 = vpop.f32.mrf.mxu1 }
 0x47e   : > { %v2369_v57 = vadd.f32 %v2515_v54, %v2361_v55 }
 0x480   : > { %v2370_v58 = vadd.f32 %v2369_v57, %v2946_v9  ;;  %v2516_v9 = vld [vmem:[%s3314_s10] ss:$0 sm:$0xff] }
 0x482   : > { %v2373_v59 = vsel %vm471_vm0, %v2370_v58, 0.0 }
 0x483   : > { %2374 = vadd.xlane.f32.xlu1 %v2373_v59 }
 0x50c   : > { %v2375_v60 = vpop.xlane.xlu1 %2374 }
 0x50d   : > { %v2377_v61 = vmul.f32 0.03125, %v2375_v60 }
 0x50f   : > { %v2378_v62 = vsub.f32 %v2370_v58, %v2377_v61 }
 0x511   : > { %v2379_v63 = vmul.f32 %v2378_v62, %v2378_v62 }
 0x513   : > { %v2380_v0 = vsel %vm471_vm0, %v2379_v63, 0.0 }
 0x514   : > { %2381 = vadd.xlane.f32.xlu1 %v2380_v0 }
 0x59d   : > { %v2382_v1 = vpop.xlane.xlu1 %2381 }
 0x59e   : > { %v2383_v3 = vmul.f32 0.03125, %v2382_v1 }
 0x5a0   : > { %v2384_v4 = vadd.f32 1e-12, %v2383_v3 }
 0x5a2   : > { %2824 = vrsqrt.f32 %v2384_v4 }
 0x5af   : > { %v2825_v5 = vpop.eup %2824 }
 0x5b0   : > { %v2386_v6 = vmul.f32 %v2825_v5, %v2378_v62 }
 0x5b2   : > { %v2393_v8 = vmul.f32 %v2516_v9, %v2386_v6 }
 0x5b4   : > { %v2400_v10 = vadd.f32 %v2517_v7, %v2393_v8 }
 0x5b6   : > { %2401 = vst.msk [vmem:[%s425_s20] sm:$0xff] %vm471_vm0, %v2400_v10 }
 0x5b7 PF: > { %s22_s21 = sadd.s32 1, %s2832_s21  }
 0x5b8   : > { %p19_p4 = scmp.ge.s32.totalorder %s22_s21, 4  }
 0x5ba   :  { %21 = sbr.rel (!%p19_p4) target bundleno = 1 (0x1), region = 101 }

// kernel: _lambda_.16
= control target key start
LH: loop header
LB: loop body
LE: loop exit
PB: predicated region body
PF: predicated region fallthrough
CT: control target
= control target key end

     0   :  { %s2968_s25 = smov 0   ;;  %s3376_s0 = inlined_call_operand.vmem [shape: f32[2,8,32], index: 0, kind: input, shape index: {}]   ;;  %s3377_s1 = inlined_call_operand.vmem [shape: f32[2,8,32], index: 1, kind: input, shape index: {}]   ;;  %s3378_s2 = inlined_call_operand.vmem [shape: f32[2,8,1], index: 2, kind: input, shape index: {}]   ;;  %s3379_s3 = inlined_call_operand.vmem [shape: f32[4,32,8], index: 3, kind: input, shape index: {}]   ;;  %s3380_s4 = inlined_call_operand.vmem [shape: f32[4,1,8], index: 4, kind: input, shape index: {}]   ;;  %s3381_s5 = inlined_call_operand.vmem [shape: f32[4,32,8], index: 5, kind: input, shape index: {}]   ;;  %s3382_s6 = inlined_call_operand.vmem [shape: f32[4,1,8], index: 6, kind: input, shape index: {}]   ;;  %s3383_s7 = inlined_call_operand.vmem [shape: f32[4,32,8], index: 7, kind: input, shape index: {}]   ;;  %s3384_s8 = inlined_call_operand.vmem [shape: f32[4,1,8], index: 8, kind: input, shape index: {}]   ;;  %s3385_s9 = inlined_call_operand.vmem [shape: f32[4,8,32], index: 9, kind: input, shape index: {}]   ;;  %s3386_s10 = inlined_call_operand.vmem [shape: f32[1,32], index: 10, kind: input, shape index: {}]   ;;  %s3387_s11 = inlined_call_operand.vmem [shape: f32[1,32], index: 11, kind: input, shape index: {}]   ;;  %s3388_s12 = inlined_call_operand.vmem [shape: f32[1,32], index: 12, kind: input, shape index: {}]   ;;  %s3389_s13 = inlined_call_operand.vmem [shape: f32[2,8,32], index: 13, kind: output, shape index: {}]  }
   0x1 LB: > { %s2527_s26 = sadd.s32 4294967295, %s2893_s25   ;;  %p2531_p0 = scmp.ge.s32.totalorder %s2893_s25, 1  ;;  %s2893_s25 = sphi %s2968_s25, %s23_s25  }
   0x2   : > { %p404_p1 = scmp.lt.s32.totalorder %s2893_s25, 3 }
   0x4   : > { %p405_p2 = pnand %p2531_p0, %p404_p1 }
   0x5   : > { %p454_p3 = scmp.lt.s32.totalorder (!%p405_p2), %s2527_s26, 1 }
   0x6   : > { %408 = sbr.rel (%p405_p2) target bundleno = 1463 (0x5b7), region = 72 }
   0xb   : > { %v475_v0 = vld [vmem:[%s3379_s3 + $0x18] sm:$0xff]  ;;  %v2895_v2 = vmov 0.0   ;;  %v474_v3 = vld [vmem:[%s3379_s3 + $0x10] sm:$0xff]  ;;  %s3391_s26 = smov (!%p454_p3, %s2527_s26), 1  ;;  %v473_v5 = vld [vmem:[%s3379_s3 + $0x8] sm:$0xff]  ;;  %vm516_vm0 = vcmask 261120  }
   0xc   : > { %v479_v1 = vld [vmem:[%s3379_s3 + $0x38] sm:$0xff]  ;;  %2665 = vmatprep.subr.mxu0 %v2895_v2  ;;  %2676 = vmatprep.subr.mxu1 %v2895_v2  ;;  %v478_v4 = vld [vmem:[%s3379_s3 + $0x30] sm:$0xff]  ;;  %v477_v6 = vld [vmem:[%s3379_s3 + $0x28] sm:$0xff]  ;;  %s2998_s22 = sshll.u32 %s3391_s26, 3  ;;  %vm2896_vm1 = vmmov 0   ;;  %v2897_v51 = vmov 0  }
   0xd   : > { %2666 = vmatpush3.msra.mxu0 %v475_v0  ;;  %2677 = vmatpush3.msra.mxu1 %v479_v1  ;;  %v472_v7 = vld [vmem:[%s3379_s3] sm:$0xff]  ;;  %s457_s29 = scalar_lea.vmem %s3376_s0, %s2998_s22  ;;  %v483_v10 = vld [vmem:[%s3379_s3 + $0x58] sm:$0xff]  ;;  %v482_v12 = vld [vmem:[%s3379_s3 + $0x50] sm:$0xff]  ;;  %s461_s26 = scalar_lea.vmem %s3377_s1, %s2998_s22  ;;  %vm1451_vm3 = vcmask 64512  }
   0xe   : > { %2667 = vmatprep.subr.mxu0 %v2895_v2  ;;  %2678 = vmatprep.subr.mxu1 %v2895_v2  ;;  %v476_v8 = vld [vmem:[%s3379_s3 + $0x20] sm:$0xff]  ;;  %v487_v11 = vld [vmem:[%s3379_s3 + $0x78] sm:$0xff]  ;;  %v486_v13 = vld [vmem:[%s3379_s3 + $0x70] sm:$0xff]  ;;  %s465_s27 = scalar_lea.vmem %s3378_s2, %s2998_s22  ;;  %s469_s20 = scalar_lea.vmem %s3389_s13, %s2998_s22 }
   0xf   : > { %2668 = vmatpush3.msra.mxu0 %v474_v3  ;;  %2679 = vmatpush3.msra.mxu1 %v478_v4  ;;  %v3012_v9 = vld [vmem:[%s457_s29] sm:$0xff]  ;;  %v481_v14 = vld [vmem:[%s3379_s3 + $0x48] sm:$0xff]  ;;  %v803_v18 = vld [vmem:[%s3381_s5 + $0x18] sm:$0xff] }
  0x10   : > { %2669 = vmatprep.subr.mxu0 %v2895_v2  ;;  %2680 = vmatprep.subr.mxu1 %v2895_v2  ;;  %v485_v15 = vld [vmem:[%s3379_s3 + $0x68] sm:$0xff]  ;;  %v480_v16 = vld [vmem:[%s3379_s3 + $0x40] sm:$0xff]  ;;  %v807_v19 = vld [vmem:[%s3381_s5 + $0x38] sm:$0xff] }
  0x11   : > { %2670 = vmatpush3.msra.mxu0 %v473_v5  ;;  %2681 = vmatpush3.msra.mxu1 %v477_v6  ;;  %v484_v17 = vld [vmem:[%s3379_s3 + $0x60] sm:$0xff]  ;;  %v802_v20 = vld [vmem:[%s3381_s5 + $0x10] sm:$0xff]  ;;  %v801_v22 = vld [vmem:[%s3381_s5 + $0x8] sm:$0xff] }
  0x12   : > { %2671 = vmatprep.subr.mxu0 %v2895_v2  ;;  %2682 = vmatprep.subr.mxu1 %v2895_v2  ;;  %v806_v21 = vld [vmem:[%s3381_s5 + $0x30] sm:$0xff]  ;;  %v805_v23 = vld [vmem:[%s3381_s5 + $0x28] sm:$0xff]  ;;  %v800_v24 = vld [vmem:[%s3381_s5] sm:$0xff] }
  0x13   : > { %2672 = vmatpush3.msra.mxu0 %v472_v7  ;;  %2673 = vmatprep.mubr.msk.f32.mxu0 %vm2896_vm1, %v2895_v2  ;;  %v804_v25 = vld [vmem:[%s3381_s5 + $0x20] sm:$0xff]  ;;  %v811_v27 = vld [vmem:[%s3381_s5 + $0x58] sm:$0xff]  ;;  %v810_v29 = vld [vmem:[%s3381_s5 + $0x50] sm:$0xff] }
  0x14   : > { %2683 = vmatpush3.msra.mxu1 %v476_v8  ;;  %2674 = vmatmul.mubr.msk.f32.vlgmr.msra.gmra.mxu0 %vm516_vm0, %v3012_v9  ;;  %v3098_v26 = vld [vmem:[%s461_s26] sm:$0xff]  ;;  %v815_v28 = vld [vmem:[%s3381_s5 + $0x78] sm:$0xff]  ;;  %v814_v30 = vld [vmem:[%s3381_s5 + $0x70] sm:$0xff] }
  0x15   : > { %2684 = vmatprep.mubr.msk.f32.mxu1 %vm2896_vm1, %v2895_v2  ;;  %2687 = vmatprep.subr.mxu0 %v2895_v2  ;;  %v809_v31 = vld [vmem:[%s3381_s5 + $0x48] sm:$0xff]  ;;  %v808_v33 = vld [vmem:[%s3381_s5 + $0x40] sm:$0xff]  ;;  %v1130_v35 = vld [vmem:[%s3383_s7 + $0x18] sm:$0xff] }
  0x16   : > { %2698 = vmatprep.subr.mxu1 %v2895_v2  ;;  %2685 = vmatmul.mubr.msk.f32.vlgmr.msra.gmra.mxu1 %vm516_vm0, %v3012_v9  ;;  %v813_v32 = vld [vmem:[%s3381_s5 + $0x68] sm:$0xff]  ;;  %v812_v34 = vld [vmem:[%s3381_s5 + $0x60] sm:$0xff]  ;;  %v1134_v36 = vld [vmem:[%s3383_s7 + $0x38] sm:$0xff] }
  0x17   : > { %2688 = vmatpush3.msra.mxu0 %v483_v10  ;;  %2699 = vmatpush3.msra.mxu1 %v487_v11  ;;  %v1129_v37 = vld [vmem:[%s3383_s7 + $0x10] sm:$0xff]  ;;  %v1128_v39 = vld [vmem:[%s3383_s7 + $0x8] sm:$0xff]  ;;  %v1127_v41 = vld [vmem:[%s3383_s7] sm:$0xff] }
  0x18   : > { %2689 = vmatprep.subr.mxu0 %v2895_v2  ;;  %2700 = vmatprep.subr.mxu1 %v2895_v2  ;;  %v1133_v38 = vld [vmem:[%s3383_s7 + $0x30] sm:$0xff]  ;;  %v1132_v40 = vld [vmem:[%s3383_s7 + $0x28] sm:$0xff]  ;;  %v1131_v42 = vld [vmem:[%s3383_s7 + $0x20] sm:$0xff] }
  0x19   : > { %2690 = vmatpush3.msra.mxu0 %v482_v12  ;;  %2701 = vmatpush3.msra.mxu1 %v486_v13  ;;  %v1138_v43 = vld [vmem:[%s3383_s7 + $0x58] sm:$0xff]  ;;  %v1137_v45 = vld [vmem:[%s3383_s7 + $0x50] sm:$0xff]  ;;  %v1136_v47 = vld [vmem:[%s3383_s7 + $0x48] sm:$0xff] }
  0x1a   : > { %2691 = vmatprep.subr.mxu0 %v2895_v2  ;;  %2702 = vmatprep.subr.mxu1 %v2895_v2  ;;  %v1142_v44 = vld [vmem:[%s3383_s7 + $0x78] sm:$0xff]  ;;  %v1141_v46 = vld [vmem:[%s3383_s7 + $0x70] sm:$0xff]  ;;  %v1140_v48 = vld [vmem:[%s3383_s7 + $0x68] sm:$0xff] }
  0x1b   : > { %2692 = vmatpush3.msra.mxu0 %v481_v14  ;;  %2703 = vmatpush3.msra.mxu1 %v485_v15  ;;  %v1135_v49 = vld [vmem:[%s3383_s7 + $0x40] sm:$0xff] }
  0x1c   : > { %2693 = vmatprep.subr.mxu0 %v2895_v2  ;;  %2704 = vmatprep.subr.mxu1 %v2895_v2  ;;  %v1139_v50 = vld [vmem:[%s3383_s7 + $0x60] sm:$0xff] }
  0x1d   : > { %2694 = vmatpush3.msra.mxu0 %v480_v16  ;;  %2695 = vmatprep.mubr.msk.f32.mxu0 %vm2896_vm1, %v2895_v2  ;;  %v1760_v52 = vld [vmem:[%s465_s27] sm:$0xff] }
  0x1e   : > { %2705 = vmatpush3.msra.mxu1 %v484_v17  ;;  %2696 = vmatmul.mubr.msk.f32.vlgmr.msra.gmra.mxu0 %vm516_vm0, %v3012_v9  ;;  %vm1761_vm2 = vcmp.gt.f32.partialorder %v1760_v52, 0.0  ;;  %v2544_v62 = vld [vmem:[%s3382_s6] ss:$0 sm:$0xff]  ;;  %v2545_v63 = vld [vmem:[%s3382_s6 + $0x1] ss:$0 sm:$0xff] }
  0x1f   : > { %2706 = vmatprep.mubr.msk.f32.mxu1 %vm2896_vm1, %v2895_v2  ;;  %2709 = vmatprep.subr.mxu0 %v2895_v2  ;;  %v1762_v53 = vsel %vm1761_vm2, 1, %v2897_v51  ;;  %v2536_v3 = vld [vmem:[%s3380_s4] ss:$0 sm:$0xff]  ;;  %v2537_v4 = vld [vmem:[%s3380_s4 + $0x1] ss:$0 sm:$0xff] }
  0x20   : > { %2720 = vmatprep.subr.mxu1 %v2895_v2  ;;  %2707 = vmatmul.mubr.msk.f32.vlgmr.msra.gmra.mxu1 %vm516_vm0, %v3012_v9  ;;  %v2546_v12 = vld [vmem:[%s3382_s6 + $0x2] ss:$0 sm:$0xff]  ;;  %v2547_v13 = vld [vmem:[%s3382_s6 + $0x3] ss:$0 sm:$0xff] }
  0x21   : > { %2710 = vmatpush3.msra.mxu0 %v803_v18  ;;  %2721 = vmatpush3.msra.mxu1 %v807_v19  ;;  %v2538_v16 = vld [vmem:[%s3380_s4 + $0x2] ss:$0 sm:$0xff]  ;;  %v2539_v17 = vld [vmem:[%s3380_s4 + $0x3] ss:$0 sm:$0xff] }
  0x22   : > { %2711 = vmatprep.subr.mxu0 %v2895_v2  ;;  %2722 = vmatprep.subr.mxu1 %v2895_v2 }
  0x23   : > { %2712 = vmatpush3.msra.mxu0 %v802_v20  ;;  %2723 = vmatpush3.msra.mxu1 %v806_v21 }
  0x24   : > { %2713 = vmatprep.subr.mxu0 %v2895_v2  ;;  %2724 = vmatprep.subr.mxu1 %v2895_v2 }
  0x25   : > { %2714 = vmatpush3.msra.mxu0 %v801_v22  ;;  %2725 = vmatpush3.msra.mxu1 %v805_v23 }
  0x26   : > { %2715 = vmatprep.subr.mxu0 %v2895_v2  ;;  %2726 = vmatprep.subr.mxu1 %v2895_v2 }
  0x27   : > { %2716 = vmatpush3.msra.mxu0 %v800_v24  ;;  %2717 = vmatprep.mubr.msk.f32.mxu0 %vm2896_vm1, %v2895_v2  ;;  %v2552_v24 = vld [vmem:[%s3384_s8] ss:$0 sm:$0xff] }
  0x28   : > { %2727 = vmatpush3.msra.mxu1 %v804_v25  ;;  %2728 = vmatprep.mubr.msk.f32.mxu1 %vm2896_vm1, %v2895_v2 }
  0x29   : > { %2718 = vmatmul.mubr.msk.f32.vlgmr.msra.gmra.mxu0 %vm516_vm0, %v3098_v26  ;;  %2729 = vmatmul.mubr.msk.f32.vlgmr.msra.gmra.mxu1 %vm516_vm0, %v3098_v26 }
  0x2a   : > { %2731 = vmatprep.subr.mxu0 %v2895_v2  ;;  %2742 = vmatprep.subr.mxu1 %v2895_v2 }
  0x2b   : > { %2732 = vmatpush3.msra.mxu0 %v811_v27  ;;  %2743 = vmatpush3.msra.mxu1 %v815_v28 }
  0x2c   : > { %2733 = vmatprep.subr.mxu0 %v2895_v2  ;;  %2744 = vmatprep.subr.mxu1 %v2895_v2 }
  0x2d   : > { %2734 = vmatpush3.msra.mxu0 %v810_v29  ;;  %2745 = vmatpush3.msra.mxu1 %v814_v30 }
  0x2e   : > { %2735 = vmatprep.subr.mxu0 %v2895_v2  ;;  %2746 = vmatprep.subr.mxu1 %v2895_v2 }
  0x2f   : > { %2736 = vmatpush3.msra.mxu0 %v809_v31  ;;  %2747 = vmatpush3.msra.mxu1 %v813_v32 }
  0x30   : > { %2737 = vmatprep.subr.mxu0 %v2895_v2  ;;  %2748 = vmatprep.subr.mxu1 %v2895_v2 }
  0x31   : > { %2738 = vmatpush3.msra.mxu0 %v808_v33  ;;  %2739 = vmatprep.mubr.msk.f32.mxu0 %vm2896_vm1, %v2895_v2 }
  0x32   : > { %2749 = vmatpush3.msra.mxu1 %v812_v34  ;;  %2750 = vmatprep.mubr.msk.f32.mxu1 %vm2896_vm1, %v2895_v2 }
  0x33   : > { %2740 = vmatmul.mubr.msk.f32.vlgmr.msra.gmra.mxu0 %vm516_vm0, %v3098_v26  ;;  %2751 = vmatmul.mubr.msk.f32.vlgmr.msra.gmra.mxu1 %vm516_vm0, %v3098_v26 }
  0x34   : > { %2753 = vmatprep.subr.mxu0 %v2895_v2  ;;  %2764 = vmatprep.subr.mxu1 %v2895_v2 }
  0x35   : > { %2761 = vmatprep.mubr.msk.f32.mxu0 %vm2896_vm1, %v2895_v2  ;;  %2772 = vmatprep.mubr.msk.f32.mxu1 %vm2896_vm1, %v2895_v2 }
  0x36   : > { %2754 = vmatpush3.msra.mxu0 %v1130_v35  ;;  %2765 = vmatpush3.msra.mxu1 %v1134_v36 }
  0x37   : > { %2755 = vmatprep.subr.mxu0 %v2895_v2  ;;  %2766 = vmatprep.subr.mxu1 %v2895_v2 }
  0x38   : > { %2756 = vmatpush3.msra.mxu0 %v1129_v37  ;;  %2767 = vmatpush3.msra.mxu1 %v1133_v38 }
  0x39   : > { %2757 = vmatprep.subr.mxu0 %v2895_v2  ;;  %2768 = vmatprep.subr.mxu1 %v2895_v2 }
  0x3a   : > { %2758 = vmatpush3.msra.mxu0 %v1128_v39  ;;  %2769 = vmatpush3.msra.mxu1 %v1132_v40 }
  0x3b   : > { %2759 = vmatprep.subr.mxu0 %v2895_v2  ;;  %2770 = vmatprep.subr.mxu1 %v2895_v2 }
  0x3c   : > { %2760 = vmatpush3.msra.mxu0 %v1127_v41  ;;  %2771 = vmatpush3.msra.mxu1 %v1131_v42 }
  0x3d   : > { %2762 = vmatmul.mubr.msk.f32.vlgmr.msra.gmra.mxu0 %vm516_vm0, %v3098_v26  ;;  %2775 = vmatprep.subr.mxu0 %v2895_v2 }
  0x3e   : > { %2776 = vmatpush3.msra.mxu0 %v1138_v43  ;;  %2786 = vmatprep.subr.mxu1 %v2895_v2 }
  0x3f   : > { %2773 = vmatmul.mubr.msk.f32.vlgmr.msra.gmra.mxu1 %vm516_vm0, %v3098_v26  ;;  %2777 = vmatprep.subr.mxu0 %v2895_v2 }
  0x40   : > { %2787 = vmatpush3.msra.mxu1 %v1142_v44  ;;  %2778 = vmatpush3.msra.mxu0 %v1137_v45 }
  0x41   : > { %2788 = vmatprep.subr.mxu1 %v2895_v2  ;;  %2779 = vmatprep.subr.mxu0 %v2895_v2 }
  0x42   : > { %2789 = vmatpush3.msra.mxu1 %v1141_v46  ;;  %2780 = vmatpush3.msra.mxu0 %v1136_v47 }
  0x43   : > { %2790 = vmatprep.subr.mxu1 %v2895_v2  ;;  %2781 = vmatprep.subr.mxu0 %v2895_v2 }
  0x44   : > { %2791 = vmatpush3.msra.mxu1 %v1140_v48  ;;  %2783 = vmatprep.mubr.msk.f32.mxu0 %vm2896_vm1, %v2895_v2 }
  0x45   : > { %2792 = vmatprep.subr.mxu1 %v2895_v2  ;;  %2794 = vmatprep.mubr.msk.f32.mxu1 %vm2896_vm1, %v2895_v2 }
  0x46   : > { %2782 = vmatpush3.msra.mxu0 %v1135_v49  ;;  %2793 = vmatpush3.msra.mxu1 %v1139_v50 }
  0x47   : > { %2784 = vmatmul.mubr.msk.f32.vlgmr.msra.gmra.mxu0 %vm516_vm0, %v3098_v26  ;;  %2795 = vmatmul.mubr.msk.f32.vlgmr.msra.gmra.mxu1 %vm516_vm0, %v3098_v26  ;;  %v2553_v26 = vld [vmem:[%s3384_s8 + $0x1] ss:$0 sm:$0xff] }
  0x48   : > { %2797 = vmatprep.subr.mxu0 %v2895_v2  ;;  %2802 = vmatprep.subr.mxu1 %v2895_v2 }
  0x49   : > { %2799 = vmatprep.mubr.msk.f32.mxu0 %vm2896_vm1, %v2895_v2  ;;  %2804 = vmatprep.mubr.msk.f32.mxu1 %vm2896_vm1, %v2895_v2 }
  0x4a   : > { %2868 = vset.pattern.permute.xlu0 %v2897_v51 }
  0x4b   : > { %1764 = vperm.xlu0 %2868, %v1762_v53  }
  0xc6   : > { %v1765_v36 = vpop.permute.xlu0 %1764 }
  0xc7   : > { %vm1766_vm4 = vcmp.eq.s32.totalorder %v1765_v36, 1  ;;  %v2110_v36 = vld [vmem:[%s3385_s9 + $0x18] sm:$0xff] }
  0xd4   : > { %v586_v54 = vpop.f32.mrf.mxu0 }
  0xd5   : > { %v587_v10 = vadd.f32 %v2536_v3, %v586_v54 }
  0xd6   : > { %v2675_v55 = vpop.f32.mrf.mxu0  ;;  %v656_v56 = vpop.f32.mrf.mxu1 }
  0xd7   : > { %v657_v11 = vadd.f32 %v2537_v4, %v656_v56 }
  0xd8   : > { %v2686_v57 = vpop.f32.mrf.mxu1 }
  0xde   : > { %v726_v58 = vpop.f32.mrf.mxu0 }
  0xdf   : > { %v727_v22 = vadd.f32 %v2538_v16, %v726_v58 }
  0xe0   : > { %v2697_v59 = vpop.f32.mrf.mxu0  ;;  %v796_v60 = vpop.f32.mrf.mxu1 }
  0xe1   : > { %v797_v23 = vadd.f32 %v2539_v17, %v796_v60 }
  0xe2   : > { %v2708_v61 = vpop.f32.mrf.mxu1 }
  0xe9   : > { %v913_v0 = vpop.f32.mrf.mxu0  ;;  %v983_v1 = vpop.f32.mrf.mxu1 }
  0xea   : > { %v914_v5 = vadd.f32 %v2544_v62, %v913_v0  ;;  %v984_v6 = vadd.f32 %v2545_v63, %v983_v1 }
  0xeb   : > { %v2719_v7 = vpop.f32.mrf.mxu0  ;;  %v2730_v8 = vpop.f32.mrf.mxu1 }
  0xec   : > { %2798 = vmatpush3.xpose.msk.msra.mxu0 %vm1451_vm3, %v914_v5  ;;  %2803 = vmatpush3.xpose.msk.msra.mxu1 %vm1451_vm3, %v984_v6 }
  0xed   : > { %2807 = vmatprep.subr.mxu0 %v2895_v2  ;;  %2812 = vmatprep.subr.mxu1 %v2895_v2 }
  0xef   : > { %2800 = vmatmul.mubr.msk.f32.vlgmr.msra.gmra.mxu0 %vm1451_vm3, %v587_v10  ;;  %2805 = vmatmul.mubr.msk.f32.vlgmr.msra.gmra.mxu1 %vm1451_vm3, %v657_v11 }
  0xf0   : > { %2809 = vmatprep.mubr.msk.f32.mxu0 %vm2896_vm1, %v2895_v2  ;;  %2814 = vmatprep.mubr.msk.f32.mxu1 %vm2896_vm1, %v2895_v2 }
  0xf3   : > { %v1053_v14 = vpop.f32.mrf.mxu0  ;;  %v1123_v15 = vpop.f32.mrf.mxu1 }
  0xf4   : > { %v1054_v18 = vadd.f32 %v2546_v12, %v1053_v14  ;;  %v1124_v19 = vadd.f32 %v2547_v13, %v1123_v15 }
  0xf5   : > { %v2741_v20 = vpop.f32.mrf.mxu0  ;;  %v2752_v21 = vpop.f32.mrf.mxu1 }
  0xf6   : > { %2808 = vmatpush3.xpose.msk.msra.mxu0 %vm1451_vm3, %v1054_v18  ;;  %2813 = vmatpush3.xpose.msk.msra.mxu1 %vm1451_vm3, %v1124_v19  ;;  %v2554_v18 = vld [vmem:[%s3384_s8 + $0x2] ss:$0 sm:$0xff] }
  0xf7   : > { %2817 = vmatprep.subr.mxu0 %v2895_v2  ;;  %2822 = vmatprep.subr.mxu1 %v2895_v2 }
  0xf9   : > { %2810 = vmatmul.mubr.msk.f32.vlgmr.msra.gmra.mxu0 %vm1451_vm3, %v727_v22  ;;  %2815 = vmatmul.mubr.msk.f32.vlgmr.msra.gmra.mxu1 %vm1451_vm3, %v797_v23  ;;  %v2555_v23 = vld [vmem:[%s3384_s8 + $0x3] ss:$0 sm:$0xff] }
  0xfa   : > { %2819 = vmatprep.mubr.msk.f32.mxu0 %vm2896_vm1, %v2895_v2  ;;  %2824 = vmatprep.mubr.msk.f32.mxu1 %vm2896_vm1, %v2895_v2 }
  0xfd   : > { %v1237_v25 = vpop.f32.mrf.mxu0 }
  0xfe   : > { %v1238_v27 = vadd.f32 %v2552_v24, %v1237_v25 }
  0xff   : > { %v2763_v28 = vpop.f32.mrf.mxu0  ;;  %v1307_v29 = vpop.f32.mrf.mxu1 }
 0x100   : > { %v1308_v30 = vadd.f32 %v2553_v26, %v1307_v29  ;;  %2818 = vmatpush3.msra.mxu0 %v1238_v27 }
 0x101   : > { %v2774_v31 = vpop.f32.mrf.mxu1  ;;  %2827 = vmatprep.subr.mxu0 %v2895_v2 }
 0x102   : > { %2823 = vmatpush3.msra.mxu1 %v1308_v30  ;;  %v2107_v31 = vld [vmem:[%s3385_s9] sm:$0xff] }
 0x103   : > { %2832 = vmatprep.subr.mxu1 %v2895_v2 }
 0x107   : > { %v3292_v32 = vpop.f32.mrf.mxu0  ;;  %v3294_v33 = vpop.f32.mrf.mxu1 }
 0x108   : > { %v1378_v22 = vadd.f32 %v2554_v18, %v3292_v32  ;;  %v1448_v26 = vadd.f32 %v2555_v23, %v3294_v33  ;;  %v2108_v32 = vld [vmem:[%s3385_s9 + $0x8] sm:$0xff]  ;;  %v2109_v33 = vld [vmem:[%s3385_s9 + $0x10] sm:$0xff] }
 0x109   : > { %v2785_v34 = vpop.f32.mrf.mxu0  ;;  %v2796_v35 = vpop.f32.mrf.mxu1 }
 0x1af   : > { %v1524_v37 = vpop.f32.mrf.mxu0  ;;  %v1600_v38 = vpop.f32.mrf.mxu1 }
 0x1b0   : > { %v1756_v39 = vmul.f32 0.35355338, %v1524_v37  ;;  %v1757_v40 = vmul.f32 0.35355338, %v1600_v38 }
 0x1b1   : > { %v2801_v41 = vpop.f32.mrf.mxu0  ;;  %v2806_v42 = vpop.f32.mrf.mxu1 }
 0x1b2   : > { %v1768_v43 = vsel %vm1766_vm4, %v1757_v40, -10000.0  ;;  %v1767_v44 = vsel %vm1766_vm4, %v1756_v39, -10000.0 }
 0x1b3   : > { %v1774_v45 = vsel %vm1451_vm3, %v1768_v43, -inf  ;;  %v1771_v46 = vsel %vm1451_vm3, %v1767_v44, -inf }
 0x1b4   : > { %1775 = vmax.xlane.f32.xlu1 %v1774_v45  ;;  %1772 = vmax.xlane.f32.xlu0 %v1771_v46 }
 0x1b9   : > { %v1676_v47 = vpop.f32.mrf.mxu0  ;;  %v1752_v48 = vpop.f32.mrf.mxu1 }
 0x1ba   : > { %v1758_v49 = vmul.f32 0.35355338, %v1676_v47  ;;  %v1759_v50 = vmul.f32 0.35355338, %v1752_v48 }
 0x1bb   : > { %v2811_v51 = vpop.f32.mrf.mxu0  ;;  %v2816_v52 = vpop.f32.mrf.mxu1 }
 0x1bc   : > { %v1769_v53 = vsel %vm1766_vm4, %v1758_v49, -10000.0  ;;  %v1770_v55 = vsel %vm1766_vm4, %v1759_v50, -10000.0 }
 0x1bd   : > { %v1777_v54 = vsel %vm1451_vm3, %v1769_v53, -inf  ;;  %v1780_v56 = vsel %vm1451_vm3, %v1770_v55, -inf }
 0x1be   : > { %1778 = vmax.xlane.f32.xlu1 %v1777_v54 }
 0x1c2   : > { %1781 = vmax.xlane.f32.xlu1 %v1780_v56 }
 0x23d   : > { %v1776_v57 = vpop.xlane.xlu1 %1775  ;;  %v1773_v58 = vpop.xlane.xlu0 %1772 }
 0x23e   : > { %v1784_v59 = vsub.f32 %v1768_v43, %v1776_v57  ;;  %v1783_v60 = vsub.f32 %v1767_v44, %v1773_v58 }
 0x240   : > { %v1787_v61 = vmul.f32 1.442695, %v1783_v60  ;;  %v1789_v62 = vmul.f32 1.442695, %v1784_v59 }
 0x242   : > { %2869 = vpow2.f32 %v1787_v61 }
 0x243   : > { %2871 = vpow2.f32 %v1789_v62 }
 0x247   : > { %v1779_v63 = vpop.xlane.xlu1 %1778 }
 0x248   : > { %v1785_v0 = vsub.f32 %v1769_v53, %v1779_v63 }
 0x24a   : > { %v1791_v1 = vmul.f32 1.442695, %v1785_v0 }
 0x24b   : > { %v1782_v3 = vpop.xlane.xlu1 %1781 }
 0x24c   : > { %2873 = vpow2.f32 %v1791_v1  ;;  %v1786_v4 = vsub.f32 %v1770_v55, %v1782_v3  ;;  %v2576_v55 = vld [vmem:[%s3386_s10] ss:$0 sm:$0xff] }
 0x24e   : > { %v1793_v5 = vmul.f32 1.442695, %v1786_v4 }
 0x24f   : > { %v2870_v6 = vpop.eup %2869 }
 0x250   : > { %2875 = vpow2.f32 %v1793_v5  ;;  %v1795_v7 = vsel %vm1451_vm3, %v2870_v6, 0.0  ;;  %v2872_v8 = vpop.eup %2871 }
 0x251   : > { %1796 = vadd.xlane.f32.xlu1 %v1795_v7  ;;  %v1798_v10 = vsel %vm1451_vm3, %v2872_v8, 0.0 }
 0x255   : > { %1799 = vadd.xlane.f32.xlu1 %v1798_v10 }
 0x259   : > { %v2874_v11 = vpop.eup %2873 }
 0x25a   : > { %v1801_v12 = vsel %vm1451_vm3, %v2874_v11, 0.0 }
 0x25b   : > { %1802 = vadd.xlane.f32.xlu1 %v1801_v12 }
 0x25d   : > { %v2876_v13 = vpop.eup %2875 }
 0x25e   : > { %v1804_v14 = vsel %vm1451_vm3, %v2876_v13, 0.0 }
 0x25f   : > { %1805 = vadd.xlane.f32.xlu1 %v1804_v14 }
 0x2da   : > { %v1797_v15 = vpop.xlane.xlu1 %1796 }
 0x2db   : > { %2877 = vrcp.f32 %v1797_v15 }
 0x2de   : > { %v1800_v16 = vpop.xlane.xlu1 %1799 }
 0x2df   : > { %2879 = vrcp.f32 %v1800_v16 }
 0x2e4   : > { %v1803_v17 = vpop.xlane.xlu1 %1802 }
 0x2e5   : > { %2881 = vrcp.f32 %v1803_v17 }
 0x2e8   : > { %v1806_v19 = vpop.xlane.xlu1 %1805  ;;  %v2878_v20 = vpop.eup %2877 }
 0x2e9   : > { %2883 = vrcp.f32 %v1806_v19  ;;  %v1811_v21 = vmul.f32 %v2878_v20, %v2870_v6 }
 0x2eb   : > { %2820 = vmatmul.mubr.msk.f32.vlgmr.msra.gmra.mxu0 %vm1451_vm3, %v1811_v21 }
 0x2ec   : > { %v2880_v24 = vpop.eup %2879  ;;  %2828 = vmatpush3.msra.mxu0 %v1378_v22  ;;  %2829 = vmatprep.mubr.msk.f32.mxu0 %vm2896_vm1, %v2895_v2 }
 0x2ed   : > { %v1812_v25 = vmul.f32 %v2880_v24, %v2872_v8  ;;  %2837 = vmatprep.subr.mxu0 %v2895_v2  ;;  %v2578_v8 = vld [vmem:[%s3388_s12] ss:$0 sm:$0xff] }
 0x2ef   : > { %2825 = vmatmul.mubr.msk.f32.vlgmr.msra.gmra.mxu1 %vm1451_vm3, %v1812_v25 }
 0x2f0   : > { %2833 = vmatpush3.msra.mxu1 %v1448_v26  ;;  %2834 = vmatprep.mubr.msk.f32.mxu1 %vm2896_vm1, %v2895_v2 }
 0x2f1   : > { %2842 = vmatprep.subr.mxu1 %v2895_v2 }
 0x2f2   : > { %v2882_v27 = vpop.eup %2881 }
 0x2f3   : > { %v1813_v28 = vmul.f32 %v2882_v27, %v2874_v11 }
 0x2f5   : > { %2830 = vmatmul.mubr.msk.f32.vlgmr.msra.gmra.mxu0 %vm1451_vm3, %v1813_v28 }
 0x2f6   : > { %v2884_v29 = vpop.eup %2883  ;;  %2839 = vmatprep.mubr.msk.f32.mxu0 %vm2896_vm1, %v2895_v2  ;;  %2838 = vmatpush3.msra.mxu0 %v2107_v31 }
 0x2f7   : > { %v1814_v30 = vmul.f32 %v2884_v29, %v2876_v13  ;;  %2847 = vmatprep.subr.mxu0 %v2895_v2 }
 0x2f9   : > { %2835 = vmatmul.mubr.msk.f32.vlgmr.msra.gmra.mxu1 %vm1451_vm3, %v1814_v30 }
 0x2fa   : > { %2844 = vmatprep.mubr.msk.f32.mxu1 %vm2896_vm1, %v2895_v2  ;;  %2843 = vmatpush3.msra.mxu1 %v2108_v32 }
 0x2fb   : > { %2852 = vmatprep.subr.mxu1 %v2895_v2 }
 0x3ab   : > { %v1884_v34 = vpop.f32.mrf.mxu0 }
 0x3ac   : > { %2840 = vmatmul.mubr.msk.f32.vlgmr.msra.gmra.mxu0 %vm1451_vm3, %v1884_v34 }
 0x3ad   : > { %v2821_v35 = vpop.f32.mrf.mxu0  ;;  %2848 = vmatpush3.msra.mxu0 %v2109_v33  ;;  %2849 = vmatprep.mubr.msk.f32.mxu0 %vm2896_vm1, %v2895_v2 }
 0x3af   : > { %v1957_v37 = vpop.f32.mrf.mxu1 }
 0x3b0   : > { %2845 = vmatmul.mubr.msk.f32.vlgmr.msra.gmra.mxu1 %vm1451_vm3, %v1957_v37 }
 0x3b1   : > { %v2826_v38 = vpop.f32.mrf.mxu1  ;;  %2853 = vmatpush3.msra.mxu1 %v2110_v36  ;;  %2854 = vmatprep.mubr.msk.f32.mxu1 %vm2896_vm1, %v2895_v2 }
 0x3b5   : > { %v2030_v39 = vpop.f32.mrf.mxu0 }
 0x3b6   : > { %2850 = vmatmul.mubr.msk.f32.vlgmr.msra.gmra.mxu0 %vm1451_vm3, %v2030_v39 }
 0x3b7   : > { %v2831_v40 = vpop.f32.mrf.mxu0 }
 0x3b9   : > { %v2103_v41 = vpop.f32.mrf.mxu1 }
 0x3ba   : > { %2855 = vmatmul.mubr.msk.f32.vlgmr.msra.gmra.mxu1 %vm1451_vm3, %v2103_v41 }
 0x3bb   : > { %v2836_v42 = vpop.f32.mrf.mxu1 }
 0x46c   : > { %v2180_v43 = vpop.f32.mrf.mxu0 }
 0x46d   : > { %v2403_v49 = vsel %vm516_vm0, %v2180_v43, 0.0 }
 0x46e   : > { %v2841_v44 = vpop.f32.mrf.mxu0 }
 0x470   : > { %v2253_v45 = vpop.f32.mrf.mxu1 }
 0x471   : > { %v2404_v47 = vsel %vm516_vm0, %v2253_v45, 0.0 }
 0x472   : > { %v2846_v46 = vpop.f32.mrf.mxu1  ;;  %v2405_v2 = vadd.f32 %v2404_v47, %v2403_v49 }
 0x476   : > { %v2326_v48 = vpop.f32.mrf.mxu0 }
 0x477   : > { %v2406_v50 = vsel %vm516_vm0, %v2326_v48, 0.0 }
 0x478   : > { %v2851_v51 = vpop.f32.mrf.mxu0  ;;  %v2407_v52 = vadd.f32 %v2406_v50, %v2405_v2 }
 0x47a   : > { %v2399_v53 = vpop.f32.mrf.mxu1 }
 0x47b   : > { %v2408_v54 = vsel %vm516_vm0, %v2399_v53, 0.0 }
 0x47c   : > { %v2409_v56 = vadd.f32 %v2408_v54, %v2407_v52  ;;  %v2856_v57 = vpop.f32.mrf.mxu1 }
 0x47e   : > { %v2417_v58 = vadd.f32 %v2576_v55, %v2409_v56 }
 0x480   : > { %v2418_v59 = vadd.f32 %v2417_v58, %v3012_v9  ;;  %v2577_v9 = vld [vmem:[%s3387_s11] ss:$0 sm:$0xff] }
 0x482   : > { %v2421_v60 = vsel %vm516_vm0, %v2418_v59, 0.0 }
 0x483   : > { %2422 = vadd.xlane.f32.xlu1 %v2421_v60 }
 0x50c   : > { %v2423_v61 = vpop.xlane.xlu1 %2422 }
 0x50d   : > { %v2425_v62 = vmul.f32 0.03125, %v2423_v61 }
 0x50f   : > { %v2426_v63 = vsub.f32 %v2418_v59, %v2425_v62 }
 0x511   : > { %v2427_v0 = vmul.f32 %v2426_v63, %v2426_v63 }
 0x513   : > { %v2428_v1 = vsel %vm516_vm0, %v2427_v0, 0.0 }
 0x514   : > { %2429 = vadd.xlane.f32.xlu1 %v2428_v1 }
 0x59d   : > { %v2430_v3 = vpop.xlane.xlu1 %2429 }
 0x59e   : > { %v2431_v4 = vmul.f32 0.03125, %v2430_v3 }
 0x5a0   : > { %v2432_v5 = vadd.f32 1e-12, %v2431_v4 }
 0x5a2   : > { %2885 = vrsqrt.f32 %v2432_v5 }
 0x5af   : > { %v2886_v6 = vpop.eup %2885 }
 0x5b0   : > { %v2434_v7 = vmul.f32 %v2886_v6, %v2426_v63 }
 0x5b2   : > { %v2441_v10 = vmul.f32 %v2577_v9, %v2434_v7 }
 0x5b4   : > { %v2448_v11 = vadd.f32 %v2578_v8, %v2441_v10 }
 0x5b6   : > { %2449 = vst.msk [vmem:[%s469_s20] sm:$0xff] %vm516_vm0, %v2448_v11 }
 0x5b7 PF: > { %s23_s25 = sadd.s32 1, %s2893_s25  }
 0x5b8   : > { %p20_p4 = scmp.ge.s32.totalorder %s23_s25, 4  }
 0x5ba   :  { %22 = sbr.rel (!%p20_p4) target bundleno = 1 (0x1), region = 108 }

// kernel: _lambda_.15
= control target key start
LH: loop header
LB: loop body
LE: loop exit
PB: predicated region body
PF: predicated region fallthrough
CT: control target
= control target key end

     0   :  { %s2910_s21 = smov 0   ;;  %s3320_s0 = inlined_call_operand.vmem [shape: f32[2,8,32], index: 0, kind: input, shape index: {}]   ;;  %s3321_s1 = inlined_call_operand.vmem [shape: f32[2,8,1], index: 1, kind: input, shape index: {}]   ;;  %s3322_s2 = inlined_call_operand.vmem [shape: f32[4,32,8], index: 2, kind: input, shape index: {}]   ;;  %s3323_s3 = inlined_call_operand.vmem [shape: f32[4,1,8], index: 3, kind: input, shape index: {}]   ;;  %s3324_s4 = inlined_call_operand.vmem [shape: f32[4,32,8], index: 4, kind: input, shape index: {}]   ;;  %s3325_s5 = inlined_call_operand.vmem [shape: f32[4,1,8], index: 5, kind: input, shape index: {}]   ;;  %s3326_s6 = inlined_call_operand.vmem [shape: f32[4,32,8], index: 6, kind: input, shape index: {}]   ;;  %s3327_s7 = inlined_call_operand.vmem [shape: f32[4,1,8], index: 7, kind: input, shape index: {}]   ;;  %s3328_s8 = inlined_call_operand.vmem [shape: f32[4,8,32], index: 8, kind: input, shape index: {}]   ;;  %s3329_s9 = inlined_call_operand.vmem [shape: f32[1,32], index: 9, kind: input, shape index: {}]   ;;  %s3330_s10 = inlined_call_operand.vmem [shape: f32[1,32], index: 10, kind: input, shape index: {}]   ;;  %s3331_s11 = inlined_call_operand.vmem [shape: f32[1,32], index: 11, kind: input, shape index: {}]   ;;  %s3332_s12 = inlined_call_operand.vmem [shape: f32[2,8,32], index: 12, kind: output, shape index: {}]  }
   0x1 LB: > { %s2475_s22 = sadd.s32 4294967295, %s2840_s21   ;;  %p2479_p0 = scmp.ge.s32.totalorder %s2840_s21, 1  ;;  %s2840_s21 = sphi %s2910_s21, %s22_s21  }
   0x2   : > { %p370_p1 = scmp.lt.s32.totalorder %s2840_s21, 3 }
   0x4   : > { %p371_p2 = pnand %p2479_p0, %p370_p1 }
   0x5   : > { %p414_p3 = scmp.lt.s32.totalorder (!%p371_p2), %s2475_s22, 1 }
   0x6   : > { %374 = sbr.rel (%p371_p2) target bundleno = 1463 (0x5b7), region = 68 }
   0xb   : > { %v430_v0 = vld [vmem:[%s3322_s2 + $0x18] sm:$0xff]  ;;  %v2842_v2 = vmov 0.0   ;;  %v429_v3 = vld [vmem:[%s3322_s2 + $0x10] sm:$0xff]  ;;  %s3336_s22 = smov (!%p414_p3, %s2475_s22), 1  ;;  %v428_v5 = vld [vmem:[%s3322_s2 + $0x8] sm:$0xff]  ;;  %vm471_vm0 = vcmask 261120  }
   0xc   : > { %v434_v1 = vld [vmem:[%s3322_s2 + $0x38] sm:$0xff]  ;;  %2612 = vmatprep.subr.mxu0 %v2842_v2  ;;  %2623 = vmatprep.subr.mxu1 %v2842_v2  ;;  %v433_v4 = vld [vmem:[%s3322_s2 + $0x30] sm:$0xff]  ;;  %v432_v6 = vld [vmem:[%s3322_s2 + $0x28] sm:$0xff]  ;;  %s2940_s17 = sshll.u32 %s3336_s22, 3  ;;  %vm2843_vm1 = vmmov 0   ;;  %v2844_v50 = vmov 0  }
   0xd   : > { %2613 = vmatpush3.msra.mxu0 %v430_v0  ;;  %2624 = vmatpush3.msra.mxu1 %v434_v1  ;;  %v427_v7 = vld [vmem:[%s3322_s2] sm:$0xff]  ;;  %s417_s24 = scalar_lea.vmem %s3320_s0, %s2940_s17  ;;  %v438_v10 = vld [vmem:[%s3322_s2 + $0x58] sm:$0xff]  ;;  %v437_v12 = vld [vmem:[%s3322_s2 + $0x50] sm:$0xff]  ;;  %s421_s28 = scalar_lea.vmem %s3321_s1, %s2940_s17  ;;  %vm1403_vm3 = vcmask 64512  }
   0xe   : > { %2614 = vmatprep.subr.mxu0 %v2842_v2  ;;  %2625 = vmatprep.subr.mxu1 %v2842_v2  ;;  %v431_v8 = vld [vmem:[%s3322_s2 + $0x20] sm:$0xff]  ;;  %v442_v11 = vld [vmem:[%s3322_s2 + $0x78] sm:$0xff]  ;;  %v441_v13 = vld [vmem:[%s3322_s2 + $0x70] sm:$0xff]  ;;  %s425_s20 = scalar_lea.vmem %s3332_s12, %s2940_s17 }
   0xf   : > { %2615 = vmatpush3.msra.mxu0 %v429_v3  ;;  %2626 = vmatpush3.msra.mxu1 %v433_v4  ;;  %v2954_v9 = vld [vmem:[%s417_s24] sm:$0xff]  ;;  %v436_v14 = vld [vmem:[%s3322_s2 + $0x48] sm:$0xff]  ;;  %v758_v18 = vld [vmem:[%s3324_s4 + $0x18] sm:$0xff] }
  0x10   : > { %2616 = vmatprep.subr.mxu0 %v2842_v2  ;;  %2627 = vmatprep.subr.mxu1 %v2842_v2  ;;  %v440_v15 = vld [vmem:[%s3322_s2 + $0x68] sm:$0xff]  ;;  %v435_v16 = vld [vmem:[%s3322_s2 + $0x40] sm:$0xff]  ;;  %v762_v19 = vld [vmem:[%s3324_s4 + $0x38] sm:$0xff] }
  0x11   : > { %2617 = vmatpush3.msra.mxu0 %v428_v5  ;;  %2628 = vmatpush3.msra.mxu1 %v432_v6  ;;  %v439_v17 = vld [vmem:[%s3322_s2 + $0x60] sm:$0xff]  ;;  %v757_v20 = vld [vmem:[%s3324_s4 + $0x10] sm:$0xff]  ;;  %v756_v22 = vld [vmem:[%s3324_s4 + $0x8] sm:$0xff] }
  0x12   : > { %2618 = vmatprep.subr.mxu0 %v2842_v2  ;;  %2629 = vmatprep.subr.mxu1 %v2842_v2  ;;  %v761_v21 = vld [vmem:[%s3324_s4 + $0x30] sm:$0xff]  ;;  %v760_v23 = vld [vmem:[%s3324_s4 + $0x28] sm:$0xff]  ;;  %v755_v24 = vld [vmem:[%s3324_s4] sm:$0xff] }
  0x13   : > { %2619 = vmatpush3.msra.mxu0 %v427_v7  ;;  %2620 = vmatprep.mubr.msk.f32.mxu0 %vm2843_vm1, %v2842_v2  ;;  %v759_v25 = vld [vmem:[%s3324_s4 + $0x20] sm:$0xff]  ;;  %v766_v26 = vld [vmem:[%s3324_s4 + $0x58] sm:$0xff]  ;;  %v765_v28 = vld [vmem:[%s3324_s4 + $0x50] sm:$0xff] }
  0x14   : > { %2630 = vmatpush3.msra.mxu1 %v431_v8  ;;  %2621 = vmatmul.mubr.msk.f32.vlgmr.msra.gmra.mxu0 %vm471_vm0, %v2954_v9  ;;  %v770_v27 = vld [vmem:[%s3324_s4 + $0x78] sm:$0xff]  ;;  %v769_v29 = vld [vmem:[%s3324_s4 + $0x70] sm:$0xff]  ;;  %v764_v30 = vld [vmem:[%s3324_s4 + $0x48] sm:$0xff] }
  0x15   : > { %2631 = vmatprep.mubr.msk.f32.mxu1 %vm2843_vm1, %v2842_v2  ;;  %2634 = vmatprep.subr.mxu0 %v2842_v2  ;;  %v768_v31 = vld [vmem:[%s3324_s4 + $0x68] sm:$0xff]  ;;  %v763_v32 = vld [vmem:[%s3324_s4 + $0x40] sm:$0xff]  ;;  %v1082_v34 = vld [vmem:[%s3326_s6 + $0x18] sm:$0xff] }
  0x16   : > { %2645 = vmatprep.subr.mxu1 %v2842_v2  ;;  %2632 = vmatmul.mubr.msk.f32.vlgmr.msra.gmra.mxu1 %vm471_vm0, %v2954_v9  ;;  %v767_v33 = vld [vmem:[%s3324_s4 + $0x60] sm:$0xff]  ;;  %v1086_v35 = vld [vmem:[%s3326_s6 + $0x38] sm:$0xff]  ;;  %v1081_v36 = vld [vmem:[%s3326_s6 + $0x10] sm:$0xff] }
  0x17   : > { %2635 = vmatpush3.msra.mxu0 %v438_v10  ;;  %2646 = vmatpush3.msra.mxu1 %v442_v11  ;;  %v1085_v37 = vld [vmem:[%s3326_s6 + $0x30] sm:$0xff]  ;;  %v1080_v38 = vld [vmem:[%s3326_s6 + $0x8] sm:$0xff]  ;;  %v1079_v40 = vld [vmem:[%s3326_s6] sm:$0xff] }
  0x18   : > { %2636 = vmatprep.subr.mxu0 %v2842_v2  ;;  %2647 = vmatprep.subr.mxu1 %v2842_v2  ;;  %v1084_v39 = vld [vmem:[%s3326_s6 + $0x28] sm:$0xff]  ;;  %v1083_v41 = vld [vmem:[%s3326_s6 + $0x20] sm:$0xff]  ;;  %v1090_v42 = vld [vmem:[%s3326_s6 + $0x58] sm:$0xff] }
  0x19   : > { %2637 = vmatpush3.msra.mxu0 %v437_v12  ;;  %2648 = vmatpush3.msra.mxu1 %v441_v13  ;;  %v1094_v43 = vld [vmem:[%s3326_s6 + $0x78] sm:$0xff]  ;;  %v1089_v44 = vld [vmem:[%s3326_s6 + $0x50] sm:$0xff]  ;;  %v1088_v46 = vld [vmem:[%s3326_s6 + $0x48] sm:$0xff] }
  0x1a   : > { %2638 = vmatprep.subr.mxu0 %v2842_v2  ;;  %2649 = vmatprep.subr.mxu1 %v2842_v2  ;;  %v1093_v45 = vld [vmem:[%s3326_s6 + $0x70] sm:$0xff]  ;;  %v1092_v47 = vld [vmem:[%s3326_s6 + $0x68] sm:$0xff]  ;;  %v1087_v48 = vld [vmem:[%s3326_s6 + $0x40] sm:$0xff] }
  0x1b   : > { %2639 = vmatpush3.msra.mxu0 %v436_v14  ;;  %2650 = vmatpush3.msra.mxu1 %v440_v15  ;;  %v1091_v49 = vld [vmem:[%s3326_s6 + $0x60] sm:$0xff] }
  0x1c   : > { %2640 = vmatprep.subr.mxu0 %v2842_v2  ;;  %2651 = vmatprep.subr.mxu1 %v2842_v2  ;;  %v1712_v51 = vld [vmem:[%s421_s28] sm:$0xff] }
  0x1d   : > { %2641 = vmatpush3.msra.mxu0 %v435_v16  ;;  %2642 = vmatprep.mubr.msk.f32.mxu0 %vm2843_vm1, %v2842_v2  ;;  %vm1713_vm2 = vcmp.gt.f32.partialorder %v1712_v51, 0.0  ;;  %v2491_v61 = vld [vmem:[%s3325_s5] ss:$0 sm:$0xff]  ;;  %v2492_v62 = vld [vmem:[%s3325_s5 + $0x1] ss:$0 sm:$0xff] }
  0x1e   : > { %2652 = vmatpush3.msra.mxu1 %v439_v17  ;;  %2643 = vmatmul.mubr.msk.f32.vlgmr.msra.gmra.mxu0 %vm471_vm0, %v2954_v9  ;;  %v1714_v52 = vsel %vm1713_vm2, 1, %v2844_v50  ;;  %v2483_v1 = vld [vmem:[%s3323_s3] ss:$0 sm:$0xff]  ;;  %v2484_v3 = vld [vmem:[%s3323_s3 + $0x1] ss:$0 sm:$0xff] }
  0x1f   : > { %2653 = vmatprep.mubr.msk.f32.mxu1 %vm2843_vm1, %v2842_v2  ;;  %2656 = vmatprep.subr.mxu0 %v2842_v2  ;;  %v2493_v11 = vld [vmem:[%s3325_s5 + $0x2] ss:$0 sm:$0xff]  ;;  %v2494_v12 = vld [vmem:[%s3325_s5 + $0x3] ss:$0 sm:$0xff] }
  0x20   : > { %2667 = vmatprep.subr.mxu1 %v2842_v2  ;;  %2654 = vmatmul.mubr.msk.f32.vlgmr.msra.gmra.mxu1 %vm471_vm0, %v2954_v9  ;;  %v2485_v15 = vld [vmem:[%s3323_s3 + $0x2] ss:$0 sm:$0xff]  ;;  %v2486_v16 = vld [vmem:[%s3323_s3 + $0x3] ss:$0 sm:$0xff] }
  0x21   : > { %2657 = vmatpush3.msra.mxu0 %v758_v18  ;;  %2668 = vmatpush3.msra.mxu1 %v762_v19 }
  0x22   : > { %2658 = vmatprep.subr.mxu0 %v2842_v2  ;;  %2669 = vmatprep.subr.mxu1 %v2842_v2 }
  0x23   : > { %2659 = vmatpush3.msra.mxu0 %v757_v20  ;;  %2670 = vmatpush3.msra.mxu1 %v761_v21 }
  0x24   : > { %2660 = vmatprep.subr.mxu0 %v2842_v2  ;;  %2671 = vmatprep.subr.mxu1 %v2842_v2 }
  0x25   : > { %2661 = vmatpush3.msra.mxu0 %v756_v22  ;;  %2672 = vmatpush3.msra.mxu1 %v760_v23  ;;  %v2499_v23 = vld [vmem:[%s3327_s7] ss:$0 sm:$0xff] }
  0x26   : > { %2662 = vmatprep.subr.mxu0 %v2842_v2  ;;  %2673 = vmatprep.subr.mxu1 %v2842_v2 }
  0x27   : > { %2663 = vmatpush3.msra.mxu0 %v755_v24  ;;  %2664 = vmatprep.mubr.msk.f32.mxu0 %vm2843_vm1, %v2842_v2 }
  0x28   : > { %2674 = vmatpush3.msra.mxu1 %v759_v25  ;;  %2675 = vmatprep.mubr.msk.f32.mxu1 %vm2843_vm1, %v2842_v2  ;;  %v2500_v25 = vld [vmem:[%s3327_s7 + $0x1] ss:$0 sm:$0xff] }
  0x29   : > { %2665 = vmatmul.mubr.msk.f32.vlgmr.msra.gmra.mxu0 %vm471_vm0, %v2954_v9  ;;  %2676 = vmatmul.mubr.msk.f32.vlgmr.msra.gmra.mxu1 %vm471_vm0, %v2954_v9 }
  0x2a   : > { %2678 = vmatprep.subr.mxu0 %v2842_v2  ;;  %2689 = vmatprep.subr.mxu1 %v2842_v2 }
  0x2b   : > { %2679 = vmatpush3.msra.mxu0 %v766_v26  ;;  %2690 = vmatpush3.msra.mxu1 %v770_v27 }
  0x2c   : > { %2680 = vmatprep.subr.mxu0 %v2842_v2  ;;  %2691 = vmatprep.subr.mxu1 %v2842_v2 }
  0x2d   : > { %2681 = vmatpush3.msra.mxu0 %v765_v28  ;;  %2692 = vmatpush3.msra.mxu1 %v769_v29 }
  0x2e   : > { %2682 = vmatprep.subr.mxu0 %v2842_v2  ;;  %2693 = vmatprep.subr.mxu1 %v2842_v2 }
  0x2f   : > { %2683 = vmatpush3.msra.mxu0 %v764_v30  ;;  %2694 = vmatpush3.msra.mxu1 %v768_v31 }
  0x30   : > { %2684 = vmatprep.subr.mxu0 %v2842_v2  ;;  %2695 = vmatprep.subr.mxu1 %v2842_v2 }
  0x31   : > { %2685 = vmatpush3.msra.mxu0 %v763_v32  ;;  %2686 = vmatprep.mubr.msk.f32.mxu0 %vm2843_vm1, %v2842_v2 }
  0x32   : > { %2696 = vmatpush3.msra.mxu1 %v767_v33  ;;  %2697 = vmatprep.mubr.msk.f32.mxu1 %vm2843_vm1, %v2842_v2 }
  0x33   : > { %2687 = vmatmul.mubr.msk.f32.vlgmr.msra.gmra.mxu0 %vm471_vm0, %v2954_v9  ;;  %2698 = vmatmul.mubr.msk.f32.vlgmr.msra.gmra.mxu1 %vm471_vm0, %v2954_v9 }
  0x34   : > { %2700 = vmatprep.subr.mxu0 %v2842_v2  ;;  %2711 = vmatprep.subr.mxu1 %v2842_v2 }
  0x35   : > { %2708 = vmatprep.mubr.msk.f32.mxu0 %vm2843_vm1, %v2842_v2  ;;  %2719 = vmatprep.mubr.msk.f32.mxu1 %vm2843_vm1, %v2842_v2 }
  0x36   : > { %2701 = vmatpush3.msra.mxu0 %v1082_v34  ;;  %2712 = vmatpush3.msra.mxu1 %v1086_v35  ;;  %v1719_v35 = vlaneseq }
  0x37   : > { %2702 = vmatprep.subr.mxu0 %v2842_v2  ;;  %2713 = vmatprep.subr.mxu1 %v2842_v2 }
  0x38   : > { %2703 = vmatpush3.msra.mxu0 %v1081_v36  ;;  %2714 = vmatpush3.msra.mxu1 %v1085_v37  ;;  %v1720_v36 = vshrl.u32 %v1719_v35, 7  ;;  %v1722_v37 = vand.u32 127, %v1719_v35  ;;  %v2068_v35 = vld [vmem:[%s3328_s8 + $0x8] sm:$0xff] }
  0x39   : > { %2704 = vmatprep.subr.mxu0 %v2842_v2  ;;  %2715 = vmatprep.subr.mxu1 %v2842_v2 }
  0x3a   : > { %2705 = vmatpush3.msra.mxu0 %v1080_v38  ;;  %2716 = vmatpush3.msra.mxu1 %v1084_v39  ;;  %vm1723_vm4 = vcmp.ge.s32.totalorder %v1720_v36, %v1722_v37  ;;  %v2069_v36 = vld [vmem:[%s3328_s8 + $0x10] sm:$0xff]  ;;  %v2070_v39 = vld [vmem:[%s3328_s8 + $0x18] sm:$0xff] }
  0x3b   : > { %2706 = vmatprep.subr.mxu0 %v2842_v2  ;;  %2717 = vmatprep.subr.mxu1 %v2842_v2 }
  0x3c   : > { %2707 = vmatpush3.msra.mxu0 %v1079_v40  ;;  %2718 = vmatpush3.msra.mxu1 %v1083_v41 }
  0x3d   : > { %2709 = vmatmul.mubr.msk.f32.vlgmr.msra.gmra.mxu0 %vm471_vm0, %v2954_v9  ;;  %2722 = vmatprep.subr.mxu0 %v2842_v2 }
  0x3e   : > { %2723 = vmatpush3.msra.mxu0 %v1090_v42  ;;  %2733 = vmatprep.subr.mxu1 %v2842_v2 }
  0x3f   : > { %2720 = vmatmul.mubr.msk.f32.vlgmr.msra.gmra.mxu1 %vm471_vm0, %v2954_v9  ;;  %2724 = vmatprep.subr.mxu0 %v2842_v2 }
  0x40   : > { %2734 = vmatpush3.msra.mxu1 %v1094_v43  ;;  %2725 = vmatpush3.msra.mxu0 %v1089_v44 }
  0x41   : > { %2735 = vmatprep.subr.mxu1 %v2842_v2  ;;  %2726 = vmatprep.subr.mxu0 %v2842_v2 }
  0x42   : > { %2736 = vmatpush3.msra.mxu1 %v1093_v45  ;;  %2727 = vmatpush3.msra.mxu0 %v1088_v46 }
  0x43   : > { %2737 = vmatprep.subr.mxu1 %v2842_v2  ;;  %2728 = vmatprep.subr.mxu0 %v2842_v2 }
  0x44   : > { %2738 = vmatpush3.msra.mxu1 %v1092_v47  ;;  %2730 = vmatprep.mubr.msk.f32.mxu0 %vm2843_vm1, %v2842_v2 }
  0x45   : > { %2739 = vmatprep.subr.mxu1 %v2842_v2  ;;  %2741 = vmatprep.mubr.msk.f32.mxu1 %vm2843_vm1, %v2842_v2 }
  0x46   : > { %2729 = vmatpush3.msra.mxu0 %v1087_v48  ;;  %2740 = vmatpush3.msra.mxu1 %v1091_v49 }
  0x47   : > { %2731 = vmatmul.mubr.msk.f32.vlgmr.msra.gmra.mxu0 %vm471_vm0, %v2954_v9  ;;  %2742 = vmatmul.mubr.msk.f32.vlgmr.msra.gmra.mxu1 %vm471_vm0, %v2954_v9 }
  0x48   : > { %2744 = vmatprep.subr.mxu0 %v2842_v2  ;;  %2749 = vmatprep.subr.mxu1 %v2842_v2 }
  0x49   : > { %2746 = vmatprep.mubr.msk.f32.mxu0 %vm2843_vm1, %v2842_v2  ;;  %2751 = vmatprep.mubr.msk.f32.mxu1 %vm2843_vm1, %v2842_v2 }
  0x4a   : > { %2815 = vset.pattern.permute.xlu0 %v2844_v50 }
  0x4b   : > { %1716 = vperm.xlu0 %2815, %v1714_v52  }
  0xc6   : > { %v1717_v38 = vpop.permute.xlu0 %1716 }
  0xc7   : > { %vm1718_vm5 = vcmp.eq.s32.totalorder %v1717_v38, 1 }
  0xc8   : > { %vm3232_vm6 = vmand %vm1718_vm5, %vm1723_vm4 }
  0xd4   : > { %v541_v53 = vpop.f32.mrf.mxu0 }
  0xd5   : > { %v542_v8 = vadd.f32 %v2483_v1, %v541_v53 }
  0xd6   : > { %v2622_v54 = vpop.f32.mrf.mxu0  ;;  %v611_v55 = vpop.f32.mrf.mxu1 }
  0xd7   : > { %v612_v10 = vadd.f32 %v2484_v3, %v611_v55 }
  0xd8   : > { %v2633_v56 = vpop.f32.mrf.mxu1 }
  0xde   : > { %v681_v57 = vpop.f32.mrf.mxu0 }
  0xdf   : > { %v682_v21 = vadd.f32 %v2485_v15, %v681_v57 }
  0xe0   : > { %v2644_v58 = vpop.f32.mrf.mxu0  ;;  %v751_v59 = vpop.f32.mrf.mxu1 }
  0xe1   : > { %v752_v22 = vadd.f32 %v2486_v16, %v751_v59 }
  0xe2   : > { %v2655_v60 = vpop.f32.mrf.mxu1 }
  0xe9   : > { %v865_v63 = vpop.f32.mrf.mxu0  ;;  %v935_v0 = vpop.f32.mrf.mxu1 }
  0xea   : > { %v866_v4 = vadd.f32 %v2491_v61, %v865_v63  ;;  %v936_v5 = vadd.f32 %v2492_v62, %v935_v0 }
  0xeb   : > { %v2666_v6 = vpop.f32.mrf.mxu0  ;;  %v2677_v7 = vpop.f32.mrf.mxu1 }
  0xec   : > { %2745 = vmatpush3.xpose.msk.msra.mxu0 %vm1403_vm3, %v866_v4  ;;  %2750 = vmatpush3.xpose.msk.msra.mxu1 %vm1403_vm3, %v936_v5 }
  0xed   : > { %2754 = vmatprep.subr.mxu0 %v2842_v2  ;;  %2759 = vmatprep.subr.mxu1 %v2842_v2 }
  0xef   : > { %2747 = vmatmul.mubr.msk.f32.vlgmr.msra.gmra.mxu0 %vm1403_vm3, %v542_v8  ;;  %2752 = vmatmul.mubr.msk.f32.vlgmr.msra.gmra.mxu1 %vm1403_vm3, %v612_v10 }
  0xf0   : > { %2756 = vmatprep.mubr.msk.f32.mxu0 %vm2843_vm1, %v2842_v2  ;;  %2761 = vmatprep.mubr.msk.f32.mxu1 %vm2843_vm1, %v2842_v2 }
  0xf3   : > { %v1005_v13 = vpop.f32.mrf.mxu0  ;;  %v1075_v14 = vpop.f32.mrf.mxu1 }
  0xf4   : > { %v1006_v17 = vadd.f32 %v2493_v11, %v1005_v13  ;;  %v1076_v18 = vadd.f32 %v2494_v12, %v1075_v14 }
  0xf5   : > { %v2688_v19 = vpop.f32.mrf.mxu0  ;;  %v2699_v20 = vpop.f32.mrf.mxu1 }
  0xf6   : > { %2755 = vmatpush3.xpose.msk.msra.mxu0 %vm1403_vm3, %v1006_v17  ;;  %2760 = vmatpush3.xpose.msk.msra.mxu1 %vm1403_vm3, %v1076_v18 }
  0xf7   : > { %2764 = vmatprep.subr.mxu0 %v2842_v2  ;;  %2769 = vmatprep.subr.mxu1 %v2842_v2 }
  0xf9   : > { %2757 = vmatmul.mubr.msk.f32.vlgmr.msra.gmra.mxu0 %vm1403_vm3, %v682_v21  ;;  %2762 = vmatmul.mubr.msk.f32.vlgmr.msra.gmra.mxu1 %vm1403_vm3, %v752_v22  ;;  %v2501_v21 = vld [vmem:[%s3327_s7 + $0x2] ss:$0 sm:$0xff] }
  0xfa   : > { %2766 = vmatprep.mubr.msk.f32.mxu0 %vm2843_vm1, %v2842_v2  ;;  %2771 = vmatprep.mubr.msk.f32.mxu1 %vm2843_vm1, %v2842_v2 }
  0xfd   : > { %v1189_v24 = vpop.f32.mrf.mxu0 }
  0xfe   : > { %v1190_v26 = vadd.f32 %v2499_v23, %v1189_v24 }
  0xff   : > { %v2710_v27 = vpop.f32.mrf.mxu0  ;;  %v1259_v28 = vpop.f32.mrf.mxu1 }
 0x100   : > { %v1260_v29 = vadd.f32 %v2500_v25, %v1259_v28  ;;  %2765 = vmatpush3.msra.mxu0 %v1190_v26  ;;  %v2502_v26 = vld [vmem:[%s3327_s7 + $0x3] ss:$0 sm:$0xff] }
 0x101   : > { %v2721_v30 = vpop.f32.mrf.mxu1  ;;  %2774 = vmatprep.subr.mxu0 %v2842_v2 }
 0x102   : > { %2770 = vmatpush3.msra.mxu1 %v1260_v29 }
 0x103   : > { %2779 = vmatprep.subr.mxu1 %v2842_v2 }
 0x107   : > { %v3228_v31 = vpop.f32.mrf.mxu0  ;;  %v3230_v32 = vpop.f32.mrf.mxu1 }
 0x108   : > { %v1330_v25 = vadd.f32 %v2501_v21, %v3228_v31  ;;  %v1400_v29 = vadd.f32 %v2502_v26, %v3230_v32  ;;  %v2067_v32 = vld [vmem:[%s3328_s8] sm:$0xff] }
 0x109   : > { %v2732_v33 = vpop.f32.mrf.mxu0  ;;  %v2743_v34 = vpop.f32.mrf.mxu1 }
 0x1af   : > { %v1476_v40 = vpop.f32.mrf.mxu0  ;;  %v1552_v41 = vpop.f32.mrf.mxu1 }
 0x1b0   : > { %v1708_v42 = vmul.f32 0.35355338, %v1476_v40  ;;  %v1709_v43 = vmul.f32 0.35355338, %v1552_v41 }
 0x1b1   : > { %v2748_v44 = vpop.f32.mrf.mxu0  ;;  %v2753_v45 = vpop.f32.mrf.mxu1 }
 0x1b2   : > { %v1728_v46 = vsel %vm3232_vm6, %v1709_v43, -10000.0  ;;  %v1727_v47 = vsel %vm3232_vm6, %v1708_v42, -10000.0 }
 0x1b3   : > { %v1734_v48 = vsel %vm1403_vm3, %v1728_v46, -inf  ;;  %v1731_v49 = vsel %vm1403_vm3, %v1727_v47, -inf }
 0x1b4   : > { %1735 = vmax.xlane.f32.xlu1 %v1734_v48  ;;  %1732 = vmax.xlane.f32.xlu0 %v1731_v49 }
 0x1b9   : > { %v1628_v50 = vpop.f32.mrf.mxu0  ;;  %v1704_v51 = vpop.f32.mrf.mxu1 }
 0x1ba   : > { %v1710_v52 = vmul.f32 0.35355338, %v1628_v50  ;;  %v1711_v53 = vmul.f32 0.35355338, %v1704_v51 }
 0x1bb   : > { %v2758_v54 = vpop.f32.mrf.mxu0  ;;  %v2763_v55 = vpop.f32.mrf.mxu1 }
 0x1bc   : > { %v1729_v56 = vsel %vm3232_vm6, %v1710_v52, -10000.0  ;;  %v1730_v58 = vsel %vm3232_vm6, %v1711_v53, -10000.0 }
 0x1bd   : > { %v1737_v57 = vsel %vm1403_vm3, %v1729_v56, -inf  ;;  %v1740_v59 = vsel %vm1403_vm3, %v1730_v58, -inf }
 0x1be   : > { %1738 = vmax.xlane.f32.xlu1 %v1737_v57 }
 0x1c2   : > { %1741 = vmax.xlane.f32.xlu1 %v1740_v59 }
 0x23d   : > { %v1736_v60 = vpop.xlane.xlu1 %1735  ;;  %v1733_v61 = vpop.xlane.xlu0 %1732 }
 0x23e   : > { %v1744_v62 = vsub.f32 %v1728_v46, %v1736_v60  ;;  %v1743_v63 = vsub.f32 %v1727_v47, %v1733_v61 }
 0x240   : > { %v1747_v0 = vmul.f32 1.442695, %v1743_v63  ;;  %v1749_v1 = vmul.f32 1.442695, %v1744_v62 }
 0x242   : > { %2816 = vpow2.f32 %v1747_v0 }
 0x243   : > { %2818 = vpow2.f32 %v1749_v1 }
 0x247   : > { %v1739_v3 = vpop.xlane.xlu1 %1738 }
 0x248   : > { %v1745_v4 = vsub.f32 %v1729_v56, %v1739_v3 }
 0x24a   : > { %v1751_v5 = vmul.f32 1.442695, %v1745_v4 }
 0x24b   : > { %v1742_v6 = vpop.xlane.xlu1 %1741 }
 0x24c   : > { %2820 = vpow2.f32 %v1751_v5  ;;  %v1746_v7 = vsub.f32 %v1730_v58, %v1742_v6  ;;  %v2523_v58 = vld [vmem:[%s3329_s9] ss:$0 sm:$0xff] }
 0x24e   : > { %v1753_v8 = vmul.f32 1.442695, %v1746_v7 }
 0x24f   : > { %v2817_v10 = vpop.eup %2816 }
 0x250   : > { %2822 = vpow2.f32 %v1753_v8  ;;  %v1755_v11 = vsel %vm1403_vm3, %v2817_v10, 0.0  ;;  %v2819_v12 = vpop.eup %2818 }
 0x251   : > { %1756 = vadd.xlane.f32.xlu1 %v1755_v11  ;;  %v1758_v13 = vsel %vm1403_vm3, %v2819_v12, 0.0 }
 0x255   : > { %1759 = vadd.xlane.f32.xlu1 %v1758_v13 }
 0x259   : > { %v2821_v14 = vpop.eup %2820 }
 0x25a   : > { %v1761_v15 = vsel %vm1403_vm3, %v2821_v14, 0.0 }
 0x25b   : > { %1762 = vadd.xlane.f32.xlu1 %v1761_v15 }
 0x25d   : > { %v2823_v16 = vpop.eup %2822 }
 0x25e   : > { %v1764_v17 = vsel %vm1403_vm3, %v2823_v16, 0.0 }
 0x25f   : > { %1765 = vadd.xlane.f32.xlu1 %v1764_v17 }
 0x2da   : > { %v1757_v18 = vpop.xlane.xlu1 %1756 }
 0x2db   : > { %2824 = vrcp.f32 %v1757_v18 }
 0x2de   : > { %v1760_v19 = vpop.xlane.xlu1 %1759 }
 0x2df   : > { %2826 = vrcp.f32 %v1760_v19 }
 0x2e4   : > { %v1763_v20 = vpop.xlane.xlu1 %1762 }
 0x2e5   : > { %2828 = vrcp.f32 %v1763_v20 }
 0x2e8   : > { %v1766_v22 = vpop.xlane.xlu1 %1765  ;;  %v2825_v23 = vpop.eup %2824 }
 0x2e9   : > { %2830 = vrcp.f32 %v1766_v22  ;;  %v1771_v24 = vmul.f32 %v2825_v23, %v2817_v10 }
 0x2eb   : > { %2767 = vmatmul.mubr.msk.f32.vlgmr.msra.gmra.mxu0 %vm1403_vm3, %v1771_v24 }
 0x2ec   : > { %v2827_v27 = vpop.eup %2826  ;;  %2775 = vmatpush3.msra.mxu0 %v1330_v25  ;;  %2776 = vmatprep.mubr.msk.f32.mxu0 %vm2843_vm1, %v2842_v2 }
 0x2ed   : > { %v1772_v28 = vmul.f32 %v2827_v27, %v2819_v12  ;;  %2784 = vmatprep.subr.mxu0 %v2842_v2  ;;  %v2525_v12 = vld [vmem:[%s3331_s11] ss:$0 sm:$0xff] }
 0x2ef   : > { %2772 = vmatmul.mubr.msk.f32.vlgmr.msra.gmra.mxu1 %vm1403_vm3, %v1772_v28 }
 0x2f0   : > { %2780 = vmatpush3.msra.mxu1 %v1400_v29  ;;  %2781 = vmatprep.mubr.msk.f32.mxu1 %vm2843_vm1, %v2842_v2 }
 0x2f1   : > { %2789 = vmatprep.subr.mxu1 %v2842_v2 }
 0x2f2   : > { %v2829_v30 = vpop.eup %2828 }
 0x2f3   : > { %v1773_v31 = vmul.f32 %v2829_v30, %v2821_v14 }
 0x2f5   : > { %2777 = vmatmul.mubr.msk.f32.vlgmr.msra.gmra.mxu0 %vm1403_vm3, %v1773_v31 }
 0x2f6   : > { %v2831_v33 = vpop.eup %2830  ;;  %2786 = vmatprep.mubr.msk.f32.mxu0 %vm2843_vm1, %v2842_v2  ;;  %2785 = vmatpush3.msra.mxu0 %v2067_v32 }
 0x2f7   : > { %v1774_v34 = vmul.f32 %v2831_v33, %v2823_v16  ;;  %2794 = vmatprep.subr.mxu0 %v2842_v2 }
 0x2f9   : > { %2782 = vmatmul.mubr.msk.f32.vlgmr.msra.gmra.mxu1 %vm1403_vm3, %v1774_v34 }
 0x2fa   : > { %2791 = vmatprep.mubr.msk.f32.mxu1 %vm2843_vm1, %v2842_v2  ;;  %2790 = vmatpush3.msra.mxu1 %v2068_v35 }
 0x2fb   : > { %2799 = vmatprep.subr.mxu1 %v2842_v2 }
 0x3ab   : > { %v1844_v37 = vpop.f32.mrf.mxu0 }
 0x3ac   : > { %2787 = vmatmul.mubr.msk.f32.vlgmr.msra.gmra.mxu0 %vm1403_vm3, %v1844_v37 }
 0x3ad   : > { %v2768_v38 = vpop.f32.mrf.mxu0  ;;  %2795 = vmatpush3.msra.mxu0 %v2069_v36  ;;  %2796 = vmatprep.mubr.msk.f32.mxu0 %vm2843_vm1, %v2842_v2 }
 0x3af   : > { %v1917_v40 = vpop.f32.mrf.mxu1 }
 0x3b0   : > { %2792 = vmatmul.mubr.msk.f32.vlgmr.msra.gmra.mxu1 %vm1403_vm3, %v1917_v40 }
 0x3b1   : > { %v2773_v41 = vpop.f32.mrf.mxu1  ;;  %2800 = vmatpush3.msra.mxu1 %v2070_v39  ;;  %2801 = vmatprep.mubr.msk.f32.mxu1 %vm2843_vm1, %v2842_v2 }
 0x3b5   : > { %v1990_v42 = vpop.f32.mrf.mxu0 }
 0x3b6   : > { %2797 = vmatmul.mubr.msk.f32.vlgmr.msra.gmra.mxu0 %vm1403_vm3, %v1990_v42 }
 0x3b7   : > { %v2778_v43 = vpop.f32.mrf.mxu0 }
 0x3b9   : > { %v2063_v44 = vpop.f32.mrf.mxu1 }
 0x3ba   : > { %2802 = vmatmul.mubr.msk.f32.vlgmr.msra.gmra.mxu1 %vm1403_vm3, %v2063_v44 }
 0x3bb   : > { %v2783_v45 = vpop.f32.mrf.mxu1 }
 0x46c   : > { %v2140_v46 = vpop.f32.mrf.mxu0 }
 0x46d   : > { %v2363_v52 = vsel %vm471_vm0, %v2140_v46, 0.0 }
 0x46e   : > { %v2788_v47 = vpop.f32.mrf.mxu0 }
 0x470   : > { %v2213_v48 = vpop.f32.mrf.mxu1 }
 0x471   : > { %v2364_v50 = vsel %vm471_vm0, %v2213_v48, 0.0 }
 0x472   : > { %v2793_v49 = vpop.f32.mrf.mxu1  ;;  %v2365_v2 = vadd.f32 %v2364_v50, %v2363_v52 }
 0x476   : > { %v2286_v51 = vpop.f32.mrf.mxu0 }
 0x477   : > { %v2366_v53 = vsel %vm471_vm0, %v2286_v51, 0.0 }
 0x478   : > { %v2798_v54 = vpop.f32.mrf.mxu0  ;;  %v2367_v55 = vadd.f32 %v2366_v53, %v2365_v2 }
 0x47a   : > { %v2359_v56 = vpop.f32.mrf.mxu1 }
 0x47b   : > { %v2368_v57 = vsel %vm471_vm0, %v2359_v56, 0.0 }
 0x47c   : > { %v2369_v59 = vadd.f32 %v2368_v57, %v2367_v55  ;;  %v2803_v60 = vpop.f32.mrf.mxu1 }
 0x47e   : > { %v2377_v61 = vadd.f32 %v2523_v58, %v2369_v59 }
 0x480   : > { %v2378_v62 = vadd.f32 %v2377_v61, %v2954_v9  ;;  %v2524_v9 = vld [vmem:[%s3330_s10] ss:$0 sm:$0xff] }
 0x482   : > { %v2381_v63 = vsel %vm471_vm0, %v2378_v62, 0.0 }
 0x483   : > { %2382 = vadd.xlane.f32.xlu1 %v2381_v63 }
 0x50c   : > { %v2383_v0 = vpop.xlane.xlu1 %2382 }
 0x50d   : > { %v2385_v1 = vmul.f32 0.03125, %v2383_v0 }
 0x50f   : > { %v2386_v3 = vsub.f32 %v2378_v62, %v2385_v1 }
 0x511   : > { %v2387_v4 = vmul.f32 %v2386_v3, %v2386_v3 }
 0x513   : > { %v2388_v5 = vsel %vm471_vm0, %v2387_v4, 0.0 }
 0x514   : > { %2389 = vadd.xlane.f32.xlu1 %v2388_v5 }
 0x59d   : > { %v2390_v6 = vpop.xlane.xlu1 %2389 }
 0x59e   : > { %v2391_v7 = vmul.f32 0.03125, %v2390_v6 }
 0x5a0   : > { %v2392_v8 = vadd.f32 1e-12, %v2391_v7 }
 0x5a2   : > { %2832 = vrsqrt.f32 %v2392_v8 }
 0x5af   : > { %v2833_v10 = vpop.eup %2832 }
 0x5b0   : > { %v2394_v11 = vmul.f32 %v2833_v10, %v2386_v3 }
 0x5b2   : > { %v2401_v13 = vmul.f32 %v2524_v9, %v2394_v11 }
 0x5b4   : > { %v2408_v14 = vadd.f32 %v2525_v12, %v2401_v13 }
 0x5b6   : > { %2409 = vst.msk [vmem:[%s425_s20] sm:$0xff] %vm471_vm0, %v2408_v14 }
 0x5b7 PF: > { %s22_s21 = sadd.s32 1, %s2840_s21  }
 0x5b8   : > { %p19_p4 = scmp.ge.s32.totalorder %s22_s21, 4  }
 0x5ba   :  { %21 = sbr.rel (!%p19_p4) target bundleno = 1 (0x1), region = 101 }

</bundles_post_ra>
